<compile_context>
chip_gen: v6e
topology: v6e:2x2x1
jax: 0.10.0
libtpu: 0.0.40
codegen_flags: <defaults>
</compile_context>

<pallas_src>
import jax
import jax.numpy as jnp
from jax import lax
from jax.experimental import pallas as pl
from jax.experimental.pallas import tpu as pltpu

EPS = 1e-5

# Static network configuration.
IN_C = 3        # input channels
C0 = 8          # conv1 input channels, zero-padded 3 -> 8
OC1 = 16        # conv1 output channels
OC2 = 32        # conv2 output channels
LAT = 32        # latent dim (fc1 out)
OUT = 10        # output dim (fc2 out)
LANE = 128      # lane-dense padding for every channel/feature dim
H = W = 16      # input spatial
PH = 4          # pooled spatial (after conv1 8x8 -> pool 4x4)
OH2 = 2         # conv2 output spatial

_VMEM = pl.BlockSpec(memory_space=pltpu.MemorySpace.VMEM)


# ------------------------------- fused kernel -------------------------------

def net1_fused_kernel(ph_ref, w1_ref, bgb1_ref, w2_ref, bgb2_ref,
                      wfc1_ref, wfc2_ref, bfc_ref, o_ref):
    """Whole Net1 forward for a small batch, fully resident in VMEM.

    ph_ref   : (4, 4, 5, 5*N, C0)  conv1 input, mod-4 phase layout (see wrapper)
    w1_ref   : (3, 3, C0, LANE)    conv1 taps  (kh, kw, cin, cout)   zero-padded
    bgb1_ref : (3, LANE)           rows = [conv1 bias, bn1 gamma, bn1 beta]
    w2_ref   : (3, 3, LANE, LANE)  conv2 taps
    bgb2_ref : (3, LANE)
    wfc1_ref : (4, LANE, LANE)     fc1 weight with the NCHW-flatten permutation absorbed
    wfc2_ref : (LANE, LANE)
    bfc_ref  : (2, LANE)           rows = [fc1 bias, fc2 bias]
    o_ref    : (N, LANE)           padded logits (first OUT lanes are real)
    """
    n = o_ref.shape[0]
    c0 = ph_ref.shape[-1]
    rows1 = PH * PH * n               # rows per pooling-parity accumulator

    # ---- conv1 (k=3, s=2, p=1), computed separately per 2x2-pool parity (a, b) ----
    # For output (oh, ow) = (2u+a, 2v+b): padded input row = 4u + (2a+di), col = 4v + (2b+dj),
    # which is a contiguous window of the mod-4 phase array.  Rows ordered (u, v, n).
    accs = []
    for a in range(2):
        for b in range(2):
            acc = jnp.zeros((rows1, LANE), jnp.float32)
            for di in range(3):
                for dj in range(3):
                    s = 2 * a + di
                    t = 2 * b + dj
                    rp, ip = s % 4, s // 4
                    cp, jp = t % 4, t // 4
                    win = ph_ref[rp, cp, ip:ip + PH, jp * n:(jp + PH) * n, :]
                    acc = acc + jnp.dot(win.reshape(rows1, c0), w1_ref[di, dj],
                                        preferred_element_type=jnp.float32)
            accs.append(acc + bgb1_ref[0:1, :])

    # ---- BatchNorm2d (batch stats over N*H*W) + ReLU + MaxPool2x2 epilogue ----
    r1 = 4 * rows1                    # = N * 8 * 8 conv1 positions
    mean1 = (accs[0].sum(0, keepdims=True) + accs[1].sum(0, keepdims=True)
             + accs[2].sum(0, keepdims=True) + accs[3].sum(0, keepdims=True)) / r1
    var1 = (((accs[0] - mean1) ** 2).sum(0, keepdims=True)
            + ((accs[1] - mean1) ** 2).sum(0, keepdims=True)
            + ((accs[2] - mean1) ** 2).sum(0, keepdims=True)
            + ((accs[3] - mean1) ** 2).sum(0, keepdims=True)) / r1
    scale1 = bgb1_ref[1:2, :] * lax.rsqrt(var1 + EPS)     # per-channel, computed once (EUP)
    shift1 = bgb1_ref[2:3, :] - mean1 * scale1
    ys = [jnp.maximum(acc * scale1 + shift1, 0.0) for acc in accs]
    # MaxPool2d(2,2): elementwise max over the 4 parities -> (PH*PH*n, LANE), rows (u, v, n)
    pooled = jnp.maximum(jnp.maximum(ys[0], ys[1]), jnp.maximum(ys[2], ys[3]))

    # ---- conv2 (k=3, s=2, p=1) on the 4x4 pooled grid -> 2x2, fully unrolled ----
    acc2 = []
    for oh in range(OH2):
        for ow in range(OH2):
            a2 = jnp.zeros((n, LANE), jnp.float32)
            for di in range(3):
                for dj in range(3):
                    rr = 2 * oh + di - 1
                    cc = 2 * ow + dj - 1
                    if 0 <= rr < PH and 0 <= cc < PH:     # zero-padding taps skipped statically
                        blk = pooled[(rr * PH + cc) * n:(rr * PH + cc + 1) * n, :]
                        a2 = a2 + jnp.dot(blk, w2_ref[di, dj],
                                          preferred_element_type=jnp.float32)
            acc2.append(a2 + bgb2_ref[0:1, :])

    r2 = OH2 * OH2 * n
    mean2 = (acc2[0].sum(0, keepdims=True) + acc2[1].sum(0, keepdims=True)
             + acc2[2].sum(0, keepdims=True) + acc2[3].sum(0, keepdims=True)) / r2
    var2 = (((acc2[0] - mean2) ** 2).sum(0, keepdims=True)
            + ((acc2[1] - mean2) ** 2).sum(0, keepdims=True)
            + ((acc2[2] - mean2) ** 2).sum(0, keepdims=True)
            + ((acc2[3] - mean2) ** 2).sum(0, keepdims=True)) / r2
    scale2 = bgb2_ref[1:2, :] * lax.rsqrt(var2 + EPS)
    shift2 = bgb2_ref[2:3, :] - mean2 * scale2

    # ---- flatten (NCHW channel-major order absorbed into wfc1) + fc1 + fc2 ----
    h = jnp.zeros((n, LANE), jnp.float32)
    for p2 in range(OH2 * OH2):
        y2p = jnp.maximum(acc2[p2] * scale2 + shift2, 0.0)
        h = h + jnp.dot(y2p, wfc1_ref[p2], preferred_element_type=jnp.float32)
    h = h + bfc_ref[0:1, :]
    o_ref[...] = jnp.dot(h, wfc2_ref[...],
                         preferred_element_type=jnp.float32) + bfc_ref[1:2, :]


# ------------------------------ param handling -------------------------------

def init_params(key):
    ks = jax.random.split(key, 8)
    p = {}
    p['w1'] = 0.1 * jax.random.normal(ks[0], (OC1, IN_C, 3, 3), jnp.float32)
    p['b1'] = 0.1 * jax.random.normal(ks[1], (OC1,), jnp.float32)
    p['g1'] = jnp.ones((OC1,), jnp.float32)
    p['be1'] = jnp.zeros((OC1,), jnp.float32)
    p['w2'] = 0.1 * jax.random.normal(ks[2], (OC2, OC1, 3, 3), jnp.float32)
    p['b2'] = 0.1 * jax.random.normal(ks[3], (OC2,), jnp.float32)
    p['g2'] = jnp.ones((OC2,), jnp.float32)
    p['be2'] = jnp.zeros((OC2,), jnp.float32)
    p['fc1_w'] = 0.1 * jax.random.normal(ks[4], (LAT, OC2 * OH2 * OH2), jnp.float32)
    p['fc1_b'] = 0.1 * jax.random.normal(ks[5], (LAT,), jnp.float32)
    p['fc2_w'] = 0.1 * jax.random.normal(ks[6], (OUT, LAT), jnp.float32)
    p['fc2_b'] = 0.1 * jax.random.normal(ks[7], (OUT,), jnp.float32)
    return p


def pack_params(p):
    """One-time packing: transpose / zero-pad everything to lane-dense kernel layouts."""
    def pad_vec(v):
        return jnp.pad(v.astype(jnp.float32), (0, LANE - v.shape[0]))

    w1 = jnp.transpose(p['w1'], (2, 3, 1, 0)).astype(jnp.float32)          # (3,3,Cin,OC1)
    w1 = jnp.pad(w1, ((0, 0), (0, 0), (0, C0 - IN_C), (0, LANE - OC1)))
    w2 = jnp.transpose(p['w2'], (2, 3, 1, 0)).astype(jnp.float32)          # (3,3,OC1,OC2)
    w2 = jnp.pad(w2, ((0, 0), (0, 0), (0, LANE - OC1), (0, LANE - OC2)))
    # fc1 weight acts on the PyTorch NCHW flatten (feature index = c*4 + spatial_pos);
    # split it per spatial position so the kernel never has to transpose/flatten y2.
    wfc1 = p['fc1_w'].astype(jnp.float32).reshape(LAT, OC2, OH2 * OH2)     # (j, c, pos)
    wfc1 = jnp.transpose(wfc1, (2, 1, 0))                                  # (pos, c, j)
    wfc1 = jnp.pad(wfc1, ((0, 0), (0, LANE - OC2), (0, LANE - LAT)))
    wfc2 = jnp.pad(p['fc2_w'].astype(jnp.float32).T,
                   ((0, LANE - LAT), (0, LANE - OUT)))
    return dict(
        w1=w1,
        bgb1=jnp.stack([pad_vec(p['b1']), pad_vec(p['g1']), pad_vec(p['be1'])]),
        w2=w2,
        bgb2=jnp.stack([pad_vec(p['b2']), pad_vec(p['g2']), pad_vec(p['be2'])]),
        wfc1=wfc1, wfc2=wfc2,
        bfc=jnp.stack([pad_vec(p['fc1_b']), pad_vec(p['fc2_b'])]),
    )


# --------------------------------- forward -----------------------------------

@jax.jit
def _net1_forward_impl(x, packed):
    n = x.shape[0]
    # NCHW -> NHWC, zero-pad (1 left / 3 right spatially so 16+4=20=5*4; channels 3->C0),
    # then mod-4 phase reorder: ph[r4, c4, i, j*n + b, c] = xpad[b, 4i+r4, 4j+c4, c].
    # This makes every stride-2 conv tap a contiguous static slice inside the kernel.
    xn = jnp.transpose(x, (0, 2, 3, 1)).astype(jnp.float32)                # (N,16,16,3)
    xp = jnp.pad(xn, ((0, 0), (1, 3), (1, 3), (0, C0 - IN_C)))             # (N,20,20,C0)
    ph = xp.reshape(n, 5, 4, 5, 4, C0).transpose(2, 4, 1, 3, 0, 5)         # (4,4,5,5,N,C0)
    ph = ph.reshape(4, 4, 5, 5 * n, C0)

    out_pad = pl.pallas_call(
        net1_fused_kernel,
        out_shape=jax.ShapeDtypeStruct((n, LANE), jnp.float32),
        in_specs=[_VMEM] * 8,
        out_specs=_VMEM,
    )(ph, packed['w1'], packed['bgb1'], packed['w2'], packed['bgb2'],
      packed['wfc1'], packed['wfc2'], packed['bfc'])
    return out_pad[:, :OUT]


def net1_forward(x, packed, logit=False):
    """Net1.forward(x, start_layer_idx=0[, logit]).  x: NCHW float32."""
    out = _net1_forward_impl(x, packed)
    results = {'output': out}
    if logit:                       # plain-Python flag, evaluated outside jit
        results['logit'] = out
    return results


# ----------------------- pure-JAX reference (for checking) -------------------

def net1_reference(x, p):
    prec = lax.Precision.HIGHEST

    def conv(t, w, b):
        y = lax.conv_general_dilated(t, w, (2, 2), ((1, 1), (1, 1)),
                                     dimension_numbers=('NCHW', 'OIHW', 'NCHW'),
                                     precision=prec)
        return y + b[None, :, None, None]

    def bn(t, g, be):
        mu = jnp.mean(t, axis=(0, 2, 3), keepdims=True)
        var = jnp.mean((t - mu) ** 2, axis=(0, 2, 3), keepdims=True)
        return (t - mu) * lax.rsqrt(var + EPS) * g[None, :, None, None] + be[None, :, None, None]

    y = jnp.maximum(bn(conv(x, p['w1'], p['b1']), p['g1'], p['be1']), 0.0)
    y = lax.reduce_window(y, -jnp.inf, lax.max, (1, 1, 2, 2), (1, 1, 2, 2), 'VALID')
    y = jnp.maximum(bn(conv(y, p['w2'], p['b2']), p['g2'], p['be2']), 0.0)
    z = y.reshape(y.shape[0], -1)
    z = jnp.dot(z, p['fc1_w'].T, precision=prec) + p['fc1_b']
    return jnp.dot(z, p['fc2_w'].T, precision=prec) + p['fc2_b']


if __name__ == "__main__":
    key = jax.random.PRNGKey(0)
    k_x, k_p = jax.random.split(key)
    x = jax.random.normal(k_x, (2, IN_C, H, W), jnp.float32)   # NCHW, batch=2
    params = init_params(k_p)
    packed = pack_params(params)                                # one-time weight packing

    res = net1_forward(x, packed)
    out = jax.block_until_ready(res['output'])
    assert out.shape == (2, OUT) and out.dtype == jnp.float32
    assert bool(jnp.all(jnp.isfinite(out)))

    ref = net1_reference(x, params)
    err = float(jnp.max(jnp.abs(out - ref)))
    assert err < 1e-2, f"mismatch vs pure-JAX reference: max abs err = {err}"
    print("KERNEL_OK")
</pallas_src>

<mosaic_0001>
module attributes {stable_mosaic.version = 11 : i64} {
  func.func @net1_fused_kernel(%arg0: memref<4x4x5x10x8xf32, #tpu.memory_space<vmem>>, %arg1: memref<3x3x8x128xf32, #tpu.memory_space<vmem>>, %arg2: memref<3x128xf32, #tpu.memory_space<vmem>>, %arg3: memref<3x3x128x128xf32, #tpu.memory_space<vmem>>, %arg4: memref<3x128xf32, #tpu.memory_space<vmem>>, %arg5: memref<4x128x128xf32, #tpu.memory_space<vmem>>, %arg6: memref<128x128xf32, #tpu.memory_space<vmem>>, %arg7: memref<2x128xf32, #tpu.memory_space<vmem>>, %arg8: memref<2x128xf32, #tpu.memory_space<vmem>>) attributes {dimension_semantics = [], scalar_prefetch = 0 : i64, scratch_operands = 0 : i64, tpu.core_type = #tpu.core_type<tc>} {
    %cst = arith.constant 0.000000e+00 : f32
    %0 = vector.broadcast %cst : f32 to vector<32x128xf32>
    %c0 = arith.constant 0 : index
    %c0_0 = arith.constant 0 : index
    %c0_1 = arith.constant 0 : index
    %c0_2 = arith.constant 0 : index
    %c0_3 = arith.constant 0 : index
    %1 = vector.load %arg0[%c0, %c0_0, %c0_1, %c0_2, %c0_3] : memref<4x4x5x10x8xf32, #tpu.memory_space<vmem>>, vector<1x1x4x8x8xf32>
    %2 = vector.shape_cast %1 : vector<1x1x4x8x8xf32> to vector<4x8x8xf32>
    %3 = vector.shape_cast %2 : vector<4x8x8xf32> to vector<32x8xf32>
    %c0_4 = arith.constant 0 : index
    %c0_5 = arith.constant 0 : index
    %c0_6 = arith.constant 0 : index
    %c0_7 = arith.constant 0 : index
    %4 = vector.load %arg1[%c0_4, %c0_5, %c0_6, %c0_7] : memref<3x3x8x128xf32, #tpu.memory_space<vmem>>, vector<1x1x8x128xf32>
    %5 = vector.shape_cast %4 : vector<1x1x8x128xf32> to vector<8x128xf32>
    %cst_8 = arith.constant dense<0.000000e+00> : vector<32x128xf32>
    %6 = tpu.matmul %3, %5, %cst_8 {dimension_numbers = #tpu.dot_dimension_numbers<[1], [0], [0], [1], [0, 0, 1, 1], [], []>} : vector<32x8xf32>, vector<8x128xf32>, vector<32x128xf32> -> vector<32x128xf32>
    %7 = arith.addf %0, %6 : vector<32x128xf32>
    %c0_9 = arith.constant 0 : index
    %c1 = arith.constant 1 : index
    %c0_10 = arith.constant 0 : index
    %c0_11 = arith.constant 0 : index
    %c0_12 = arith.constant 0 : index
    %8 = vector.load %arg0[%c0_9, %c1, %c0_10, %c0_11, %c0_12] : memref<4x4x5x10x8xf32, #tpu.memory_space<vmem>>, vector<1x1x4x8x8xf32>
    %9 = vector.shape_cast %8 : vector<1x1x4x8x8xf32> to vector<4x8x8xf32>
    %10 = vector.shape_cast %9 : vector<4x8x8xf32> to vector<32x8xf32>
    %c0_13 = arith.constant 0 : index
    %c1_14 = arith.constant 1 : index
    %c0_15 = arith.constant 0 : index
    %c0_16 = arith.constant 0 : index
    %11 = vector.load %arg1[%c0_13, %c1_14, %c0_15, %c0_16] : memref<3x3x8x128xf32, #tpu.memory_space<vmem>>, vector<1x1x8x128xf32>
    %12 = vector.shape_cast %11 : vector<1x1x8x128xf32> to vector<8x128xf32>
    %cst_17 = arith.constant dense<0.000000e+00> : vector<32x128xf32>
    %13 = tpu.matmul %10, %12, %cst_17 {dimension_numbers = #tpu.dot_dimension_numbers<[1], [0], [0], [1], [0, 0, 1, 1], [], []>} : vector<32x8xf32>, vector<8x128xf32>, vector<32x128xf32> -> vector<32x128xf32>
    %14 = arith.addf %7, %13 : vector<32x128xf32>
    %c0_18 = arith.constant 0 : index
    %c2 = arith.constant 2 : index
    %c0_19 = arith.constant 0 : index
    %c0_20 = arith.constant 0 : index
    %c0_21 = arith.constant 0 : index
    %15 = vector.load %arg0[%c0_18, %c2, %c0_19, %c0_20, %c0_21] : memref<4x4x5x10x8xf32, #tpu.memory_space<vmem>>, vector<1x1x4x8x8xf32>
    %16 = vector.shape_cast %15 : vector<1x1x4x8x8xf32> to vector<4x8x8xf32>
    %17 = vector.shape_cast %16 : vector<4x8x8xf32> to vector<32x8xf32>
    %c0_22 = arith.constant 0 : index
    %c2_23 = arith.constant 2 : index
    %c0_24 = arith.constant 0 : index
    %c0_25 = arith.constant 0 : index
    %18 = vector.load %arg1[%c0_22, %c2_23, %c0_24, %c0_25] : memref<3x3x8x128xf32, #tpu.memory_space<vmem>>, vector<1x1x8x128xf32>
    %19 = vector.shape_cast %18 : vector<1x1x8x128xf32> to vector<8x128xf32>
    %cst_26 = arith.constant dense<0.000000e+00> : vector<32x128xf32>
    %20 = tpu.matmul %17, %19, %cst_26 {dimension_numbers = #tpu.dot_dimension_numbers<[1], [0], [0], [1], [0, 0, 1, 1], [], []>} : vector<32x8xf32>, vector<8x128xf32>, vector<32x128xf32> -> vector<32x128xf32>
    %21 = arith.addf %14, %20 : vector<32x128xf32>
    %c1_27 = arith.constant 1 : index
    %c0_28 = arith.constant 0 : index
    %c0_29 = arith.constant 0 : index
    %c0_30 = arith.constant 0 : index
    %c0_31 = arith.constant 0 : index
    %22 = vector.load %arg0[%c1_27, %c0_28, %c0_29, %c0_30, %c0_31] : memref<4x4x5x10x8xf32, #tpu.memory_space<vmem>>, vector<1x1x4x8x8xf32>
    %23 = vector.shape_cast %22 : vector<1x1x4x8x8xf32> to vector<4x8x8xf32>
    %24 = vector.shape_cast %23 : vector<4x8x8xf32> to vector<32x8xf32>
    %c1_32 = arith.constant 1 : index
    %c0_33 = arith.constant 0 : index
    %c0_34 = arith.constant 0 : index
    %c0_35 = arith.constant 0 : index
    %25 = vector.load %arg1[%c1_32, %c0_33, %c0_34, %c0_35] : memref<3x3x8x128xf32, #tpu.memory_space<vmem>>, vector<1x1x8x128xf32>
    %26 = vector.shape_cast %25 : vector<1x1x8x128xf32> to vector<8x128xf32>
    %cst_36 = arith.constant dense<0.000000e+00> : vector<32x128xf32>
    %27 = tpu.matmul %24, %26, %cst_36 {dimension_numbers = #tpu.dot_dimension_numbers<[1], [0], [0], [1], [0, 0, 1, 1], [], []>} : vector<32x8xf32>, vector<8x128xf32>, vector<32x128xf32> -> vector<32x128xf32>
    %28 = arith.addf %21, %27 : vector<32x128xf32>
    %c1_37 = arith.constant 1 : index
    %c1_38 = arith.constant 1 : index
    %c0_39 = arith.constant 0 : index
    %c0_40 = arith.constant 0 : index
    %c0_41 = arith.constant 0 : index
    %29 = vector.load %arg0[%c1_37, %c1_38, %c0_39, %c0_40, %c0_41] : memref<4x4x5x10x8xf32, #tpu.memory_space<vmem>>, vector<1x1x4x8x8xf32>
    %30 = vector.shape_cast %29 : vector<1x1x4x8x8xf32> to vector<4x8x8xf32>
    %31 = vector.shape_cast %30 : vector<4x8x8xf32> to vector<32x8xf32>
    %c1_42 = arith.constant 1 : index
    %c1_43 = arith.constant 1 : index
    %c0_44 = arith.constant 0 : index
    %c0_45 = arith.constant 0 : index
    %32 = vector.load %arg1[%c1_42, %c1_43, %c0_44, %c0_45] : memref<3x3x8x128xf32, #tpu.memory_space<vmem>>, vector<1x1x8x128xf32>
    %33 = vector.shape_cast %32 : vector<1x1x8x128xf32> to vector<8x128xf32>
    %cst_46 = arith.constant dense<0.000000e+00> : vector<32x128xf32>
    %34 = tpu.matmul %31, %33, %cst_46 {dimension_numbers = #tpu.dot_dimension_numbers<[1], [0], [0], [1], [0, 0, 1, 1], [], []>} : vector<32x8xf32>, vector<8x128xf32>, vector<32x128xf32> -> vector<32x128xf32>
    %35 = arith.addf %28, %34 : vector<32x128xf32>
    %c1_47 = arith.constant 1 : index
    %c2_48 = arith.constant 2 : index
    %c0_49 = arith.constant 0 : index
    %c0_50 = arith.constant 0 : index
    %c0_51 = arith.constant 0 : index
    %36 = vector.load %arg0[%c1_47, %c2_48, %c0_49, %c0_50, %c0_51] : memref<4x4x5x10x8xf32, #tpu.memory_space<vmem>>, vector<1x1x4x8x8xf32>
    %37 = vector.shape_cast %36 : vector<1x1x4x8x8xf32> to vector<4x8x8xf32>
    %38 = vector.shape_cast %37 : vector<4x8x8xf32> to vector<32x8xf32>
    %c1_52 = arith.constant 1 : index
    %c2_53 = arith.constant 2 : index
    %c0_54 = arith.constant 0 : index
    %c0_55 = arith.constant 0 : index
    %39 = vector.load %arg1[%c1_52, %c2_53, %c0_54, %c0_55] : memref<3x3x8x128xf32, #tpu.memory_space<vmem>>, vector<1x1x8x128xf32>
    %40 = vector.shape_cast %39 : vector<1x1x8x128xf32> to vector<8x128xf32>
    %cst_56 = arith.constant dense<0.000000e+00> : vector<32x128xf32>
    %41 = tpu.matmul %38, %40, %cst_56 {dimension_numbers = #tpu.dot_dimension_numbers<[1], [0], [0], [1], [0, 0, 1, 1], [], []>} : vector<32x8xf32>, vector<8x128xf32>, vector<32x128xf32> -> vector<32x128xf32>
    %42 = arith.addf %35, %41 : vector<32x128xf32>
    %c2_57 = arith.constant 2 : index
    %c0_58 = arith.constant 0 : index
    %c0_59 = arith.constant 0 : index
    %c0_60 = arith.constant 0 : index
    %c0_61 = arith.constant 0 : index
    %43 = vector.load %arg0[%c2_57, %c0_58, %c0_59, %c0_60, %c0_61] : memref<4x4x5x10x8xf32, #tpu.memory_space<vmem>>, vector<1x1x4x8x8xf32>
    %44 = vector.shape_cast %43 : vector<1x1x4x8x8xf32> to vector<4x8x8xf32>
    %45 = vector.shape_cast %44 : vector<4x8x8xf32> to vector<32x8xf32>
    %c2_62 = arith.constant 2 : index
    %c0_63 = arith.constant 0 : index
    %c0_64 = arith.constant 0 : index
    %c0_65 = arith.constant 0 : index
    %46 = vector.load %arg1[%c2_62, %c0_63, %c0_64, %c0_65] : memref<3x3x8x128xf32, #tpu.memory_space<vmem>>, vector<1x1x8x128xf32>
    %47 = vector.shape_cast %46 : vector<1x1x8x128xf32> to vector<8x128xf32>
    %cst_66 = arith.constant dense<0.000000e+00> : vector<32x128xf32>
    %48 = tpu.matmul %45, %47, %cst_66 {dimension_numbers = #tpu.dot_dimension_numbers<[1], [0], [0], [1], [0, 0, 1, 1], [], []>} : vector<32x8xf32>, vector<8x128xf32>, vector<32x128xf32> -> vector<32x128xf32>
    %49 = arith.addf %42, %48 : vector<32x128xf32>
    %c2_67 = arith.constant 2 : index
    %c1_68 = arith.constant 1 : index
    %c0_69 = arith.constant 0 : index
    %c0_70 = arith.constant 0 : index
    %c0_71 = arith.constant 0 : index
    %50 = vector.load %arg0[%c2_67, %c1_68, %c0_69, %c0_70, %c0_71] : memref<4x4x5x10x8xf32, #tpu.memory_space<vmem>>, vector<1x1x4x8x8xf32>
    %51 = vector.shape_cast %50 : vector<1x1x4x8x8xf32> to vector<4x8x8xf32>
    %52 = vector.shape_cast %51 : vector<4x8x8xf32> to vector<32x8xf32>
    %c2_72 = arith.constant 2 : index
    %c1_73 = arith.constant 1 : index
    %c0_74 = arith.constant 0 : index
    %c0_75 = arith.constant 0 : index
    %53 = vector.load %arg1[%c2_72, %c1_73, %c0_74, %c0_75] : memref<3x3x8x128xf32, #tpu.memory_space<vmem>>, vector<1x1x8x128xf32>
    %54 = vector.shape_cast %53 : vector<1x1x8x128xf32> to vector<8x128xf32>
    %cst_76 = arith.constant dense<0.000000e+00> : vector<32x128xf32>
    %55 = tpu.matmul %52, %54, %cst_76 {dimension_numbers = #tpu.dot_dimension_numbers<[1], [0], [0], [1], [0, 0, 1, 1], [], []>} : vector<32x8xf32>, vector<8x128xf32>, vector<32x128xf32> -> vector<32x128xf32>
    %56 = arith.addf %49, %55 : vector<32x128xf32>
    %c2_77 = arith.constant 2 : index
    %c2_78 = arith.constant 2 : index
    %c0_79 = arith.constant 0 : index
    %c0_80 = arith.constant 0 : index
    %c0_81 = arith.constant 0 : index
    %57 = vector.load %arg0[%c2_77, %c2_78, %c0_79, %c0_80, %c0_81] : memref<4x4x5x10x8xf32, #tpu.memory_space<vmem>>, vector<1x1x4x8x8xf32>
    %58 = vector.shape_cast %57 : vector<1x1x4x8x8xf32> to vector<4x8x8xf32>
    %59 = vector.shape_cast %58 : vector<4x8x8xf32> to vector<32x8xf32>
    %c2_82 = arith.constant 2 : index
    %c2_83 = arith.constant 2 : index
    %c0_84 = arith.constant 0 : index
    %c0_85 = arith.constant 0 : index
    %60 = vector.load %arg1[%c2_82, %c2_83, %c0_84, %c0_85] : memref<3x3x8x128xf32, #tpu.memory_space<vmem>>, vector<1x1x8x128xf32>
    %61 = vector.shape_cast %60 : vector<1x1x8x128xf32> to vector<8x128xf32>
    %cst_86 = arith.constant dense<0.000000e+00> : vector<32x128xf32>
    %62 = tpu.matmul %59, %61, %cst_86 {dimension_numbers = #tpu.dot_dimension_numbers<[1], [0], [0], [1], [0, 0, 1, 1], [], []>} : vector<32x8xf32>, vector<8x128xf32>, vector<32x128xf32> -> vector<32x128xf32>
    %63 = arith.addf %56, %62 : vector<32x128xf32>
    %c0_87 = arith.constant 0 : index
    %c0_88 = arith.constant 0 : index
    %64 = vector.load %arg2[%c0_87, %c0_88] : memref<3x128xf32, #tpu.memory_space<vmem>>, vector<1x128xf32>
    %65 = vector.broadcast %64 : vector<1x128xf32> to vector<32x128xf32>
    %66 = arith.addf %63, %65 : vector<32x128xf32>
    %cst_89 = arith.constant 0.000000e+00 : f32
    %67 = vector.broadcast %cst_89 : f32 to vector<32x128xf32>
    %c0_90 = arith.constant 0 : index
    %c2_91 = arith.constant 2 : index
    %c0_92 = arith.constant 0 : index
    %c0_93 = arith.constant 0 : index
    %c0_94 = arith.constant 0 : index
    %68 = vector.load %arg0[%c0_90, %c2_91, %c0_92, %c0_93, %c0_94] : memref<4x4x5x10x8xf32, #tpu.memory_space<vmem>>, vector<1x1x4x8x8xf32>
    %69 = vector.shape_cast %68 : vector<1x1x4x8x8xf32> to vector<4x8x8xf32>
    %70 = vector.shape_cast %69 : vector<4x8x8xf32> to vector<32x8xf32>
    %c0_95 = arith.constant 0 : index
    %c0_96 = arith.constant 0 : index
    %c0_97 = arith.constant 0 : index
    %c0_98 = arith.constant 0 : index
    %71 = vector.load %arg1[%c0_95, %c0_96, %c0_97, %c0_98] : memref<3x3x8x128xf32, #tpu.memory_space<vmem>>, vector<1x1x8x128xf32>
    %72 = vector.shape_cast %71 : vector<1x1x8x128xf32> to vector<8x128xf32>
    %cst_99 = arith.constant dense<0.000000e+00> : vector<32x128xf32>
    %73 = tpu.matmul %70, %72, %cst_99 {dimension_numbers = #tpu.dot_dimension_numbers<[1], [0], [0], [1], [0, 0, 1, 1], [], []>} : vector<32x8xf32>, vector<8x128xf32>, vector<32x128xf32> -> vector<32x128xf32>
    %74 = arith.addf %67, %73 : vector<32x128xf32>
    %c0_100 = arith.constant 0 : index
    %c3 = arith.constant 3 : index
    %c0_101 = arith.constant 0 : index
    %c0_102 = arith.constant 0 : index
    %c0_103 = arith.constant 0 : index
    %75 = vector.load %arg0[%c0_100, %c3, %c0_101, %c0_102, %c0_103] : memref<4x4x5x10x8xf32, #tpu.memory_space<vmem>>, vector<1x1x4x8x8xf32>
    %76 = vector.shape_cast %75 : vector<1x1x4x8x8xf32> to vector<4x8x8xf32>
    %77 = vector.shape_cast %76 : vector<4x8x8xf32> to vector<32x8xf32>
    %c0_104 = arith.constant 0 : index
    %c1_105 = arith.constant 1 : index
    %c0_106 = arith.constant 0 : index
    %c0_107 = arith.constant 0 : index
    %78 = vector.load %arg1[%c0_104, %c1_105, %c0_106, %c0_107] : memref<3x3x8x128xf32, #tpu.memory_space<vmem>>, vector<1x1x8x128xf32>
    %79 = vector.shape_cast %78 : vector<1x1x8x128xf32> to vector<8x128xf32>
    %cst_108 = arith.constant dense<0.000000e+00> : vector<32x128xf32>
    %80 = tpu.matmul %77, %79, %cst_108 {dimension_numbers = #tpu.dot_dimension_numbers<[1], [0], [0], [1], [0, 0, 1, 1], [], []>} : vector<32x8xf32>, vector<8x128xf32>, vector<32x128xf32> -> vector<32x128xf32>
    %81 = arith.addf %74, %80 : vector<32x128xf32>
    %c0_109 = arith.constant 0 : index
    %c0_110 = arith.constant 0 : index
    %c0_111 = arith.constant 0 : index
    %c2_112 = arith.constant 2 : index
    %c0_113 = arith.constant 0 : index
    %82 = vector.load %arg0[%c0_109, %c0_110, %c0_111, %c2_112, %c0_113] : memref<4x4x5x10x8xf32, #tpu.memory_space<vmem>>, vector<1x1x4x8x8xf32>
    %83 = vector.shape_cast %82 : vector<1x1x4x8x8xf32> to vector<4x8x8xf32>
    %84 = vector.shape_cast %83 : vector<4x8x8xf32> to vector<32x8xf32>
    %c0_114 = arith.constant 0 : index
    %c2_115 = arith.constant 2 : index
    %c0_116 = arith.constant 0 : index
    %c0_117 = arith.constant 0 : index
    %85 = vector.load %arg1[%c0_114, %c2_115, %c0_116, %c0_117] : memref<3x3x8x128xf32, #tpu.memory_space<vmem>>, vector<1x1x8x128xf32>
    %86 = vector.shape_cast %85 : vector<1x1x8x128xf32> to vector<8x128xf32>
    %cst_118 = arith.constant dense<0.000000e+00> : vector<32x128xf32>
    %87 = tpu.matmul %84, %86, %cst_118 {dimension_numbers = #tpu.dot_dimension_numbers<[1], [0], [0], [1], [0, 0, 1, 1], [], []>} : vector<32x8xf32>, vector<8x128xf32>, vector<32x128xf32> -> vector<32x128xf32>
    %88 = arith.addf %81, %87 : vector<32x128xf32>
    %c1_119 = arith.constant 1 : index
    %c2_120 = arith.constant 2 : index
    %c0_121 = arith.constant 0 : index
    %c0_122 = arith.constant 0 : index
    %c0_123 = arith.constant 0 : index
    %89 = vector.load %arg0[%c1_119, %c2_120, %c0_121, %c0_122, %c0_123] : memref<4x4x5x10x8xf32, #tpu.memory_space<vmem>>, vector<1x1x4x8x8xf32>
    %90 = vector.shape_cast %89 : vector<1x1x4x8x8xf32> to vector<4x8x8xf32>
    %91 = vector.shape_cast %90 : vector<4x8x8xf32> to vector<32x8xf32>
    %c1_124 = arith.constant 1 : index
    %c0_125 = arith.constant 0 : index
    %c0_126 = arith.constant 0 : index
    %c0_127 = arith.constant 0 : index
    %92 = vector.load %arg1[%c1_124, %c0_125, %c0_126, %c0_127] : memref<3x3x8x128xf32, #tpu.memory_space<vmem>>, vector<1x1x8x128xf32>
    %93 = vector.shape_cast %92 : vector<1x1x8x128xf32> to vector<8x128xf32>
    %cst_128 = arith.constant dense<0.000000e+00> : vector<32x128xf32>
    %94 = tpu.matmul %91, %93, %cst_128 {dimension_numbers = #tpu.dot_dimension_numbers<[1], [0], [0], [1], [0, 0, 1, 1], [], []>} : vector<32x8xf32>, vector<8x128xf32>, vector<32x128xf32> -> vector<32x128xf32>
    %95 = arith.addf %88, %94 : vector<32x128xf32>
    %c1_129 = arith.constant 1 : index
    %c3_130 = arith.constant 3 : index
    %c0_131 = arith.constant 0 : index
    %c0_132 = arith.constant 0 : index
    %c0_133 = arith.constant 0 : index
    %96 = vector.load %arg0[%c1_129, %c3_130, %c0_131, %c0_132, %c0_133] : memref<4x4x5x10x8xf32, #tpu.memory_space<vmem>>, vector<1x1x4x8x8xf32>
    %97 = vector.shape_cast %96 : vector<1x1x4x8x8xf32> to vector<4x8x8xf32>
    %98 = vector.shape_cast %97 : vector<4x8x8xf32> to vector<32x8xf32>
    %c1_134 = arith.constant 1 : index
    %c1_135 = arith.constant 1 : index
    %c0_136 = arith.constant 0 : index
    %c0_137 = arith.constant 0 : index
    %99 = vector.load %arg1[%c1_134, %c1_135, %c0_136, %c0_137] : memref<3x3x8x128xf32, #tpu.memory_space<vmem>>, vector<1x1x8x128xf32>
    %100 = vector.shape_cast %99 : vector<1x1x8x128xf32> to vector<8x128xf32>
    %cst_138 = arith.constant dense<0.000000e+00> : vector<32x128xf32>
    %101 = tpu.matmul %98, %100, %cst_138 {dimension_numbers = #tpu.dot_dimension_numbers<[1], [0], [0], [1], [0, 0, 1, 1], [], []>} : vector<32x8xf32>, vector<8x128xf32>, vector<32x128xf32> -> vector<32x128xf32>
    %102 = arith.addf %95, %101 : vector<32x128xf32>
    %c1_139 = arith.constant 1 : index
    %c0_140 = arith.constant 0 : index
    %c0_141 = arith.constant 0 : index
    %c2_142 = arith.constant 2 : index
    %c0_143 = arith.constant 0 : index
    %103 = vector.load %arg0[%c1_139, %c0_140, %c0_141, %c2_142, %c0_143] : memref<4x4x5x10x8xf32, #tpu.memory_space<vmem>>, vector<1x1x4x8x8xf32>
    %104 = vector.shape_cast %103 : vector<1x1x4x8x8xf32> to vector<4x8x8xf32>
    %105 = vector.shape_cast %104 : vector<4x8x8xf32> to vector<32x8xf32>
    %c1_144 = arith.constant 1 : index
    %c2_145 = arith.constant 2 : index
    %c0_146 = arith.constant 0 : index
    %c0_147 = arith.constant 0 : index
    %106 = vector.load %arg1[%c1_144, %c2_145, %c0_146, %c0_147] : memref<3x3x8x128xf32, #tpu.memory_space<vmem>>, vector<1x1x8x128xf32>
    %107 = vector.shape_cast %106 : vector<1x1x8x128xf32> to vector<8x128xf32>
    %cst_148 = arith.constant dense<0.000000e+00> : vector<32x128xf32>
    %108 = tpu.matmul %105, %107, %cst_148 {dimension_numbers = #tpu.dot_dimension_numbers<[1], [0], [0], [1], [0, 0, 1, 1], [], []>} : vector<32x8xf32>, vector<8x128xf32>, vector<32x128xf32> -> vector<32x128xf32>
    %109 = arith.addf %102, %108 : vector<32x128xf32>
    %c2_149 = arith.constant 2 : index
    %c2_150 = arith.constant 2 : index
    %c0_151 = arith.constant 0 : index
    %c0_152 = arith.constant 0 : index
    %c0_153 = arith.constant 0 : index
    %110 = vector.load %arg0[%c2_149, %c2_150, %c0_151, %c0_152, %c0_153] : memref<4x4x5x10x8xf32, #tpu.memory_space<vmem>>, vector<1x1x4x8x8xf32>
    %111 = vector.shape_cast %110 : vector<1x1x4x8x8xf32> to vector<4x8x8xf32>
    %112 = vector.shape_cast %111 : vector<4x8x8xf32> to vector<32x8xf32>
    %c2_154 = arith.constant 2 : index
    %c0_155 = arith.constant 0 : index
    %c0_156 = arith.constant 0 : index
    %c0_157 = arith.constant 0 : index
    %113 = vector.load %arg1[%c2_154, %c0_155, %c0_156, %c0_157] : memref<3x3x8x128xf32, #tpu.memory_space<vmem>>, vector<1x1x8x128xf32>
    %114 = vector.shape_cast %113 : vector<1x1x8x128xf32> to vector<8x128xf32>
    %cst_158 = arith.constant dense<0.000000e+00> : vector<32x128xf32>
    %115 = tpu.matmul %112, %114, %cst_158 {dimension_numbers = #tpu.dot_dimension_numbers<[1], [0], [0], [1], [0, 0, 1, 1], [], []>} : vector<32x8xf32>, vector<8x128xf32>, vector<32x128xf32> -> vector<32x128xf32>
    %116 = arith.addf %109, %115 : vector<32x128xf32>
    %c2_159 = arith.constant 2 : index
    %c3_160 = arith.constant 3 : index
    %c0_161 = arith.constant 0 : index
    %c0_162 = arith.constant 0 : index
    %c0_163 = arith.constant 0 : index
    %117 = vector.load %arg0[%c2_159, %c3_160, %c0_161, %c0_162, %c0_163] : memref<4x4x5x10x8xf32, #tpu.memory_space<vmem>>, vector<1x1x4x8x8xf32>
    %118 = vector.shape_cast %117 : vector<1x1x4x8x8xf32> to vector<4x8x8xf32>
    %119 = vector.shape_cast %118 : vector<4x8x8xf32> to vector<32x8xf32>
    %c2_164 = arith.constant 2 : index
    %c1_165 = arith.constant 1 : index
    %c0_166 = arith.constant 0 : index
    %c0_167 = arith.constant 0 : index
    %120 = vector.load %arg1[%c2_164, %c1_165, %c0_166, %c0_167] : memref<3x3x8x128xf32, #tpu.memory_space<vmem>>, vector<1x1x8x128xf32>
    %121 = vector.shape_cast %120 : vector<1x1x8x128xf32> to vector<8x128xf32>
    %cst_168 = arith.constant dense<0.000000e+00> : vector<32x128xf32>
    %122 = tpu.matmul %119, %121, %cst_168 {dimension_numbers = #tpu.dot_dimension_numbers<[1], [0], [0], [1], [0, 0, 1, 1], [], []>} : vector<32x8xf32>, vector<8x128xf32>, vector<32x128xf32> -> vector<32x128xf32>
    %123 = arith.addf %116, %122 : vector<32x128xf32>
    %c2_169 = arith.constant 2 : index
    %c0_170 = arith.constant 0 : index
    %c0_171 = arith.constant 0 : index
    %c2_172 = arith.constant 2 : index
    %c0_173 = arith.constant 0 : index
    %124 = vector.load %arg0[%c2_169, %c0_170, %c0_171, %c2_172, %c0_173] : memref<4x4x5x10x8xf32, #tpu.memory_space<vmem>>, vector<1x1x4x8x8xf32>
    %125 = vector.shape_cast %124 : vector<1x1x4x8x8xf32> to vector<4x8x8xf32>
    %126 = vector.shape_cast %125 : vector<4x8x8xf32> to vector<32x8xf32>
    %c2_174 = arith.constant 2 : index
    %c2_175 = arith.constant 2 : index
    %c0_176 = arith.constant 0 : index
    %c0_177 = arith.constant 0 : index
    %127 = vector.load %arg1[%c2_174, %c2_175, %c0_176, %c0_177] : memref<3x3x8x128xf32, #tpu.memory_space<vmem>>, vector<1x1x8x128xf32>
    %128 = vector.shape_cast %127 : vector<1x1x8x128xf32> to vector<8x128xf32>
    %cst_178 = arith.constant dense<0.000000e+00> : vector<32x128xf32>
    %129 = tpu.matmul %126, %128, %cst_178 {dimension_numbers = #tpu.dot_dimension_numbers<[1], [0], [0], [1], [0, 0, 1, 1], [], []>} : vector<32x8xf32>, vector<8x128xf32>, vector<32x128xf32> -> vector<32x128xf32>
    %130 = arith.addf %123, %129 : vector<32x128xf32>
    %c0_179 = arith.constant 0 : index
    %c0_180 = arith.constant 0 : index
    %131 = vector.load %arg2[%c0_179, %c0_180] : memref<3x128xf32, #tpu.memory_space<vmem>>, vector<1x128xf32>
    %132 = vector.broadcast %131 : vector<1x128xf32> to vector<32x128xf32>
    %133 = arith.addf %130, %132 : vector<32x128xf32>
    %cst_181 = arith.constant 0.000000e+00 : f32
    %134 = vector.broadcast %cst_181 : f32 to vector<32x128xf32>
    %c2_182 = arith.constant 2 : index
    %c0_183 = arith.constant 0 : index
    %c0_184 = arith.constant 0 : index
    %c0_185 = arith.constant 0 : index
    %c0_186 = arith.constant 0 : index
    %135 = vector.load %arg0[%c2_182, %c0_183, %c0_184, %c0_185, %c0_186] : memref<4x4x5x10x8xf32, #tpu.memory_space<vmem>>, vector<1x1x4x8x8xf32>
    %136 = vector.shape_cast %135 : vector<1x1x4x8x8xf32> to vector<4x8x8xf32>
    %137 = vector.shape_cast %136 : vector<4x8x8xf32> to vector<32x8xf32>
    %c0_187 = arith.constant 0 : index
    %c0_188 = arith.constant 0 : index
    %c0_189 = arith.constant 0 : index
    %c0_190 = arith.constant 0 : index
    %138 = vector.load %arg1[%c0_187, %c0_188, %c0_189, %c0_190] : memref<3x3x8x128xf32, #tpu.memory_space<vmem>>, vector<1x1x8x128xf32>
    %139 = vector.shape_cast %138 : vector<1x1x8x128xf32> to vector<8x128xf32>
    %cst_191 = arith.constant dense<0.000000e+00> : vector<32x128xf32>
    %140 = tpu.matmul %137, %139, %cst_191 {dimension_numbers = #tpu.dot_dimension_numbers<[1], [0], [0], [1], [0, 0, 1, 1], [], []>} : vector<32x8xf32>, vector<8x128xf32>, vector<32x128xf32> -> vector<32x128xf32>
    %141 = arith.addf %134, %140 : vector<32x128xf32>
    %c2_192 = arith.constant 2 : index
    %c1_193 = arith.constant 1 : index
    %c0_194 = arith.constant 0 : index
    %c0_195 = arith.constant 0 : index
    %c0_196 = arith.constant 0 : index
    %142 = vector.load %arg0[%c2_192, %c1_193, %c0_194, %c0_195, %c0_196] : memref<4x4x5x10x8xf32, #tpu.memory_space<vmem>>, vector<1x1x4x8x8xf32>
    %143 = vector.shape_cast %142 : vector<1x1x4x8x8xf32> to vector<4x8x8xf32>
    %144 = vector.shape_cast %143 : vector<4x8x8xf32> to vector<32x8xf32>
    %c0_197 = arith.constant 0 : index
    %c1_198 = arith.constant 1 : index
    %c0_199 = arith.constant 0 : index
    %c0_200 = arith.constant 0 : index
    %145 = vector.load %arg1[%c0_197, %c1_198, %c0_199, %c0_200] : memref<3x3x8x128xf32, #tpu.memory_space<vmem>>, vector<1x1x8x128xf32>
    %146 = vector.shape_cast %145 : vector<1x1x8x128xf32> to vector<8x128xf32>
    %cst_201 = arith.constant dense<0.000000e+00> : vector<32x128xf32>
    %147 = tpu.matmul %144, %146, %cst_201 {dimension_numbers = #tpu.dot_dimension_numbers<[1], [0], [0], [1], [0, 0, 1, 1], [], []>} : vector<32x8xf32>, vector<8x128xf32>, vector<32x128xf32> -> vector<32x128xf32>
    %148 = arith.addf %141, %147 : vector<32x128xf32>
    %c2_202 = arith.constant 2 : index
    %c2_203 = arith.constant 2 : index
    %c0_204 = arith.constant 0 : index
    %c0_205 = arith.constant 0 : index
    %c0_206 = arith.constant 0 : index
    %149 = vector.load %arg0[%c2_202, %c2_203, %c0_204, %c0_205, %c0_206] : memref<4x4x5x10x8xf32, #tpu.memory_space<vmem>>, vector<1x1x4x8x8xf32>
    %150 = vector.shape_cast %149 : vector<1x1x4x8x8xf32> to vector<4x8x8xf32>
    %151 = vector.shape_cast %150 : vector<4x8x8xf32> to vector<32x8xf32>
    %c0_207 = arith.constant 0 : index
    %c2_208 = arith.constant 2 : index
    %c0_209 = arith.constant 0 : index
    %c0_210 = arith.constant 0 : index
    %152 = vector.load %arg1[%c0_207, %c2_208, %c0_209, %c0_210] : memref<3x3x8x128xf32, #tpu.memory_space<vmem>>, vector<1x1x8x128xf32>
    %153 = vector.shape_cast %152 : vector<1x1x8x128xf32> to vector<8x128xf32>
    %cst_211 = arith.constant dense<0.000000e+00> : vector<32x128xf32>
    %154 = tpu.matmul %151, %153, %cst_211 {dimension_numbers = #tpu.dot_dimension_numbers<[1], [0], [0], [1], [0, 0, 1, 1], [], []>} : vector<32x8xf32>, vector<8x128xf32>, vector<32x128xf32> -> vector<32x128xf32>
    %155 = arith.addf %148, %154 : vector<32x128xf32>
    %c3_212 = arith.constant 3 : index
    %c0_213 = arith.constant 0 : index
    %c0_214 = arith.constant 0 : index
    %c0_215 = arith.constant 0 : index
    %c0_216 = arith.constant 0 : index
    %156 = vector.load %arg0[%c3_212, %c0_213, %c0_214, %c0_215, %c0_216] : memref<4x4x5x10x8xf32, #tpu.memory_space<vmem>>, vector<1x1x4x8x8xf32>
    %157 = vector.shape_cast %156 : vector<1x1x4x8x8xf32> to vector<4x8x8xf32>
    %158 = vector.shape_cast %157 : vector<4x8x8xf32> to vector<32x8xf32>
    %c1_217 = arith.constant 1 : index
    %c0_218 = arith.constant 0 : index
    %c0_219 = arith.constant 0 : index
    %c0_220 = arith.constant 0 : index
    %159 = vector.load %arg1[%c1_217, %c0_218, %c0_219, %c0_220] : memref<3x3x8x128xf32, #tpu.memory_space<vmem>>, vector<1x1x8x128xf32>
    %160 = vector.shape_cast %159 : vector<1x1x8x128xf32> to vector<8x128xf32>
    %cst_221 = arith.constant dense<0.000000e+00> : vector<32x128xf32>
    %161 = tpu.matmul %158, %160, %cst_221 {dimension_numbers = #tpu.dot_dimension_numbers<[1], [0], [0], [1], [0, 0, 1, 1], [], []>} : vector<32x8xf32>, vector<8x128xf32>, vector<32x128xf32> -> vector<32x128xf32>
    %162 = arith.addf %155, %161 : vector<32x128xf32>
    %c3_222 = arith.constant 3 : index
    %c1_223 = arith.constant 1 : index
    %c0_224 = arith.constant 0 : index
    %c0_225 = arith.constant 0 : index
    %c0_226 = arith.constant 0 : index
    %163 = vector.load %arg0[%c3_222, %c1_223, %c0_224, %c0_225, %c0_226] : memref<4x4x5x10x8xf32, #tpu.memory_space<vmem>>, vector<1x1x4x8x8xf32>
    %164 = vector.shape_cast %163 : vector<1x1x4x8x8xf32> to vector<4x8x8xf32>
    %165 = vector.shape_cast %164 : vector<4x8x8xf32> to vector<32x8xf32>
    %c1_227 = arith.constant 1 : index
    %c1_228 = arith.constant 1 : index
    %c0_229 = arith.constant 0 : index
    %c0_230 = arith.constant 0 : index
    %166 = vector.load %arg1[%c1_227, %c1_228, %c0_229, %c0_230] : memref<3x3x8x128xf32, #tpu.memory_space<vmem>>, vector<1x1x8x128xf32>
    %167 = vector.shape_cast %166 : vector<1x1x8x128xf32> to vector<8x128xf32>
    %cst_231 = arith.constant dense<0.000000e+00> : vector<32x128xf32>
    %168 = tpu.matmul %165, %167, %cst_231 {dimension_numbers = #tpu.dot_dimension_numbers<[1], [0], [0], [1], [0, 0, 1, 1], [], []>} : vector<32x8xf32>, vector<8x128xf32>, vector<32x128xf32> -> vector<32x128xf32>
    %169 = arith.addf %162, %168 : vector<32x128xf32>
    %c3_232 = arith.constant 3 : index
    %c2_233 = arith.constant 2 : index
    %c0_234 = arith.constant 0 : index
    %c0_235 = arith.constant 0 : index
    %c0_236 = arith.constant 0 : index
    %170 = vector.load %arg0[%c3_232, %c2_233, %c0_234, %c0_235, %c0_236] : memref<4x4x5x10x8xf32, #tpu.memory_space<vmem>>, vector<1x1x4x8x8xf32>
    %171 = vector.shape_cast %170 : vector<1x1x4x8x8xf32> to vector<4x8x8xf32>
    %172 = vector.shape_cast %171 : vector<4x8x8xf32> to vector<32x8xf32>
    %c1_237 = arith.constant 1 : index
    %c2_238 = arith.constant 2 : index
    %c0_239 = arith.constant 0 : index
    %c0_240 = arith.constant 0 : index
    %173 = vector.load %arg1[%c1_237, %c2_238, %c0_239, %c0_240] : memref<3x3x8x128xf32, #tpu.memory_space<vmem>>, vector<1x1x8x128xf32>
    %174 = vector.shape_cast %173 : vector<1x1x8x128xf32> to vector<8x128xf32>
    %cst_241 = arith.constant dense<0.000000e+00> : vector<32x128xf32>
    %175 = tpu.matmul %172, %174, %cst_241 {dimension_numbers = #tpu.dot_dimension_numbers<[1], [0], [0], [1], [0, 0, 1, 1], [], []>} : vector<32x8xf32>, vector<8x128xf32>, vector<32x128xf32> -> vector<32x128xf32>
    %176 = arith.addf %169, %175 : vector<32x128xf32>
    %c0_242 = arith.constant 0 : index
    %c0_243 = arith.constant 0 : index
    %c1_244 = arith.constant 1 : index
    %c0_245 = arith.constant 0 : index
    %c0_246 = arith.constant 0 : index
    %177 = vector.load %arg0[%c0_242, %c0_243, %c1_244, %c0_245, %c0_246] : memref<4x4x5x10x8xf32, #tpu.memory_space<vmem>>, vector<1x1x4x8x8xf32>
    %178 = vector.shape_cast %177 : vector<1x1x4x8x8xf32> to vector<4x8x8xf32>
    %179 = vector.shape_cast %178 : vector<4x8x8xf32> to vector<32x8xf32>
    %c2_247 = arith.constant 2 : index
    %c0_248 = arith.constant 0 : index
    %c0_249 = arith.constant 0 : index
    %c0_250 = arith.constant 0 : index
    %180 = vector.load %arg1[%c2_247, %c0_248, %c0_249, %c0_250] : memref<3x3x8x128xf32, #tpu.memory_space<vmem>>, vector<1x1x8x128xf32>
    %181 = vector.shape_cast %180 : vector<1x1x8x128xf32> to vector<8x128xf32>
    %cst_251 = arith.constant dense<0.000000e+00> : vector<32x128xf32>
    %182 = tpu.matmul %179, %181, %cst_251 {dimension_numbers = #tpu.dot_dimension_numbers<[1], [0], [0], [1], [0, 0, 1, 1], [], []>} : vector<32x8xf32>, vector<8x128xf32>, vector<32x128xf32> -> vector<32x128xf32>
    %183 = arith.addf %176, %182 : vector<32x128xf32>
    %c0_252 = arith.constant 0 : index
    %c1_253 = arith.constant 1 : index
    %c1_254 = arith.constant 1 : index
    %c0_255 = arith.constant 0 : index
    %c0_256 = arith.constant 0 : index
    %184 = vector.load %arg0[%c0_252, %c1_253, %c1_254, %c0_255, %c0_256] : memref<4x4x5x10x8xf32, #tpu.memory_space<vmem>>, vector<1x1x4x8x8xf32>
    %185 = vector.shape_cast %184 : vector<1x1x4x8x8xf32> to vector<4x8x8xf32>
    %186 = vector.shape_cast %185 : vector<4x8x8xf32> to vector<32x8xf32>
    %c2_257 = arith.constant 2 : index
    %c1_258 = arith.constant 1 : index
    %c0_259 = arith.constant 0 : index
    %c0_260 = arith.constant 0 : index
    %187 = vector.load %arg1[%c2_257, %c1_258, %c0_259, %c0_260] : memref<3x3x8x128xf32, #tpu.memory_space<vmem>>, vector<1x1x8x128xf32>
    %188 = vector.shape_cast %187 : vector<1x1x8x128xf32> to vector<8x128xf32>
    %cst_261 = arith.constant dense<0.000000e+00> : vector<32x128xf32>
    %189 = tpu.matmul %186, %188, %cst_261 {dimension_numbers = #tpu.dot_dimension_numbers<[1], [0], [0], [1], [0, 0, 1, 1], [], []>} : vector<32x8xf32>, vector<8x128xf32>, vector<32x128xf32> -> vector<32x128xf32>
    %190 = arith.addf %183, %189 : vector<32x128xf32>
    %c0_262 = arith.constant 0 : index
    %c2_263 = arith.constant 2 : index
    %c1_264 = arith.constant 1 : index
    %c0_265 = arith.constant 0 : index
    %c0_266 = arith.constant 0 : index
    %191 = vector.load %arg0[%c0_262, %c2_263, %c1_264, %c0_265, %c0_266] : memref<4x4x5x10x8xf32, #tpu.memory_space<vmem>>, vector<1x1x4x8x8xf32>
    %192 = vector.shape_cast %191 : vector<1x1x4x8x8xf32> to vector<4x8x8xf32>
    %193 = vector.shape_cast %192 : vector<4x8x8xf32> to vector<32x8xf32>
    %c2_267 = arith.constant 2 : index
    %c2_268 = arith.constant 2 : index
    %c0_269 = arith.constant 0 : index
    %c0_270 = arith.constant 0 : index
    %194 = vector.load %arg1[%c2_267, %c2_268, %c0_269, %c0_270] : memref<3x3x8x128xf32, #tpu.memory_space<vmem>>, vector<1x1x8x128xf32>
    %195 = vector.shape_cast %194 : vector<1x1x8x128xf32> to vector<8x128xf32>
    %cst_271 = arith.constant dense<0.000000e+00> : vector<32x128xf32>
    %196 = tpu.matmul %193, %195, %cst_271 {dimension_numbers = #tpu.dot_dimension_numbers<[1], [0], [0], [1], [0, 0, 1, 1], [], []>} : vector<32x8xf32>, vector<8x128xf32>, vector<32x128xf32> -> vector<32x128xf32>
    %197 = arith.addf %190, %196 : vector<32x128xf32>
    %c0_272 = arith.constant 0 : index
    %c0_273 = arith.constant 0 : index
    %198 = vector.load %arg2[%c0_272, %c0_273] : memref<3x128xf32, #tpu.memory_space<vmem>>, vector<1x128xf32>
    %199 = vector.broadcast %198 : vector<1x128xf32> to vector<32x128xf32>
    %200 = arith.addf %197, %199 : vector<32x128xf32>
    %cst_274 = arith.constant 0.000000e+00 : f32
    %201 = vector.broadcast %cst_274 : f32 to vector<32x128xf32>
    %c2_275 = arith.constant 2 : index
    %c2_276 = arith.constant 2 : index
    %c0_277 = arith.constant 0 : index
    %c0_278 = arith.constant 0 : index
    %c0_279 = arith.constant 0 : index
    %202 = vector.load %arg0[%c2_275, %c2_276, %c0_277, %c0_278, %c0_279] : memref<4x4x5x10x8xf32, #tpu.memory_space<vmem>>, vector<1x1x4x8x8xf32>
    %203 = vector.shape_cast %202 : vector<1x1x4x8x8xf32> to vector<4x8x8xf32>
    %204 = vector.shape_cast %203 : vector<4x8x8xf32> to vector<32x8xf32>
    %c0_280 = arith.constant 0 : index
    %c0_281 = arith.constant 0 : index
    %c0_282 = arith.constant 0 : index
    %c0_283 = arith.constant 0 : index
    %205 = vector.load %arg1[%c0_280, %c0_281, %c0_282, %c0_283] : memref<3x3x8x128xf32, #tpu.memory_space<vmem>>, vector<1x1x8x128xf32>
    %206 = vector.shape_cast %205 : vector<1x1x8x128xf32> to vector<8x128xf32>
    %cst_284 = arith.constant dense<0.000000e+00> : vector<32x128xf32>
    %207 = tpu.matmul %204, %206, %cst_284 {dimension_numbers = #tpu.dot_dimension_numbers<[1], [0], [0], [1], [0, 0, 1, 1], [], []>} : vector<32x8xf32>, vector<8x128xf32>, vector<32x128xf32> -> vector<32x128xf32>
    %208 = arith.addf %201, %207 : vector<32x128xf32>
    %c2_285 = arith.constant 2 : index
    %c3_286 = arith.constant 3 : index
    %c0_287 = arith.constant 0 : index
    %c0_288 = arith.constant 0 : index
    %c0_289 = arith.constant 0 : index
    %209 = vector.load %arg0[%c2_285, %c3_286, %c0_287, %c0_288, %c0_289] : memref<4x4x5x10x8xf32, #tpu.memory_space<vmem>>, vector<1x1x4x8x8xf32>
    %210 = vector.shape_cast %209 : vector<1x1x4x8x8xf32> to vector<4x8x8xf32>
    %211 = vector.shape_cast %210 : vector<4x8x8xf32> to vector<32x8xf32>
    %c0_290 = arith.constant 0 : index
    %c1_291 = arith.constant 1 : index
    %c0_292 = arith.constant 0 : index
    %c0_293 = arith.constant 0 : index
    %212 = vector.load %arg1[%c0_290, %c1_291, %c0_292, %c0_293] : memref<3x3x8x128xf32, #tpu.memory_space<vmem>>, vector<1x1x8x128xf32>
    %213 = vector.shape_cast %212 : vector<1x1x8x128xf32> to vector<8x128xf32>
    %cst_294 = arith.constant dense<0.000000e+00> : vector<32x128xf32>
    %214 = tpu.matmul %211, %213, %cst_294 {dimension_numbers = #tpu.dot_dimension_numbers<[1], [0], [0], [1], [0, 0, 1, 1], [], []>} : vector<32x8xf32>, vector<8x128xf32>, vector<32x128xf32> -> vector<32x128xf32>
    %215 = arith.addf %208, %214 : vector<32x128xf32>
    %c2_295 = arith.constant 2 : index
    %c0_296 = arith.constant 0 : index
    %c0_297 = arith.constant 0 : index
    %c2_298 = arith.constant 2 : index
    %c0_299 = arith.constant 0 : index
    %216 = vector.load %arg0[%c2_295, %c0_296, %c0_297, %c2_298, %c0_299] : memref<4x4x5x10x8xf32, #tpu.memory_space<vmem>>, vector<1x1x4x8x8xf32>
    %217 = vector.shape_cast %216 : vector<1x1x4x8x8xf32> to vector<4x8x8xf32>
    %218 = vector.shape_cast %217 : vector<4x8x8xf32> to vector<32x8xf32>
    %c0_300 = arith.constant 0 : index
    %c2_301 = arith.constant 2 : index
    %c0_302 = arith.constant 0 : index
    %c0_303 = arith.constant 0 : index
    %219 = vector.load %arg1[%c0_300, %c2_301, %c0_302, %c0_303] : memref<3x3x8x128xf32, #tpu.memory_space<vmem>>, vector<1x1x8x128xf32>
    %220 = vector.shape_cast %219 : vector<1x1x8x128xf32> to vector<8x128xf32>
    %cst_304 = arith.constant dense<0.000000e+00> : vector<32x128xf32>
    %221 = tpu.matmul %218, %220, %cst_304 {dimension_numbers = #tpu.dot_dimension_numbers<[1], [0], [0], [1], [0, 0, 1, 1], [], []>} : vector<32x8xf32>, vector<8x128xf32>, vector<32x128xf32> -> vector<32x128xf32>
    %222 = arith.addf %215, %221 : vector<32x128xf32>
    %c3_305 = arith.constant 3 : index
    %c2_306 = arith.constant 2 : index
    %c0_307 = arith.constant 0 : index
    %c0_308 = arith.constant 0 : index
    %c0_309 = arith.constant 0 : index
    %223 = vector.load %arg0[%c3_305, %c2_306, %c0_307, %c0_308, %c0_309] : memref<4x4x5x10x8xf32, #tpu.memory_space<vmem>>, vector<1x1x4x8x8xf32>
    %224 = vector.shape_cast %223 : vector<1x1x4x8x8xf32> to vector<4x8x8xf32>
    %225 = vector.shape_cast %224 : vector<4x8x8xf32> to vector<32x8xf32>
    %c1_310 = arith.constant 1 : index
    %c0_311 = arith.constant 0 : index
    %c0_312 = arith.constant 0 : index
    %c0_313 = arith.constant 0 : index
    %226 = vector.load %arg1[%c1_310, %c0_311, %c0_312, %c0_313] : memref<3x3x8x128xf32, #tpu.memory_space<vmem>>, vector<1x1x8x128xf32>
    %227 = vector.shape_cast %226 : vector<1x1x8x128xf32> to vector<8x128xf32>
    %cst_314 = arith.constant dense<0.000000e+00> : vector<32x128xf32>
    %228 = tpu.matmul %225, %227, %cst_314 {dimension_numbers = #tpu.dot_dimension_numbers<[1], [0], [0], [1], [0, 0, 1, 1], [], []>} : vector<32x8xf32>, vector<8x128xf32>, vector<32x128xf32> -> vector<32x128xf32>
    %229 = arith.addf %222, %228 : vector<32x128xf32>
    %c3_315 = arith.constant 3 : index
    %c3_316 = arith.constant 3 : index
    %c0_317 = arith.constant 0 : index
    %c0_318 = arith.constant 0 : index
    %c0_319 = arith.constant 0 : index
    %230 = vector.load %arg0[%c3_315, %c3_316, %c0_317, %c0_318, %c0_319] : memref<4x4x5x10x8xf32, #tpu.memory_space<vmem>>, vector<1x1x4x8x8xf32>
    %231 = vector.shape_cast %230 : vector<1x1x4x8x8xf32> to vector<4x8x8xf32>
    %232 = vector.shape_cast %231 : vector<4x8x8xf32> to vector<32x8xf32>
    %c1_320 = arith.constant 1 : index
    %c1_321 = arith.constant 1 : index
    %c0_322 = arith.constant 0 : index
    %c0_323 = arith.constant 0 : index
    %233 = vector.load %arg1[%c1_320, %c1_321, %c0_322, %c0_323] : memref<3x3x8x128xf32, #tpu.memory_space<vmem>>, vector<1x1x8x128xf32>
    %234 = vector.shape_cast %233 : vector<1x1x8x128xf32> to vector<8x128xf32>
    %cst_324 = arith.constant dense<0.000000e+00> : vector<32x128xf32>
    %235 = tpu.matmul %232, %234, %cst_324 {dimension_numbers = #tpu.dot_dimension_numbers<[1], [0], [0], [1], [0, 0, 1, 1], [], []>} : vector<32x8xf32>, vector<8x128xf32>, vector<32x128xf32> -> vector<32x128xf32>
    %236 = arith.addf %229, %235 : vector<32x128xf32>
    %c3_325 = arith.constant 3 : index
    %c0_326 = arith.constant 0 : index
    %c0_327 = arith.constant 0 : index
    %c2_328 = arith.constant 2 : index
    %c0_329 = arith.constant 0 : index
    %237 = vector.load %arg0[%c3_325, %c0_326, %c0_327, %c2_328, %c0_329] : memref<4x4x5x10x8xf32, #tpu.memory_space<vmem>>, vector<1x1x4x8x8xf32>
    %238 = vector.shape_cast %237 : vector<1x1x4x8x8xf32> to vector<4x8x8xf32>
    %239 = vector.shape_cast %238 : vector<4x8x8xf32> to vector<32x8xf32>
    %c1_330 = arith.constant 1 : index
    %c2_331 = arith.constant 2 : index
    %c0_332 = arith.constant 0 : index
    %c0_333 = arith.constant 0 : index
    %240 = vector.load %arg1[%c1_330, %c2_331, %c0_332, %c0_333] : memref<3x3x8x128xf32, #tpu.memory_space<vmem>>, vector<1x1x8x128xf32>
    %241 = vector.shape_cast %240 : vector<1x1x8x128xf32> to vector<8x128xf32>
    %cst_334 = arith.constant dense<0.000000e+00> : vector<32x128xf32>
    %242 = tpu.matmul %239, %241, %cst_334 {dimension_numbers = #tpu.dot_dimension_numbers<[1], [0], [0], [1], [0, 0, 1, 1], [], []>} : vector<32x8xf32>, vector<8x128xf32>, vector<32x128xf32> -> vector<32x128xf32>
    %243 = arith.addf %236, %242 : vector<32x128xf32>
    %c0_335 = arith.constant 0 : index
    %c2_336 = arith.constant 2 : index
    %c1_337 = arith.constant 1 : index
    %c0_338 = arith.constant 0 : index
    %c0_339 = arith.constant 0 : index
    %244 = vector.load %arg0[%c0_335, %c2_336, %c1_337, %c0_338, %c0_339] : memref<4x4x5x10x8xf32, #tpu.memory_space<vmem>>, vector<1x1x4x8x8xf32>
    %245 = vector.shape_cast %244 : vector<1x1x4x8x8xf32> to vector<4x8x8xf32>
    %246 = vector.shape_cast %245 : vector<4x8x8xf32> to vector<32x8xf32>
    %c2_340 = arith.constant 2 : index
    %c0_341 = arith.constant 0 : index
    %c0_342 = arith.constant 0 : index
    %c0_343 = arith.constant 0 : index
    %247 = vector.load %arg1[%c2_340, %c0_341, %c0_342, %c0_343] : memref<3x3x8x128xf32, #tpu.memory_space<vmem>>, vector<1x1x8x128xf32>
    %248 = vector.shape_cast %247 : vector<1x1x8x128xf32> to vector<8x128xf32>
    %cst_344 = arith.constant dense<0.000000e+00> : vector<32x128xf32>
    %249 = tpu.matmul %246, %248, %cst_344 {dimension_numbers = #tpu.dot_dimension_numbers<[1], [0], [0], [1], [0, 0, 1, 1], [], []>} : vector<32x8xf32>, vector<8x128xf32>, vector<32x128xf32> -> vector<32x128xf32>
    %250 = arith.addf %243, %249 : vector<32x128xf32>
    %c0_345 = arith.constant 0 : index
    %c3_346 = arith.constant 3 : index
    %c1_347 = arith.constant 1 : index
    %c0_348 = arith.constant 0 : index
    %c0_349 = arith.constant 0 : index
    %251 = vector.load %arg0[%c0_345, %c3_346, %c1_347, %c0_348, %c0_349] : memref<4x4x5x10x8xf32, #tpu.memory_space<vmem>>, vector<1x1x4x8x8xf32>
    %252 = vector.shape_cast %251 : vector<1x1x4x8x8xf32> to vector<4x8x8xf32>
    %253 = vector.shape_cast %252 : vector<4x8x8xf32> to vector<32x8xf32>
    %c2_350 = arith.constant 2 : index
    %c1_351 = arith.constant 1 : index
    %c0_352 = arith.constant 0 : index
    %c0_353 = arith.constant 0 : index
    %254 = vector.load %arg1[%c2_350, %c1_351, %c0_352, %c0_353] : memref<3x3x8x128xf32, #tpu.memory_space<vmem>>, vector<1x1x8x128xf32>
    %255 = vector.shape_cast %254 : vector<1x1x8x128xf32> to vector<8x128xf32>
    %cst_354 = arith.constant dense<0.000000e+00> : vector<32x128xf32>
    %256 = tpu.matmul %253, %255, %cst_354 {dimension_numbers = #tpu.dot_dimension_numbers<[1], [0], [0], [1], [0, 0, 1, 1], [], []>} : vector<32x8xf32>, vector<8x128xf32>, vector<32x128xf32> -> vector<32x128xf32>
    %257 = arith.addf %250, %256 : vector<32x128xf32>
    %c0_355 = arith.constant 0 : index
    %c0_356 = arith.constant 0 : index
    %c1_357 = arith.constant 1 : index
    %c2_358 = arith.constant 2 : index
    %c0_359 = arith.constant 0 : index
    %258 = vector.load %arg0[%c0_355, %c0_356, %c1_357, %c2_358, %c0_359] : memref<4x4x5x10x8xf32, #tpu.memory_space<vmem>>, vector<1x1x4x8x8xf32>
    %259 = vector.shape_cast %258 : vector<1x1x4x8x8xf32> to vector<4x8x8xf32>
    %260 = vector.shape_cast %259 : vector<4x8x8xf32> to vector<32x8xf32>
    %c2_360 = arith.constant 2 : index
    %c2_361 = arith.constant 2 : index
    %c0_362 = arith.constant 0 : index
    %c0_363 = arith.constant 0 : index
    %261 = vector.load %arg1[%c2_360, %c2_361, %c0_362, %c0_363] : memref<3x3x8x128xf32, #tpu.memory_space<vmem>>, vector<1x1x8x128xf32>
    %262 = vector.shape_cast %261 : vector<1x1x8x128xf32> to vector<8x128xf32>
    %cst_364 = arith.constant dense<0.000000e+00> : vector<32x128xf32>
    %263 = tpu.matmul %260, %262, %cst_364 {dimension_numbers = #tpu.dot_dimension_numbers<[1], [0], [0], [1], [0, 0, 1, 1], [], []>} : vector<32x8xf32>, vector<8x128xf32>, vector<32x128xf32> -> vector<32x128xf32>
    %264 = arith.addf %257, %263 : vector<32x128xf32>
    %c0_365 = arith.constant 0 : index
    %c0_366 = arith.constant 0 : index
    %265 = vector.load %arg2[%c0_365, %c0_366] : memref<3x128xf32, #tpu.memory_space<vmem>>, vector<1x128xf32>
    %266 = vector.broadcast %265 : vector<1x128xf32> to vector<32x128xf32>
    %267 = arith.addf %264, %266 : vector<32x128xf32>
    %cst_367 = arith.constant dense<0.000000e+00> : vector<128xf32>
    %268 = vector.multi_reduction <add>, %66, %cst_367 [0] : vector<32x128xf32> to vector<128xf32>
    %269 = vector.shape_cast %268 : vector<128xf32> to vector<1x128xf32>
    %cst_368 = arith.constant dense<0.000000e+00> : vector<128xf32>
    %270 = vector.multi_reduction <add>, %133, %cst_368 [0] : vector<32x128xf32> to vector<128xf32>
    %271 = vector.shape_cast %270 : vector<128xf32> to vector<1x128xf32>
    %272 = arith.addf %269, %271 : vector<1x128xf32>
    %cst_369 = arith.constant dense<0.000000e+00> : vector<128xf32>
    %273 = vector.multi_reduction <add>, %200, %cst_369 [0] : vector<32x128xf32> to vector<128xf32>
    %274 = vector.shape_cast %273 : vector<128xf32> to vector<1x128xf32>
    %275 = arith.addf %272, %274 : vector<1x128xf32>
    %cst_370 = arith.constant dense<0.000000e+00> : vector<128xf32>
    %276 = vector.multi_reduction <add>, %267, %cst_370 [0] : vector<32x128xf32> to vector<128xf32>
    %277 = vector.shape_cast %276 : vector<128xf32> to vector<1x128xf32>
    %278 = arith.addf %275, %277 : vector<1x128xf32>
    %cst_371 = arith.constant 1.280000e+02 : f32
    %279 = vector.broadcast %cst_371 : f32 to vector<1x128xf32>
    %280 = arith.divf %278, %279 : vector<1x128xf32>
    %281 = vector.broadcast %280 : vector<1x128xf32> to vector<32x128xf32>
    %282 = arith.subf %66, %281 : vector<32x128xf32>
    %283 = arith.mulf %282, %282 : vector<32x128xf32>
    %cst_372 = arith.constant dense<0.000000e+00> : vector<128xf32>
    %284 = vector.multi_reduction <add>, %283, %cst_372 [0] : vector<32x128xf32> to vector<128xf32>
    %285 = vector.shape_cast %284 : vector<128xf32> to vector<1x128xf32>
    %286 = vector.broadcast %280 : vector<1x128xf32> to vector<32x128xf32>
    %287 = arith.subf %133, %286 : vector<32x128xf32>
    %288 = arith.mulf %287, %287 : vector<32x128xf32>
    %cst_373 = arith.constant dense<0.000000e+00> : vector<128xf32>
    %289 = vector.multi_reduction <add>, %288, %cst_373 [0] : vector<32x128xf32> to vector<128xf32>
    %290 = vector.shape_cast %289 : vector<128xf32> to vector<1x128xf32>
    %291 = arith.addf %285, %290 : vector<1x128xf32>
    %292 = vector.broadcast %280 : vector<1x128xf32> to vector<32x128xf32>
    %293 = arith.subf %200, %292 : vector<32x128xf32>
    %294 = arith.mulf %293, %293 : vector<32x128xf32>
    %cst_374 = arith.constant dense<0.000000e+00> : vector<128xf32>
    %295 = vector.multi_reduction <add>, %294, %cst_374 [0] : vector<32x128xf32> to vector<128xf32>
    %296 = vector.shape_cast %295 : vector<128xf32> to vector<1x128xf32>
    %297 = arith.addf %291, %296 : vector<1x128xf32>
    %298 = vector.broadcast %280 : vector<1x128xf32> to vector<32x128xf32>
    %299 = arith.subf %267, %298 : vector<32x128xf32>
    %300 = arith.mulf %299, %299 : vector<32x128xf32>
    %cst_375 = arith.constant dense<0.000000e+00> : vector<128xf32>
    %301 = vector.multi_reduction <add>, %300, %cst_375 [0] : vector<32x128xf32> to vector<128xf32>
    %302 = vector.shape_cast %301 : vector<128xf32> to vector<1x128xf32>
    %303 = arith.addf %297, %302 : vector<1x128xf32>
    %cst_376 = arith.constant 1.280000e+02 : f32
    %304 = vector.broadcast %cst_376 : f32 to vector<1x128xf32>
    %305 = arith.divf %303, %304 : vector<1x128xf32>
    %c1_377 = arith.constant 1 : index
    %c0_378 = arith.constant 0 : index
    %306 = vector.load %arg2[%c1_377, %c0_378] : memref<3x128xf32, #tpu.memory_space<vmem>>, vector<1x128xf32>
    %cst_379 = arith.constant 9.99999974E-6 : f32
    %307 = vector.broadcast %cst_379 : f32 to vector<1x128xf32>
    %308 = arith.addf %305, %307 : vector<1x128xf32>
    %309 = math.rsqrt %308 : vector<1x128xf32>
    %310 = arith.mulf %306, %309 : vector<1x128xf32>
    %c2_380 = arith.constant 2 : index
    %c0_381 = arith.constant 0 : index
    %311 = vector.load %arg2[%c2_380, %c0_381] : memref<3x128xf32, #tpu.memory_space<vmem>>, vector<1x128xf32>
    %312 = arith.mulf %280, %310 : vector<1x128xf32>
    %313 = arith.subf %311, %312 : vector<1x128xf32>
    %314 = vector.broadcast %310 : vector<1x128xf32> to vector<32x128xf32>
    %315 = arith.mulf %66, %314 : vector<32x128xf32>
    %316 = vector.broadcast %313 : vector<1x128xf32> to vector<32x128xf32>
    %317 = arith.addf %315, %316 : vector<32x128xf32>
    %cst_382 = arith.constant 0.000000e+00 : f32
    %318 = vector.broadcast %cst_382 : f32 to vector<32x128xf32>
    %319 = arith.maximumf %317, %318 : vector<32x128xf32>
    %320 = vector.broadcast %310 : vector<1x128xf32> to vector<32x128xf32>
    %321 = arith.mulf %133, %320 : vector<32x128xf32>
    %322 = vector.broadcast %313 : vector<1x128xf32> to vector<32x128xf32>
    %323 = arith.addf %321, %322 : vector<32x128xf32>
    %cst_383 = arith.constant 0.000000e+00 : f32
    %324 = vector.broadcast %cst_383 : f32 to vector<32x128xf32>
    %325 = arith.maximumf %323, %324 : vector<32x128xf32>
    %326 = vector.broadcast %310 : vector<1x128xf32> to vector<32x128xf32>
    %327 = arith.mulf %200, %326 : vector<32x128xf32>
    %328 = vector.broadcast %313 : vector<1x128xf32> to vector<32x128xf32>
    %329 = arith.addf %327, %328 : vector<32x128xf32>
    %cst_384 = arith.constant 0.000000e+00 : f32
    %330 = vector.broadcast %cst_384 : f32 to vector<32x128xf32>
    %331 = arith.maximumf %329, %330 : vector<32x128xf32>
    %332 = vector.broadcast %310 : vector<1x128xf32> to vector<32x128xf32>
    %333 = arith.mulf %267, %332 : vector<32x128xf32>
    %334 = vector.broadcast %313 : vector<1x128xf32> to vector<32x128xf32>
    %335 = arith.addf %333, %334 : vector<32x128xf32>
    %cst_385 = arith.constant 0.000000e+00 : f32
    %336 = vector.broadcast %cst_385 : f32 to vector<32x128xf32>
    %337 = arith.maximumf %335, %336 : vector<32x128xf32>
    %338 = arith.maximumf %319, %325 : vector<32x128xf32>
    %339 = arith.maximumf %331, %337 : vector<32x128xf32>
    %340 = arith.maximumf %338, %339 : vector<32x128xf32>
    %cst_386 = arith.constant 0.000000e+00 : f32
    %341 = vector.broadcast %cst_386 : f32 to vector<2x128xf32>
    %342 = vector.extract_strided_slice %340 {offsets = [0, 0], sizes = [2, 128], strides = [1, 1]} : vector<32x128xf32> to vector<2x128xf32>
    %c1_387 = arith.constant 1 : index
    %c1_388 = arith.constant 1 : index
    %c0_389 = arith.constant 0 : index
    %c0_390 = arith.constant 0 : index
    %343 = vector.load %arg3[%c1_387, %c1_388, %c0_389, %c0_390] : memref<3x3x128x128xf32, #tpu.memory_space<vmem>>, vector<1x1x128x128xf32>
    %344 = vector.shape_cast %343 : vector<1x1x128x128xf32> to vector<128x128xf32>
    %cst_391 = arith.constant dense<0.000000e+00> : vector<2x128xf32>
    %345 = tpu.matmul %342, %344, %cst_391 {dimension_numbers = #tpu.dot_dimension_numbers<[1], [0], [0], [1], [0, 0, 1, 1], [], []>} : vector<2x128xf32>, vector<128x128xf32>, vector<2x128xf32> -> vector<2x128xf32>
    %346 = arith.addf %341, %345 : vector<2x128xf32>
    %347 = vector.extract_strided_slice %340 {offsets = [2, 0], sizes = [2, 128], strides = [1, 1]} : vector<32x128xf32> to vector<2x128xf32>
    %c1_392 = arith.constant 1 : index
    %c2_393 = arith.constant 2 : index
    %c0_394 = arith.constant 0 : index
    %c0_395 = arith.constant 0 : index
    %348 = vector.load %arg3[%c1_392, %c2_393, %c0_394, %c0_395] : memref<3x3x128x128xf32, #tpu.memory_space<vmem>>, vector<1x1x128x128xf32>
    %349 = vector.shape_cast %348 : vector<1x1x128x128xf32> to vector<128x128xf32>
    %cst_396 = arith.constant dense<0.000000e+00> : vector<2x128xf32>
    %350 = tpu.matmul %347, %349, %cst_396 {dimension_numbers = #tpu.dot_dimension_numbers<[1], [0], [0], [1], [0, 0, 1, 1], [], []>} : vector<2x128xf32>, vector<128x128xf32>, vector<2x128xf32> -> vector<2x128xf32>
    %351 = arith.addf %346, %350 : vector<2x128xf32>
    %352 = vector.extract_strided_slice %340 {offsets = [8, 0], sizes = [2, 128], strides = [1, 1]} : vector<32x128xf32> to vector<2x128xf32>
    %c2_397 = arith.constant 2 : index
    %c1_398 = arith.constant 1 : index
    %c0_399 = arith.constant 0 : index
    %c0_400 = arith.constant 0 : index
    %353 = vector.load %arg3[%c2_397, %c1_398, %c0_399, %c0_400] : memref<3x3x128x128xf32, #tpu.memory_space<vmem>>, vector<1x1x128x128xf32>
    %354 = vector.shape_cast %353 : vector<1x1x128x128xf32> to vector<128x128xf32>
    %cst_401 = arith.constant dense<0.000000e+00> : vector<2x128xf32>
    %355 = tpu.matmul %352, %354, %cst_401 {dimension_numbers = #tpu.dot_dimension_numbers<[1], [0], [0], [1], [0, 0, 1, 1], [], []>} : vector<2x128xf32>, vector<128x128xf32>, vector<2x128xf32> -> vector<2x128xf32>
    %356 = arith.addf %351, %355 : vector<2x128xf32>
    %357 = vector.extract_strided_slice %340 {offsets = [10, 0], sizes = [2, 128], strides = [1, 1]} : vector<32x128xf32> to vector<2x128xf32>
    %c2_402 = arith.constant 2 : index
    %c2_403 = arith.constant 2 : index
    %c0_404 = arith.constant 0 : index
    %c0_405 = arith.constant 0 : index
    %358 = vector.load %arg3[%c2_402, %c2_403, %c0_404, %c0_405] : memref<3x3x128x128xf32, #tpu.memory_space<vmem>>, vector<1x1x128x128xf32>
    %359 = vector.shape_cast %358 : vector<1x1x128x128xf32> to vector<128x128xf32>
    %cst_406 = arith.constant dense<0.000000e+00> : vector<2x128xf32>
    %360 = tpu.matmul %357, %359, %cst_406 {dimension_numbers = #tpu.dot_dimension_numbers<[1], [0], [0], [1], [0, 0, 1, 1], [], []>} : vector<2x128xf32>, vector<128x128xf32>, vector<2x128xf32> -> vector<2x128xf32>
    %361 = arith.addf %356, %360 : vector<2x128xf32>
    %c0_407 = arith.constant 0 : index
    %c0_408 = arith.constant 0 : index
    %362 = vector.load %arg4[%c0_407, %c0_408] : memref<3x128xf32, #tpu.memory_space<vmem>>, vector<1x128xf32>
    %363 = vector.broadcast %362 : vector<1x128xf32> to vector<2x128xf32>
    %364 = arith.addf %361, %363 : vector<2x128xf32>
    %cst_409 = arith.constant 0.000000e+00 : f32
    %365 = vector.broadcast %cst_409 : f32 to vector<2x128xf32>
    %366 = vector.extract_strided_slice %340 {offsets = [2, 0], sizes = [2, 128], strides = [1, 1]} : vector<32x128xf32> to vector<2x128xf32>
    %c1_410 = arith.constant 1 : index
    %c0_411 = arith.constant 0 : index
    %c0_412 = arith.constant 0 : index
    %c0_413 = arith.constant 0 : index
    %367 = vector.load %arg3[%c1_410, %c0_411, %c0_412, %c0_413] : memref<3x3x128x128xf32, #tpu.memory_space<vmem>>, vector<1x1x128x128xf32>
    %368 = vector.shape_cast %367 : vector<1x1x128x128xf32> to vector<128x128xf32>
    %cst_414 = arith.constant dense<0.000000e+00> : vector<2x128xf32>
    %369 = tpu.matmul %366, %368, %cst_414 {dimension_numbers = #tpu.dot_dimension_numbers<[1], [0], [0], [1], [0, 0, 1, 1], [], []>} : vector<2x128xf32>, vector<128x128xf32>, vector<2x128xf32> -> vector<2x128xf32>
    %370 = arith.addf %365, %369 : vector<2x128xf32>
    %371 = vector.extract_strided_slice %340 {offsets = [4, 0], sizes = [2, 128], strides = [1, 1]} : vector<32x128xf32> to vector<2x128xf32>
    %c1_415 = arith.constant 1 : index
    %c1_416 = arith.constant 1 : index
    %c0_417 = arith.constant 0 : index
    %c0_418 = arith.constant 0 : index
    %372 = vector.load %arg3[%c1_415, %c1_416, %c0_417, %c0_418] : memref<3x3x128x128xf32, #tpu.memory_space<vmem>>, vector<1x1x128x128xf32>
    %373 = vector.shape_cast %372 : vector<1x1x128x128xf32> to vector<128x128xf32>
    %cst_419 = arith.constant dense<0.000000e+00> : vector<2x128xf32>
    %374 = tpu.matmul %371, %373, %cst_419 {dimension_numbers = #tpu.dot_dimension_numbers<[1], [0], [0], [1], [0, 0, 1, 1], [], []>} : vector<2x128xf32>, vector<128x128xf32>, vector<2x128xf32> -> vector<2x128xf32>
    %375 = arith.addf %370, %374 : vector<2x128xf32>
    %376 = vector.extract_strided_slice %340 {offsets = [6, 0], sizes = [2, 128], strides = [1, 1]} : vector<32x128xf32> to vector<2x128xf32>
    %c1_420 = arith.constant 1 : index
    %c2_421 = arith.constant 2 : index
    %c0_422 = arith.constant 0 : index
    %c0_423 = arith.constant 0 : index
    %377 = vector.load %arg3[%c1_420, %c2_421, %c0_422, %c0_423] : memref<3x3x128x128xf32, #tpu.memory_space<vmem>>, vector<1x1x128x128xf32>
    %378 = vector.shape_cast %377 : vector<1x1x128x128xf32> to vector<128x128xf32>
    %cst_424 = arith.constant dense<0.000000e+00> : vector<2x128xf32>
    %379 = tpu.matmul %376, %378, %cst_424 {dimension_numbers = #tpu.dot_dimension_numbers<[1], [0], [0], [1], [0, 0, 1, 1], [], []>} : vector<2x128xf32>, vector<128x128xf32>, vector<2x128xf32> -> vector<2x128xf32>
    %380 = arith.addf %375, %379 : vector<2x128xf32>
    %381 = vector.extract_strided_slice %340 {offsets = [10, 0], sizes = [2, 128], strides = [1, 1]} : vector<32x128xf32> to vector<2x128xf32>
    %c2_425 = arith.constant 2 : index
    %c0_426 = arith.constant 0 : index
    %c0_427 = arith.constant 0 : index
    %c0_428 = arith.constant 0 : index
    %382 = vector.load %arg3[%c2_425, %c0_426, %c0_427, %c0_428] : memref<3x3x128x128xf32, #tpu.memory_space<vmem>>, vector<1x1x128x128xf32>
    %383 = vector.shape_cast %382 : vector<1x1x128x128xf32> to vector<128x128xf32>
    %cst_429 = arith.constant dense<0.000000e+00> : vector<2x128xf32>
    %384 = tpu.matmul %381, %383, %cst_429 {dimension_numbers = #tpu.dot_dimension_numbers<[1], [0], [0], [1], [0, 0, 1, 1], [], []>} : vector<2x128xf32>, vector<128x128xf32>, vector<2x128xf32> -> vector<2x128xf32>
    %385 = arith.addf %380, %384 : vector<2x128xf32>
    %386 = vector.extract_strided_slice %340 {offsets = [12, 0], sizes = [2, 128], strides = [1, 1]} : vector<32x128xf32> to vector<2x128xf32>
    %c2_430 = arith.constant 2 : index
    %c1_431 = arith.constant 1 : index
    %c0_432 = arith.constant 0 : index
    %c0_433 = arith.constant 0 : index
    %387 = vector.load %arg3[%c2_430, %c1_431, %c0_432, %c0_433] : memref<3x3x128x128xf32, #tpu.memory_space<vmem>>, vector<1x1x128x128xf32>
    %388 = vector.shape_cast %387 : vector<1x1x128x128xf32> to vector<128x128xf32>
    %cst_434 = arith.constant dense<0.000000e+00> : vector<2x128xf32>
    %389 = tpu.matmul %386, %388, %cst_434 {dimension_numbers = #tpu.dot_dimension_numbers<[1], [0], [0], [1], [0, 0, 1, 1], [], []>} : vector<2x128xf32>, vector<128x128xf32>, vector<2x128xf32> -> vector<2x128xf32>
    %390 = arith.addf %385, %389 : vector<2x128xf32>
    %391 = vector.extract_strided_slice %340 {offsets = [14, 0], sizes = [2, 128], strides = [1, 1]} : vector<32x128xf32> to vector<2x128xf32>
    %c2_435 = arith.constant 2 : index
    %c2_436 = arith.constant 2 : index
    %c0_437 = arith.constant 0 : index
    %c0_438 = arith.constant 0 : index
    %392 = vector.load %arg3[%c2_435, %c2_436, %c0_437, %c0_438] : memref<3x3x128x128xf32, #tpu.memory_space<vmem>>, vector<1x1x128x128xf32>
    %393 = vector.shape_cast %392 : vector<1x1x128x128xf32> to vector<128x128xf32>
    %cst_439 = arith.constant dense<0.000000e+00> : vector<2x128xf32>
    %394 = tpu.matmul %391, %393, %cst_439 {dimension_numbers = #tpu.dot_dimension_numbers<[1], [0], [0], [1], [0, 0, 1, 1], [], []>} : vector<2x128xf32>, vector<128x128xf32>, vector<2x128xf32> -> vector<2x128xf32>
    %395 = arith.addf %390, %394 : vector<2x128xf32>
    %c0_440 = arith.constant 0 : index
    %c0_441 = arith.constant 0 : index
    %396 = vector.load %arg4[%c0_440, %c0_441] : memref<3x128xf32, #tpu.memory_space<vmem>>, vector<1x128xf32>
    %397 = vector.broadcast %396 : vector<1x128xf32> to vector<2x128xf32>
    %398 = arith.addf %395, %397 : vector<2x128xf32>
    %cst_442 = arith.constant 0.000000e+00 : f32
    %399 = vector.broadcast %cst_442 : f32 to vector<2x128xf32>
    %400 = vector.extract_strided_slice %340 {offsets = [8, 0], sizes = [2, 128], strides = [1, 1]} : vector<32x128xf32> to vector<2x128xf32>
    %c0_443 = arith.constant 0 : index
    %c1_444 = arith.constant 1 : index
    %c0_445 = arith.constant 0 : index
    %c0_446 = arith.constant 0 : index
    %401 = vector.load %arg3[%c0_443, %c1_444, %c0_445, %c0_446] : memref<3x3x128x128xf32, #tpu.memory_space<vmem>>, vector<1x1x128x128xf32>
    %402 = vector.shape_cast %401 : vector<1x1x128x128xf32> to vector<128x128xf32>
    %cst_447 = arith.constant dense<0.000000e+00> : vector<2x128xf32>
    %403 = tpu.matmul %400, %402, %cst_447 {dimension_numbers = #tpu.dot_dimension_numbers<[1], [0], [0], [1], [0, 0, 1, 1], [], []>} : vector<2x128xf32>, vector<128x128xf32>, vector<2x128xf32> -> vector<2x128xf32>
    %404 = arith.addf %399, %403 : vector<2x128xf32>
    %405 = vector.extract_strided_slice %340 {offsets = [10, 0], sizes = [2, 128], strides = [1, 1]} : vector<32x128xf32> to vector<2x128xf32>
    %c0_448 = arith.constant 0 : index
    %c2_449 = arith.constant 2 : index
    %c0_450 = arith.constant 0 : index
    %c0_451 = arith.constant 0 : index
    %406 = vector.load %arg3[%c0_448, %c2_449, %c0_450, %c0_451] : memref<3x3x128x128xf32, #tpu.memory_space<vmem>>, vector<1x1x128x128xf32>
    %407 = vector.shape_cast %406 : vector<1x1x128x128xf32> to vector<128x128xf32>
    %cst_452 = arith.constant dense<0.000000e+00> : vector<2x128xf32>
    %408 = tpu.matmul %405, %407, %cst_452 {dimension_numbers = #tpu.dot_dimension_numbers<[1], [0], [0], [1], [0, 0, 1, 1], [], []>} : vector<2x128xf32>, vector<128x128xf32>, vector<2x128xf32> -> vector<2x128xf32>
    %409 = arith.addf %404, %408 : vector<2x128xf32>
    %410 = vector.extract_strided_slice %340 {offsets = [16, 0], sizes = [2, 128], strides = [1, 1]} : vector<32x128xf32> to vector<2x128xf32>
    %c1_453 = arith.constant 1 : index
    %c1_454 = arith.constant 1 : index
    %c0_455 = arith.constant 0 : index
    %c0_456 = arith.constant 0 : index
    %411 = vector.load %arg3[%c1_453, %c1_454, %c0_455, %c0_456] : memref<3x3x128x128xf32, #tpu.memory_space<vmem>>, vector<1x1x128x128xf32>
    %412 = vector.shape_cast %411 : vector<1x1x128x128xf32> to vector<128x128xf32>
    %cst_457 = arith.constant dense<0.000000e+00> : vector<2x128xf32>
    %413 = tpu.matmul %410, %412, %cst_457 {dimension_numbers = #tpu.dot_dimension_numbers<[1], [0], [0], [1], [0, 0, 1, 1], [], []>} : vector<2x128xf32>, vector<128x128xf32>, vector<2x128xf32> -> vector<2x128xf32>
    %414 = arith.addf %409, %413 : vector<2x128xf32>
    %415 = vector.extract_strided_slice %340 {offsets = [18, 0], sizes = [2, 128], strides = [1, 1]} : vector<32x128xf32> to vector<2x128xf32>
    %c1_458 = arith.constant 1 : index
    %c2_459 = arith.constant 2 : index
    %c0_460 = arith.constant 0 : index
    %c0_461 = arith.constant 0 : index
    %416 = vector.load %arg3[%c1_458, %c2_459, %c0_460, %c0_461] : memref<3x3x128x128xf32, #tpu.memory_space<vmem>>, vector<1x1x128x128xf32>
    %417 = vector.shape_cast %416 : vector<1x1x128x128xf32> to vector<128x128xf32>
    %cst_462 = arith.constant dense<0.000000e+00> : vector<2x128xf32>
    %418 = tpu.matmul %415, %417, %cst_462 {dimension_numbers = #tpu.dot_dimension_numbers<[1], [0], [0], [1], [0, 0, 1, 1], [], []>} : vector<2x128xf32>, vector<128x128xf32>, vector<2x128xf32> -> vector<2x128xf32>
    %419 = arith.addf %414, %418 : vector<2x128xf32>
    %420 = vector.extract_strided_slice %340 {offsets = [24, 0], sizes = [2, 128], strides = [1, 1]} : vector<32x128xf32> to vector<2x128xf32>
    %c2_463 = arith.constant 2 : index
    %c1_464 = arith.constant 1 : index
    %c0_465 = arith.constant 0 : index
    %c0_466 = arith.constant 0 : index
    %421 = vector.load %arg3[%c2_463, %c1_464, %c0_465, %c0_466] : memref<3x3x128x128xf32, #tpu.memory_space<vmem>>, vector<1x1x128x128xf32>
    %422 = vector.shape_cast %421 : vector<1x1x128x128xf32> to vector<128x128xf32>
    %cst_467 = arith.constant dense<0.000000e+00> : vector<2x128xf32>
    %423 = tpu.matmul %420, %422, %cst_467 {dimension_numbers = #tpu.dot_dimension_numbers<[1], [0], [0], [1], [0, 0, 1, 1], [], []>} : vector<2x128xf32>, vector<128x128xf32>, vector<2x128xf32> -> vector<2x128xf32>
    %424 = arith.addf %419, %423 : vector<2x128xf32>
    %425 = vector.extract_strided_slice %340 {offsets = [26, 0], sizes = [2, 128], strides = [1, 1]} : vector<32x128xf32> to vector<2x128xf32>
    %c2_468 = arith.constant 2 : index
    %c2_469 = arith.constant 2 : index
    %c0_470 = arith.constant 0 : index
    %c0_471 = arith.constant 0 : index
    %426 = vector.load %arg3[%c2_468, %c2_469, %c0_470, %c0_471] : memref<3x3x128x128xf32, #tpu.memory_space<vmem>>, vector<1x1x128x128xf32>
    %427 = vector.shape_cast %426 : vector<1x1x128x128xf32> to vector<128x128xf32>
    %cst_472 = arith.constant dense<0.000000e+00> : vector<2x128xf32>
    %428 = tpu.matmul %425, %427, %cst_472 {dimension_numbers = #tpu.dot_dimension_numbers<[1], [0], [0], [1], [0, 0, 1, 1], [], []>} : vector<2x128xf32>, vector<128x128xf32>, vector<2x128xf32> -> vector<2x128xf32>
    %429 = arith.addf %424, %428 : vector<2x128xf32>
    %c0_473 = arith.constant 0 : index
    %c0_474 = arith.constant 0 : index
    %430 = vector.load %arg4[%c0_473, %c0_474] : memref<3x128xf32, #tpu.memory_space<vmem>>, vector<1x128xf32>
    %431 = vector.broadcast %430 : vector<1x128xf32> to vector<2x128xf32>
    %432 = arith.addf %429, %431 : vector<2x128xf32>
    %cst_475 = arith.constant 0.000000e+00 : f32
    %433 = vector.broadcast %cst_475 : f32 to vector<2x128xf32>
    %434 = vector.extract_strided_slice %340 {offsets = [10, 0], sizes = [2, 128], strides = [1, 1]} : vector<32x128xf32> to vector<2x128xf32>
    %c0_476 = arith.constant 0 : index
    %c0_477 = arith.constant 0 : index
    %c0_478 = arith.constant 0 : index
    %c0_479 = arith.constant 0 : index
    %435 = vector.load %arg3[%c0_476, %c0_477, %c0_478, %c0_479] : memref<3x3x128x128xf32, #tpu.memory_space<vmem>>, vector<1x1x128x128xf32>
    %436 = vector.shape_cast %435 : vector<1x1x128x128xf32> to vector<128x128xf32>
    %cst_480 = arith.constant dense<0.000000e+00> : vector<2x128xf32>
    %437 = tpu.matmul %434, %436, %cst_480 {dimension_numbers = #tpu.dot_dimension_numbers<[1], [0], [0], [1], [0, 0, 1, 1], [], []>} : vector<2x128xf32>, vector<128x128xf32>, vector<2x128xf32> -> vector<2x128xf32>
    %438 = arith.addf %433, %437 : vector<2x128xf32>
    %439 = vector.extract_strided_slice %340 {offsets = [12, 0], sizes = [2, 128], strides = [1, 1]} : vector<32x128xf32> to vector<2x128xf32>
    %c0_481 = arith.constant 0 : index
    %c1_482 = arith.constant 1 : index
    %c0_483 = arith.constant 0 : index
    %c0_484 = arith.constant 0 : index
    %440 = vector.load %arg3[%c0_481, %c1_482, %c0_483, %c0_484] : memref<3x3x128x128xf32, #tpu.memory_space<vmem>>, vector<1x1x128x128xf32>
    %441 = vector.shape_cast %440 : vector<1x1x128x128xf32> to vector<128x128xf32>
    %cst_485 = arith.constant dense<0.000000e+00> : vector<2x128xf32>
    %442 = tpu.matmul %439, %441, %cst_485 {dimension_numbers = #tpu.dot_dimension_numbers<[1], [0], [0], [1], [0, 0, 1, 1], [], []>} : vector<2x128xf32>, vector<128x128xf32>, vector<2x128xf32> -> vector<2x128xf32>
    %443 = arith.addf %438, %442 : vector<2x128xf32>
    %444 = vector.extract_strided_slice %340 {offsets = [14, 0], sizes = [2, 128], strides = [1, 1]} : vector<32x128xf32> to vector<2x128xf32>
    %c0_486 = arith.constant 0 : index
    %c2_487 = arith.constant 2 : index
    %c0_488 = arith.constant 0 : index
    %c0_489 = arith.constant 0 : index
    %445 = vector.load %arg3[%c0_486, %c2_487, %c0_488, %c0_489] : memref<3x3x128x128xf32, #tpu.memory_space<vmem>>, vector<1x1x128x128xf32>
    %446 = vector.shape_cast %445 : vector<1x1x128x128xf32> to vector<128x128xf32>
    %cst_490 = arith.constant dense<0.000000e+00> : vector<2x128xf32>
    %447 = tpu.matmul %444, %446, %cst_490 {dimension_numbers = #tpu.dot_dimension_numbers<[1], [0], [0], [1], [0, 0, 1, 1], [], []>} : vector<2x128xf32>, vector<128x128xf32>, vector<2x128xf32> -> vector<2x128xf32>
    %448 = arith.addf %443, %447 : vector<2x128xf32>
    %449 = vector.extract_strided_slice %340 {offsets = [18, 0], sizes = [2, 128], strides = [1, 1]} : vector<32x128xf32> to vector<2x128xf32>
    %c1_491 = arith.constant 1 : index
    %c0_492 = arith.constant 0 : index
    %c0_493 = arith.constant 0 : index
    %c0_494 = arith.constant 0 : index
    %450 = vector.load %arg3[%c1_491, %c0_492, %c0_493, %c0_494] : memref<3x3x128x128xf32, #tpu.memory_space<vmem>>, vector<1x1x128x128xf32>
    %451 = vector.shape_cast %450 : vector<1x1x128x128xf32> to vector<128x128xf32>
    %cst_495 = arith.constant dense<0.000000e+00> : vector<2x128xf32>
    %452 = tpu.matmul %449, %451, %cst_495 {dimension_numbers = #tpu.dot_dimension_numbers<[1], [0], [0], [1], [0, 0, 1, 1], [], []>} : vector<2x128xf32>, vector<128x128xf32>, vector<2x128xf32> -> vector<2x128xf32>
    %453 = arith.addf %448, %452 : vector<2x128xf32>
    %454 = vector.extract_strided_slice %340 {offsets = [20, 0], sizes = [2, 128], strides = [1, 1]} : vector<32x128xf32> to vector<2x128xf32>
    %c1_496 = arith.constant 1 : index
    %c1_497 = arith.constant 1 : index
    %c0_498 = arith.constant 0 : index
    %c0_499 = arith.constant 0 : index
    %455 = vector.load %arg3[%c1_496, %c1_497, %c0_498, %c0_499] : memref<3x3x128x128xf32, #tpu.memory_space<vmem>>, vector<1x1x128x128xf32>
    %456 = vector.shape_cast %455 : vector<1x1x128x128xf32> to vector<128x128xf32>
    %cst_500 = arith.constant dense<0.000000e+00> : vector<2x128xf32>
    %457 = tpu.matmul %454, %456, %cst_500 {dimension_numbers = #tpu.dot_dimension_numbers<[1], [0], [0], [1], [0, 0, 1, 1], [], []>} : vector<2x128xf32>, vector<128x128xf32>, vector<2x128xf32> -> vector<2x128xf32>
    %458 = arith.addf %453, %457 : vector<2x128xf32>
    %459 = vector.extract_strided_slice %340 {offsets = [22, 0], sizes = [2, 128], strides = [1, 1]} : vector<32x128xf32> to vector<2x128xf32>
    %c1_501 = arith.constant 1 : index
    %c2_502 = arith.constant 2 : index
    %c0_503 = arith.constant 0 : index
    %c0_504 = arith.constant 0 : index
    %460 = vector.load %arg3[%c1_501, %c2_502, %c0_503, %c0_504] : memref<3x3x128x128xf32, #tpu.memory_space<vmem>>, vector<1x1x128x128xf32>
    %461 = vector.shape_cast %460 : vector<1x1x128x128xf32> to vector<128x128xf32>
    %cst_505 = arith.constant dense<0.000000e+00> : vector<2x128xf32>
    %462 = tpu.matmul %459, %461, %cst_505 {dimension_numbers = #tpu.dot_dimension_numbers<[1], [0], [0], [1], [0, 0, 1, 1], [], []>} : vector<2x128xf32>, vector<128x128xf32>, vector<2x128xf32> -> vector<2x128xf32>
    %463 = arith.addf %458, %462 : vector<2x128xf32>
    %464 = vector.extract_strided_slice %340 {offsets = [26, 0], sizes = [2, 128], strides = [1, 1]} : vector<32x128xf32> to vector<2x128xf32>
    %c2_506 = arith.constant 2 : index
    %c0_507 = arith.constant 0 : index
    %c0_508 = arith.constant 0 : index
    %c0_509 = arith.constant 0 : index
    %465 = vector.load %arg3[%c2_506, %c0_507, %c0_508, %c0_509] : memref<3x3x128x128xf32, #tpu.memory_space<vmem>>, vector<1x1x128x128xf32>
    %466 = vector.shape_cast %465 : vector<1x1x128x128xf32> to vector<128x128xf32>
    %cst_510 = arith.constant dense<0.000000e+00> : vector<2x128xf32>
    %467 = tpu.matmul %464, %466, %cst_510 {dimension_numbers = #tpu.dot_dimension_numbers<[1], [0], [0], [1], [0, 0, 1, 1], [], []>} : vector<2x128xf32>, vector<128x128xf32>, vector<2x128xf32> -> vector<2x128xf32>
    %468 = arith.addf %463, %467 : vector<2x128xf32>
    %469 = vector.extract_strided_slice %340 {offsets = [28, 0], sizes = [2, 128], strides = [1, 1]} : vector<32x128xf32> to vector<2x128xf32>
    %c2_511 = arith.constant 2 : index
    %c1_512 = arith.constant 1 : index
    %c0_513 = arith.constant 0 : index
    %c0_514 = arith.constant 0 : index
    %470 = vector.load %arg3[%c2_511, %c1_512, %c0_513, %c0_514] : memref<3x3x128x128xf32, #tpu.memory_space<vmem>>, vector<1x1x128x128xf32>
    %471 = vector.shape_cast %470 : vector<1x1x128x128xf32> to vector<128x128xf32>
    %cst_515 = arith.constant dense<0.000000e+00> : vector<2x128xf32>
    %472 = tpu.matmul %469, %471, %cst_515 {dimension_numbers = #tpu.dot_dimension_numbers<[1], [0], [0], [1], [0, 0, 1, 1], [], []>} : vector<2x128xf32>, vector<128x128xf32>, vector<2x128xf32> -> vector<2x128xf32>
    %473 = arith.addf %468, %472 : vector<2x128xf32>
    %474 = vector.extract_strided_slice %340 {offsets = [30, 0], sizes = [2, 128], strides = [1, 1]} : vector<32x128xf32> to vector<2x128xf32>
    %c2_516 = arith.constant 2 : index
    %c2_517 = arith.constant 2 : index
    %c0_518 = arith.constant 0 : index
    %c0_519 = arith.constant 0 : index
    %475 = vector.load %arg3[%c2_516, %c2_517, %c0_518, %c0_519] : memref<3x3x128x128xf32, #tpu.memory_space<vmem>>, vector<1x1x128x128xf32>
    %476 = vector.shape_cast %475 : vector<1x1x128x128xf32> to vector<128x128xf32>
    %cst_520 = arith.constant dense<0.000000e+00> : vector<2x128xf32>
    %477 = tpu.matmul %474, %476, %cst_520 {dimension_numbers = #tpu.dot_dimension_numbers<[1], [0], [0], [1], [0, 0, 1, 1], [], []>} : vector<2x128xf32>, vector<128x128xf32>, vector<2x128xf32> -> vector<2x128xf32>
    %478 = arith.addf %473, %477 : vector<2x128xf32>
    %c0_521 = arith.constant 0 : index
    %c0_522 = arith.constant 0 : index
    %479 = vector.load %arg4[%c0_521, %c0_522] : memref<3x128xf32, #tpu.memory_space<vmem>>, vector<1x128xf32>
    %480 = vector.broadcast %479 : vector<1x128xf32> to vector<2x128xf32>
    %481 = arith.addf %478, %480 : vector<2x128xf32>
    %cst_523 = arith.constant dense<0.000000e+00> : vector<128xf32>
    %482 = vector.multi_reduction <add>, %364, %cst_523 [0] : vector<2x128xf32> to vector<128xf32>
    %483 = vector.shape_cast %482 : vector<128xf32> to vector<1x128xf32>
    %cst_524 = arith.constant dense<0.000000e+00> : vector<128xf32>
    %484 = vector.multi_reduction <add>, %398, %cst_524 [0] : vector<2x128xf32> to vector<128xf32>
    %485 = vector.shape_cast %484 : vector<128xf32> to vector<1x128xf32>
    %486 = arith.addf %483, %485 : vector<1x128xf32>
    %cst_525 = arith.constant dense<0.000000e+00> : vector<128xf32>
    %487 = vector.multi_reduction <add>, %432, %cst_525 [0] : vector<2x128xf32> to vector<128xf32>
    %488 = vector.shape_cast %487 : vector<128xf32> to vector<1x128xf32>
    %489 = arith.addf %486, %488 : vector<1x128xf32>
    %cst_526 = arith.constant dense<0.000000e+00> : vector<128xf32>
    %490 = vector.multi_reduction <add>, %481, %cst_526 [0] : vector<2x128xf32> to vector<128xf32>
    %491 = vector.shape_cast %490 : vector<128xf32> to vector<1x128xf32>
    %492 = arith.addf %489, %491 : vector<1x128xf32>
    %cst_527 = arith.constant 8.000000e+00 : f32
    %493 = vector.broadcast %cst_527 : f32 to vector<1x128xf32>
    %494 = arith.divf %492, %493 : vector<1x128xf32>
    %495 = vector.broadcast %494 : vector<1x128xf32> to vector<2x128xf32>
    %496 = arith.subf %364, %495 : vector<2x128xf32>
    %497 = arith.mulf %496, %496 : vector<2x128xf32>
    %cst_528 = arith.constant dense<0.000000e+00> : vector<128xf32>
    %498 = vector.multi_reduction <add>, %497, %cst_528 [0] : vector<2x128xf32> to vector<128xf32>
    %499 = vector.shape_cast %498 : vector<128xf32> to vector<1x128xf32>
    %500 = vector.broadcast %494 : vector<1x128xf32> to vector<2x128xf32>
    %501 = arith.subf %398, %500 : vector<2x128xf32>
    %502 = arith.mulf %501, %501 : vector<2x128xf32>
    %cst_529 = arith.constant dense<0.000000e+00> : vector<128xf32>
    %503 = vector.multi_reduction <add>, %502, %cst_529 [0] : vector<2x128xf32> to vector<128xf32>
    %504 = vector.shape_cast %503 : vector<128xf32> to vector<1x128xf32>
    %505 = arith.addf %499, %504 : vector<1x128xf32>
    %506 = vector.broadcast %494 : vector<1x128xf32> to vector<2x128xf32>
    %507 = arith.subf %432, %506 : vector<2x128xf32>
    %508 = arith.mulf %507, %507 : vector<2x128xf32>
    %cst_530 = arith.constant dense<0.000000e+00> : vector<128xf32>
    %509 = vector.multi_reduction <add>, %508, %cst_530 [0] : vector<2x128xf32> to vector<128xf32>
    %510 = vector.shape_cast %509 : vector<128xf32> to vector<1x128xf32>
    %511 = arith.addf %505, %510 : vector<1x128xf32>
    %512 = vector.broadcast %494 : vector<1x128xf32> to vector<2x128xf32>
    %513 = arith.subf %481, %512 : vector<2x128xf32>
    %514 = arith.mulf %513, %513 : vector<2x128xf32>
    %cst_531 = arith.constant dense<0.000000e+00> : vector<128xf32>
    %515 = vector.multi_reduction <add>, %514, %cst_531 [0] : vector<2x128xf32> to vector<128xf32>
    %516 = vector.shape_cast %515 : vector<128xf32> to vector<1x128xf32>
    %517 = arith.addf %511, %516 : vector<1x128xf32>
    %cst_532 = arith.constant 8.000000e+00 : f32
    %518 = vector.broadcast %cst_532 : f32 to vector<1x128xf32>
    %519 = arith.divf %517, %518 : vector<1x128xf32>
    %c1_533 = arith.constant 1 : index
    %c0_534 = arith.constant 0 : index
    %520 = vector.load %arg4[%c1_533, %c0_534] : memref<3x128xf32, #tpu.memory_space<vmem>>, vector<1x128xf32>
    %cst_535 = arith.constant 9.99999974E-6 : f32
    %521 = vector.broadcast %cst_535 : f32 to vector<1x128xf32>
    %522 = arith.addf %519, %521 : vector<1x128xf32>
    %523 = math.rsqrt %522 : vector<1x128xf32>
    %524 = arith.mulf %520, %523 : vector<1x128xf32>
    %c2_536 = arith.constant 2 : index
    %c0_537 = arith.constant 0 : index
    %525 = vector.load %arg4[%c2_536, %c0_537] : memref<3x128xf32, #tpu.memory_space<vmem>>, vector<1x128xf32>
    %526 = arith.mulf %494, %524 : vector<1x128xf32>
    %527 = arith.subf %525, %526 : vector<1x128xf32>
    %cst_538 = arith.constant 0.000000e+00 : f32
    %528 = vector.broadcast %cst_538 : f32 to vector<2x128xf32>
    %529 = vector.broadcast %524 : vector<1x128xf32> to vector<2x128xf32>
    %530 = arith.mulf %364, %529 : vector<2x128xf32>
    %531 = vector.broadcast %527 : vector<1x128xf32> to vector<2x128xf32>
    %532 = arith.addf %530, %531 : vector<2x128xf32>
    %cst_539 = arith.constant 0.000000e+00 : f32
    %533 = vector.broadcast %cst_539 : f32 to vector<2x128xf32>
    %534 = arith.maximumf %532, %533 : vector<2x128xf32>
    %c0_540 = arith.constant 0 : index
    %c0_541 = arith.constant 0 : index
    %c0_542 = arith.constant 0 : index
    %535 = vector.load %arg5[%c0_540, %c0_541, %c0_542] : memref<4x128x128xf32, #tpu.memory_space<vmem>>, vector<1x128x128xf32>
    %536 = vector.shape_cast %535 : vector<1x128x128xf32> to vector<128x128xf32>
    %cst_543 = arith.constant dense<0.000000e+00> : vector<2x128xf32>
    %537 = tpu.matmul %534, %536, %cst_543 {dimension_numbers = #tpu.dot_dimension_numbers<[1], [0], [0], [1], [0, 0, 1, 1], [], []>} : vector<2x128xf32>, vector<128x128xf32>, vector<2x128xf32> -> vector<2x128xf32>
    %538 = arith.addf %528, %537 : vector<2x128xf32>
    %539 = vector.broadcast %524 : vector<1x128xf32> to vector<2x128xf32>
    %540 = arith.mulf %398, %539 : vector<2x128xf32>
    %541 = vector.broadcast %527 : vector<1x128xf32> to vector<2x128xf32>
    %542 = arith.addf %540, %541 : vector<2x128xf32>
    %cst_544 = arith.constant 0.000000e+00 : f32
    %543 = vector.broadcast %cst_544 : f32 to vector<2x128xf32>
    %544 = arith.maximumf %542, %543 : vector<2x128xf32>
    %c1_545 = arith.constant 1 : index
    %c0_546 = arith.constant 0 : index
    %c0_547 = arith.constant 0 : index
    %545 = vector.load %arg5[%c1_545, %c0_546, %c0_547] : memref<4x128x128xf32, #tpu.memory_space<vmem>>, vector<1x128x128xf32>
    %546 = vector.shape_cast %545 : vector<1x128x128xf32> to vector<128x128xf32>
    %cst_548 = arith.constant dense<0.000000e+00> : vector<2x128xf32>
    %547 = tpu.matmul %544, %546, %cst_548 {dimension_numbers = #tpu.dot_dimension_numbers<[1], [0], [0], [1], [0, 0, 1, 1], [], []>} : vector<2x128xf32>, vector<128x128xf32>, vector<2x128xf32> -> vector<2x128xf32>
    %548 = arith.addf %538, %547 : vector<2x128xf32>
    %549 = vector.broadcast %524 : vector<1x128xf32> to vector<2x128xf32>
    %550 = arith.mulf %432, %549 : vector<2x128xf32>
    %551 = vector.broadcast %527 : vector<1x128xf32> to vector<2x128xf32>
    %552 = arith.addf %550, %551 : vector<2x128xf32>
    %cst_549 = arith.constant 0.000000e+00 : f32
    %553 = vector.broadcast %cst_549 : f32 to vector<2x128xf32>
    %554 = arith.maximumf %552, %553 : vector<2x128xf32>
    %c2_550 = arith.constant 2 : index
    %c0_551 = arith.constant 0 : index
    %c0_552 = arith.constant 0 : index
    %555 = vector.load %arg5[%c2_550, %c0_551, %c0_552] : memref<4x128x128xf32, #tpu.memory_space<vmem>>, vector<1x128x128xf32>
    %556 = vector.shape_cast %555 : vector<1x128x128xf32> to vector<128x128xf32>
    %cst_553 = arith.constant dense<0.000000e+00> : vector<2x128xf32>
    %557 = tpu.matmul %554, %556, %cst_553 {dimension_numbers = #tpu.dot_dimension_numbers<[1], [0], [0], [1], [0, 0, 1, 1], [], []>} : vector<2x128xf32>, vector<128x128xf32>, vector<2x128xf32> -> vector<2x128xf32>
    %558 = arith.addf %548, %557 : vector<2x128xf32>
    %559 = vector.broadcast %524 : vector<1x128xf32> to vector<2x128xf32>
    %560 = arith.mulf %481, %559 : vector<2x128xf32>
    %561 = vector.broadcast %527 : vector<1x128xf32> to vector<2x128xf32>
    %562 = arith.addf %560, %561 : vector<2x128xf32>
    %cst_554 = arith.constant 0.000000e+00 : f32
    %563 = vector.broadcast %cst_554 : f32 to vector<2x128xf32>
    %564 = arith.maximumf %562, %563 : vector<2x128xf32>
    %c3_555 = arith.constant 3 : index
    %c0_556 = arith.constant 0 : index
    %c0_557 = arith.constant 0 : index
    %565 = vector.load %arg5[%c3_555, %c0_556, %c0_557] : memref<4x128x128xf32, #tpu.memory_space<vmem>>, vector<1x128x128xf32>
    %566 = vector.shape_cast %565 : vector<1x128x128xf32> to vector<128x128xf32>
    %cst_558 = arith.constant dense<0.000000e+00> : vector<2x128xf32>
    %567 = tpu.matmul %564, %566, %cst_558 {dimension_numbers = #tpu.dot_dimension_numbers<[1], [0], [0], [1], [0, 0, 1, 1], [], []>} : vector<2x128xf32>, vector<128x128xf32>, vector<2x128xf32> -> vector<2x128xf32>
    %568 = arith.addf %558, %567 : vector<2x128xf32>
    %c0_559 = arith.constant 0 : index
    %c0_560 = arith.constant 0 : index
    %569 = vector.load %arg7[%c0_559, %c0_560] : memref<2x128xf32, #tpu.memory_space<vmem>>, vector<1x128xf32>
    %570 = vector.broadcast %569 : vector<1x128xf32> to vector<2x128xf32>
    %571 = arith.addf %568, %570 : vector<2x128xf32>
    %c0_561 = arith.constant 0 : index
    %c0_562 = arith.constant 0 : index
    %572 = vector.load %arg6[%c0_561, %c0_562] : memref<128x128xf32, #tpu.memory_space<vmem>>, vector<128x128xf32>
    %cst_563 = arith.constant dense<0.000000e+00> : vector<2x128xf32>
    %573 = tpu.matmul %571, %572, %cst_563 {dimension_numbers = #tpu.dot_dimension_numbers<[1], [0], [0], [1], [0, 0, 1, 1], [], []>} : vector<2x128xf32>, vector<128x128xf32>, vector<2x128xf32> -> vector<2x128xf32>
    %c1_564 = arith.constant 1 : index
    %c0_565 = arith.constant 0 : index
    %574 = vector.load %arg7[%c1_564, %c0_565] : memref<2x128xf32, #tpu.memory_space<vmem>>, vector<1x128xf32>
    %575 = vector.broadcast %574 : vector<1x128xf32> to vector<2x128xf32>
    %576 = arith.addf %573, %575 : vector<2x128xf32>
    %c0_566 = arith.constant 0 : index
    %c0_567 = arith.constant 0 : index
    %577 = vector.load %arg8[%c0_566, %c0_567] : memref<2x128xf32, #tpu.memory_space<vmem>>, vector<2x128xf32>
    tpu.vector_store %arg8[%c0_566, %c0_567], %576 {strides = array<i32>} : memref<2x128xf32, #tpu.memory_space<vmem>>, vector<2x128xf32>,
    return
  }
}

</mosaic_0001>

<bundles_post_ra>
// kernel: _net1_forward_impl.1
= control target key start
LH: loop header
LB: loop body
LE: loop exit
PB: predicated region body
PF: predicated region fallthrough
CT: control target
= control target key end

     0   :  { %vm42_vm0 = vcmask 64512   ;;  %s12213_s0 = inlined_call_operand.vmem [shape: f32[4,4,5,10,8], index: 0, kind: input, shape index: {}]   ;;  %s12214_s1 = inlined_call_operand.vmem [shape: f32[3,3,8,128], index: 1, kind: input, shape index: {}]   ;;  %s12215_s2 = inlined_call_operand.vmem [shape: f32[3,128], index: 2, kind: input, shape index: {}]   ;;  %s12216_s3 = inlined_call_operand.vmem [shape: f32[3,3,128,128], index: 3, kind: input, shape index: {}]   ;;  %s12217_s4 = inlined_call_operand.vmem [shape: f32[3,128], index: 4, kind: input, shape index: {}]   ;;  %s12218_s5 = inlined_call_operand.vmem [shape: f32[4,128,128], index: 5, kind: input, shape index: {}]   ;;  %s12219_s6 = inlined_call_operand.vmem [shape: f32[128,128], index: 6, kind: input, shape index: {}]   ;;  %s12220_s7 = inlined_call_operand.vmem [shape: f32[2,128], index: 7, kind: input, shape index: {}]   ;;  %s12221_s8 = inlined_call_operand.hbm [shape: f32[2,128], index: 8, kind: output, shape index: {}]  }
   0x1   :  { %v9020_v0 = vld [vmem:[%s12214_s1 + $0x8] sm:$0xff]  ;;  %v9025_v1 = vld [vmem:[%s12214_s1] sm:$0xff]  ;;  %v6366_v2 = vld [vmem:[%s12213_s0 + $0x50] sm:$0xff] }
   0x2   :  { %7480 = vmatprep.subr.mxu0 %v9020_v0  ;;  %7488 = vmatprep.subr.mxu1 %v9025_v1  ;;  %v30_v3 = vld [vmem:[%s12213_s0] sm:$0xff]  ;;  %v9043_v5 = vld [vmem:[%s12213_s0 + $0x10] sm:$0xff]  ;;  %v9055_v7 = vld [vmem:[%s12214_s1 + $0x18] sm:$0xff] }
   0x3   :  { %v9038_v4 = vld [vmem:[%s12213_s0 + $0x60] sm:$0xff]  ;;  %7481 = vmatpush3.msra.mxu0 %v9020_v0  ;;  %7482 = vmatprep.mubr.msk.f32.mxu0 %vm42_vm0, %v6366_v2  ;;  %v9050_v6 = vld [vmem:[%s12214_s1 + $0x10] sm:$0xff]  ;;  %v9107_v15 = vld [vmem:[%s12214_s1 + $0x28] sm:$0xff] }
   0x4   :  { %7489 = vmatpush3.msra.mxu1 %v9025_v1  ;;  %7490 = vmatprep.mubr.msk.f32.mxu1 %vm42_vm0, %v30_v3  ;;  %v9062_v8 = vld [vmem:[%s12213_s0 + $0x70] sm:$0xff]  ;;  %v9071_v9 = vld [vmem:[%s12213_s0 + $0x20] sm:$0xff]  ;;  %v9145_v21 = vld [vmem:[%s12214_s1 + $0x38] sm:$0xff] }
   0x5   :  { %7483 = vmatmul.mubr.msk.f32.vlgmr.msra.gmra.mxu0 %vm42_vm0, %v9038_v4  ;;  %7491 = vmatmul.mubr.msk.f32.vlgmr.msra.gmra.mxu1 %vm42_vm0, %v9043_v5  ;;  %v9078_v10 = vld [vmem:[%s12213_s0 + $0x80] sm:$0xff]  ;;  %v9083_v11 = vld [vmem:[%s12213_s0 + $0x30] sm:$0xff] }
   0x6   :  { %7496 = vmatprep.subr.mxu0 %v9050_v6  ;;  %7504 = vmatprep.subr.mxu1 %v9055_v7  ;;  %v9091_v12 = vld [vmem:[%s12213_s0 + $0xa0] sm:$0xff]  ;;  %v9119_v16 = vld [vmem:[%s12213_s0 + $0xb0] sm:$0xff] }
   0x7   :  { %7497 = vmatpush3.msra.mxu0 %v9050_v6  ;;  %7485 = vmatprep.mubr.msk.f32.mxu0 %vm42_vm0, %v9062_v8  ;;  %v6388_v13 = vld [vmem:[%s12213_s0 + $0x140] sm:$0xff]  ;;  %v6389_v17 = vld [vmem:[%s12213_s0 + $0x150] sm:$0xff] }
   0x8   :  { %7493 = vmatprep.mubr.msk.f32.mxu1 %vm42_vm0, %v9071_v9  ;;  %7505 = vmatpush3.msra.mxu1 %v9055_v7  ;;  %v9102_v14 = vld [vmem:[%s12214_s1 + $0x20] sm:$0xff]  ;;  %v9140_v20 = vld [vmem:[%s12214_s1 + $0x30] sm:$0xff] }
   0x9   :  { %7486 = vmatmul.mubr.msk.f32.gmra.mxu0 %vm42_vm0, %v9078_v10  ;;  %7494 = vmatmul.mubr.msk.f32.gmra.mxu1 %vm42_vm0, %v9083_v11  ;;  %v9129_v18 = vld [vmem:[%s12213_s0 + $0xc0] sm:$0xff]  ;;  %v9153_v22 = vld [vmem:[%s12213_s0 + $0xd0] sm:$0xff] }
   0xa   :  { %7498 = vmatprep.mubr.msk.f32.mxu0 %vm42_vm0, %v9091_v12  ;;  %7506 = vmatprep.mubr.msk.f32.mxu1 %vm42_vm0, %v6388_v13  ;;  %v6390_v19 = vld [vmem:[%s12213_s0 + $0x160] sm:$0xff]  ;;  %v6391_v23 = vld [vmem:[%s12213_s0 + $0x170] sm:$0xff] }
   0xb   :  { %7512 = vmatprep.subr.mxu0 %v9102_v14  ;;  %7520 = vmatprep.subr.mxu1 %v9107_v15  ;;  %v6397_v24 = vld [vmem:[%s12213_s0 + $0x190] sm:$0xff]  ;;  %v9166_v25 = vld [vmem:[%s12213_s0 + $0x1e0] sm:$0xff] }
   0xc   :  { %v6398_v26 = vld [vmem:[%s12213_s0 + $0x1a0] sm:$0xff]  ;;  %v9182_v27 = vld [vmem:[%s12213_s0 + $0x1f0] sm:$0xff] }
   0xd   :  { %7499 = vmatmul.mubr.msk.f32.vlgmr.msra.gmra.mxu0 %vm42_vm0, %v9119_v16  ;;  %7507 = vmatmul.mubr.msk.f32.vlgmr.msra.gmra.mxu1 %vm42_vm0, %v6389_v17  ;;  %v6399_v28 = vld [vmem:[%s12213_s0 + $0x1b0] sm:$0xff]  ;;  %v9190_v29 = vld [vmem:[%s12213_s0 + $0x200] sm:$0xff] }
   0xe   :  { %7513 = vmatpush3.msra.mxu0 %v9102_v14  ;;  %7501 = vmatprep.mubr.msk.f32.mxu0 %vm42_vm0, %v9129_v18  ;;  %v9198_v30 = vld [vmem:[%s12214_s1 + $0x40] sm:$0xff]  ;;  %v9208_v32 = vld [vmem:[%s12213_s0 + $0x210] sm:$0xff] }
   0xf   :  { %7509 = vmatprep.mubr.msk.f32.mxu1 %vm42_vm0, %v6390_v19  ;;  %7521 = vmatpush3.msra.mxu1 %v9107_v15  ;;  %v6400_v31 = vld [vmem:[%s12213_s0 + $0x1c0] sm:$0xff]  ;;  %v9221_v34 = vld [vmem:[%s12213_s0 + $0x2d0] sm:$0xff] }
  0x10   :  { %7528 = vmatprep.subr.mxu0 %v9140_v20  ;;  %7536 = vmatprep.subr.mxu1 %v9145_v21  ;;  %v9216_v33 = vld [vmem:[%s12213_s0 + $0x280] sm:$0xff]  ;;  %v9235_v35 = vld [vmem:[%s12213_s0 + $0x290] sm:$0xff] }
  0x11   :  { %7502 = vmatmul.mubr.msk.f32.gmra.mxu0 %vm42_vm0, %v9153_v22  ;;  %7510 = vmatmul.mubr.msk.f32.gmra.mxu1 %vm42_vm0, %v6391_v23  ;;  %v9240_v36 = vld [vmem:[%s12213_s0 + $0x2e0] sm:$0xff]  ;;  %v9250_v38 = vld [vmem:[%s12213_s0 + $0x2f0] sm:$0xff] }
  0x12   :  { %7514 = vmatprep.mubr.msk.f32.mxu0 %vm42_vm0, %v6397_v24  ;;  %7522 = vmatprep.mubr.msk.f32.mxu1 %vm42_vm0, %v9166_v25  ;;  %v9245_v37 = vld [vmem:[%s12213_s0 + $0x2a0] sm:$0xff]  ;;  %v9262_v39 = vld [vmem:[%s12213_s0 + $0x2b0] sm:$0xff] }
  0x13   :  { %v9267_v40 = vld [vmem:[%s12213_s0 + $0x300] sm:$0xff]  ;;  %v6443_v42 = vld [vmem:[%s12213_s0 + $0xf0] sm:$0xff] }
  0x14   :  { %v9275_v41 = vld [vmem:[%s12213_s0 + $0x320] sm:$0xff] }
  0x15   :  { %7515 = vmatmul.mubr.msk.f32.vlgmr.msra.gmra.mxu0 %vm42_vm0, %v6398_v26  ;;  %7523 = vmatmul.mubr.msk.f32.vlgmr.msra.gmra.mxu1 %vm42_vm0, %v9182_v27 }
  0x16   :  { %7529 = vmatpush3.msra.mxu0 %v9140_v20  ;;  %7517 = vmatprep.mubr.msk.f32.mxu0 %vm42_vm0, %v6399_v28 }
  0x17   :  { %7525 = vmatprep.mubr.msk.f32.mxu1 %vm42_vm0, %v9190_v29  ;;  %7537 = vmatpush3.msra.mxu1 %v9145_v21 }
  0x18   :  { %7544 = vmatprep.subr.mxu0 %v9198_v30  ;;  %7552 = vmatprep.subr.mxu1 %v9020_v0 }
  0x19   :  { %7518 = vmatmul.mubr.msk.f32.gmra.mxu0 %vm42_vm0, %v6400_v31  ;;  %7526 = vmatmul.mubr.msk.f32.gmra.mxu1 %vm42_vm0, %v9208_v32 }
  0x1a   :  { %7530 = vmatprep.mubr.msk.f32.mxu0 %vm42_vm0, %v9216_v33  ;;  %7538 = vmatprep.mubr.msk.f32.mxu1 %vm42_vm0, %v9221_v34 }
  0x1d   :  { %7531 = vmatmul.mubr.msk.f32.vlgmr.msra.gmra.mxu0 %vm42_vm0, %v9235_v35  ;;  %7539 = vmatmul.mubr.msk.f32.vlgmr.msra.gmra.mxu1 %vm42_vm0, %v9240_v36 }
  0x1e   :  { %7545 = vmatpush3.msra.mxu0 %v9198_v30  ;;  %7533 = vmatprep.mubr.msk.f32.mxu0 %vm42_vm0, %v9245_v37 }
  0x1f   :  { %7541 = vmatprep.mubr.msk.f32.mxu1 %vm42_vm0, %v9250_v38  ;;  %7553 = vmatpush3.msra.mxu1 %v9020_v0 }
  0x20   :  { %7560 = vmatprep.subr.mxu0 %v9025_v1  ;;  %7568 = vmatprep.subr.mxu1 %v9050_v6 }
  0x21   :  { %13 = vsyncpa [#allocation3], 0  ;;  %7534 = vmatmul.mubr.msk.f32.gmra.mxu0 %vm42_vm0, %v9262_v39  ;;  %7542 = vmatmul.mubr.msk.f32.gmra.mxu1 %vm42_vm0, %v9267_v40  ;;  %v9292_v43 = vld [vmem:[%s12213_s0 + $0x330] sm:$0xff]  ;;  %v9297_v44 = vld [vmem:[%s12213_s0 + $0x100] sm:$0xff]  ;;  %vm8970_vm1 = vmmov 0   ;;  %vm5804_vm2 = vcmask 1041408  }
  0x22   :  { %7546 = vmatprep.mubr.msk.f32.mxu0 %vm42_vm0, %v9275_v41  ;;  %7554 = vmatprep.mubr.msk.f32.mxu1 %vm42_vm0, %v6443_v42  ;;  %v9302_v45 = vld [vmem:[%s12213_s0 + $0x340] sm:$0xff]  ;;  %v9307_v46 = vld [vmem:[%s12213_s0 + $0x110] sm:$0xff]  ;;  %s8971_s30 = smov [#allocation2]  }
  0x23   :  { %v9319_v47 = vld [vmem:[%s12213_s0 + $0x350] sm:$0xff]  ;;  %v9324_v48 = vld [vmem:[%s12213_s0 + $0x120] sm:$0xff] }
  0x24   :  { %v1189_v49 = vld [vmem:[%s12213_s0 + $0x2] sm:$0xff]  ;;  %v9344_v50 = vld [vmem:[%s12213_s0 + $0x12] sm:$0xff] }
  0x25   :  { %7547 = vmatmul.mubr.msk.f32.vlgmr.msra.gmra.mxu0 %vm42_vm0, %v9292_v43  ;;  %7555 = vmatmul.mubr.msk.f32.vlgmr.msra.gmra.mxu1 %vm42_vm0, %v9297_v44  ;;  %v9349_v51 = vld [vmem:[%s12213_s0 + $0x22] sm:$0xff]  ;;  %v9361_v52 = vld [vmem:[%s12213_s0 + $0x32] sm:$0xff] }
  0x26   :  { %7561 = vmatpush3.msra.mxu0 %v9025_v1  ;;  %7549 = vmatprep.mubr.msk.f32.mxu0 %vm42_vm0, %v9302_v45  ;;  %v6463_v53 = vld [vmem:[%s12213_s0 + $0x230] sm:$0xff]  ;;  %v6464_v54 = vld [vmem:[%s12213_s0 + $0x240] sm:$0xff] }
  0x27   :  { %7557 = vmatprep.mubr.msk.f32.mxu1 %vm42_vm0, %v9307_v46  ;;  %7569 = vmatpush3.msra.mxu1 %v9050_v6  ;;  %v6465_v55 = vld [vmem:[%s12213_s0 + $0x250] sm:$0xff]  ;;  %v6466_v56 = vld [vmem:[%s12213_s0 + $0x260] sm:$0xff] }
  0x28   :  { %7576 = vmatprep.subr.mxu0 %v9055_v7  ;;  %7584 = vmatprep.subr.mxu1 %v9102_v14  ;;  %v6471_v57 = vld [vmem:[%s12213_s0 + $0x142] sm:$0xff]  ;;  %v6472_v58 = vld [vmem:[%s12213_s0 + $0x152] sm:$0xff] }
  0x29   :  { %7550 = vmatmul.mubr.msk.f32.gmra.mxu0 %vm42_vm0, %v9319_v47  ;;  %7558 = vmatmul.mubr.msk.f32.gmra.mxu1 %vm42_vm0, %v9324_v48  ;;  %v6473_v59 = vld [vmem:[%s12213_s0 + $0x162] sm:$0xff]  ;;  %v6474_v60 = vld [vmem:[%s12213_s0 + $0x172] sm:$0xff] }
  0x2a   :  { %7562 = vmatprep.mubr.msk.f32.mxu0 %vm42_vm0, %v9091_v12  ;;  %7570 = vmatprep.mubr.msk.f32.mxu1 %vm42_vm0, %v1189_v49  ;;  %v9426_v61 = vld [vmem:[%s12213_s0 + $0x370] sm:$0xff]  ;;  %v9431_v62 = vld [vmem:[%s12213_s0 + $0x282] sm:$0xff] }
  0x2b   :  { %v9445_v63 = vld [vmem:[%s12213_s0 + $0x380] sm:$0xff]  ;;  %v9450_v2 = vld [vmem:[%s12213_s0 + $0x292] sm:$0xff] }
  0x2c   :  { %v9455_v3 = vld [vmem:[%s12213_s0 + $0x390] sm:$0xff]  ;;  %v9460_v12 = vld [vmem:[%s12213_s0 + $0x2a2] sm:$0xff] }
  0x2d   :  { %7563 = vmatmul.mubr.msk.f32.vlgmr.msra.gmra.mxu0 %vm42_vm0, %v9119_v16  ;;  %7571 = vmatmul.mubr.msk.f32.vlgmr.msra.gmra.mxu1 %vm42_vm0, %v9344_v50  ;;  %v9472_v13 = vld [vmem:[%s12213_s0 + $0x3a0] sm:$0xff]  ;;  %v9477_v17 = vld [vmem:[%s12213_s0 + $0x2b2] sm:$0xff] }
  0x2e   :  { %7577 = vmatpush3.msra.mxu0 %v9055_v7  ;;  %7565 = vmatprep.mubr.msk.f32.mxu0 %vm42_vm0, %v9129_v18  ;;  %v6511_v19 = vld [vmem:[%s12213_s0 + $0x3c0] sm:$0xff]  ;;  %v6512_v23 = vld [vmem:[%s12213_s0 + $0x3d0] sm:$0xff] }
  0x2f   :  { %7573 = vmatprep.mubr.msk.f32.mxu1 %vm42_vm0, %v9349_v51  ;;  %7585 = vmatpush3.msra.mxu1 %v9102_v14  ;;  %v6513_v24 = vld [vmem:[%s12213_s0 + $0x3e0] sm:$0xff]  ;;  %v6519_v26 = vld [vmem:[%s12213_s0 + $0x410] sm:$0xff] }
  0x30   :  { %7592 = vmatprep.subr.mxu0 %v9107_v15  ;;  %7600 = vmatprep.subr.mxu1 %v9140_v20  ;;  %v6520_v28 = vld [vmem:[%s12213_s0 + $0x420] sm:$0xff]  ;;  %v6521_v31 = vld [vmem:[%s12213_s0 + $0x430] sm:$0xff] }
  0x31   :  { %7566 = vmatmul.mubr.msk.f32.gmra.mxu0 %vm42_vm0, %v9153_v22  ;;  %7574 = vmatmul.mubr.msk.f32.gmra.mxu1 %vm42_vm0, %v9361_v52 }
  0x32   :  { %7578 = vmatprep.mubr.msk.f32.mxu0 %vm42_vm0, %v9166_v25  ;;  %7586 = vmatprep.mubr.msk.f32.mxu1 %vm42_vm0, %v6463_v53  ;;  %v6514_v25 = vld [vmem:[%s12213_s0 + $0x3f0] sm:$0xff] }
  0x35   :  { %7579 = vmatmul.mubr.msk.f32.vlgmr.msra.gmra.mxu0 %vm42_vm0, %v9182_v27  ;;  %7587 = vmatmul.mubr.msk.f32.vlgmr.msra.gmra.mxu1 %vm42_vm0, %v6464_v54  ;;  %v9537_v27 = vld [vmem:[%s12213_s0 + $0x460] sm:$0xff] }
  0x36   :  { %7593 = vmatpush3.msra.mxu0 %v9107_v15  ;;  %7581 = vmatprep.mubr.msk.f32.mxu0 %vm42_vm0, %v9190_v29  ;;  %v6528_v29 = vld [vmem:[%s12213_s0 + $0x470] sm:$0xff] }
  0x37   :  { %7589 = vmatprep.mubr.msk.f32.mxu1 %vm42_vm0, %v6465_v55  ;;  %7601 = vmatpush3.msra.mxu1 %v9140_v20 }
  0x38   :  { %7608 = vmatprep.subr.mxu0 %v9145_v21  ;;  %7616 = vmatprep.subr.mxu1 %v9198_v30 }
  0x39   :  { %7582 = vmatmul.mubr.msk.f32.gmra.mxu0 %vm42_vm0, %v9208_v32  ;;  %7590 = vmatmul.mubr.msk.f32.gmra.mxu1 %vm42_vm0, %v6466_v56  ;;  %v6529_v32 = vld [vmem:[%s12213_s0 + $0x480] sm:$0xff] }
  0x3a   :  { %7594 = vmatprep.mubr.msk.f32.mxu0 %vm42_vm0, %v6471_v57  ;;  %7602 = vmatprep.mubr.msk.f32.mxu1 %vm42_vm0, %v9275_v41 }
  0x3d   :  { %7595 = vmatmul.mubr.msk.f32.vlgmr.msra.gmra.mxu0 %vm42_vm0, %v6472_v58  ;;  %7603 = vmatmul.mubr.msk.f32.vlgmr.msra.gmra.mxu1 %vm42_vm0, %v9292_v43 }
  0x3e   :  { %7609 = vmatpush3.msra.mxu0 %v9145_v21  ;;  %7597 = vmatprep.mubr.msk.f32.mxu0 %vm42_vm0, %v6473_v59 }
  0x3f   :  { %7605 = vmatprep.mubr.msk.f32.mxu1 %vm42_vm0, %v9302_v45  ;;  %7617 = vmatpush3.msra.mxu1 %v9198_v30 }
  0x40   :  { %7624 = vmatprep.subr.mxu0 %v9020_v0  ;;  %7632 = vmatprep.subr.mxu1 %v9025_v1 }
  0x41   :  { %7598 = vmatmul.mubr.msk.f32.gmra.mxu0 %vm42_vm0, %v6474_v60  ;;  %7606 = vmatmul.mubr.msk.f32.gmra.mxu1 %vm42_vm0, %v9319_v47 }
  0x42   :  { %7610 = vmatprep.mubr.msk.f32.mxu0 %vm42_vm0, %v9426_v61  ;;  %7618 = vmatprep.mubr.msk.f32.mxu1 %vm42_vm0, %v9431_v62 }
  0x45   :  { %7611 = vmatmul.mubr.msk.f32.vlgmr.msra.gmra.mxu0 %vm42_vm0, %v9445_v63  ;;  %7619 = vmatmul.mubr.msk.f32.vlgmr.msra.gmra.mxu1 %vm42_vm0, %v9450_v2 }
  0x46   :  { %7625 = vmatpush3.msra.mxu0 %v9020_v0  ;;  %7613 = vmatprep.mubr.msk.f32.mxu0 %vm42_vm0, %v9455_v3 }
  0x47   :  { %7621 = vmatprep.mubr.msk.f32.mxu1 %vm42_vm0, %v9460_v12  ;;  %7633 = vmatpush3.msra.mxu1 %v9025_v1 }
  0x48   :  { %7640 = vmatprep.subr.mxu0 %v9050_v6  ;;  %7648 = vmatprep.subr.mxu1 %v9055_v7 }
  0x49   :  { %7614 = vmatmul.mubr.msk.f32.gmra.mxu0 %vm42_vm0, %v9472_v13  ;;  %7622 = vmatmul.mubr.msk.f32.gmra.mxu1 %vm42_vm0, %v9477_v17 }
  0x4a   :  { %7626 = vmatprep.mubr.msk.f32.mxu0 %vm42_vm0, %v9221_v34  ;;  %7634 = vmatprep.mubr.msk.f32.mxu1 %vm42_vm0, %v9216_v33  ;;  %v6522_v33 = vld [vmem:[%s12213_s0 + $0x440] sm:$0xff]  ;;  %v6530_v34 = vld [vmem:[%s12213_s0 + $0x490] sm:$0xff] }
  0x4d   :  { %7627 = vmatmul.mubr.msk.f32.vlgmr.msra.gmra.mxu0 %vm42_vm0, %v9240_v36  ;;  %7635 = vmatmul.mubr.msk.f32.vlgmr.msra.gmra.mxu1 %vm42_vm0, %v9235_v35  ;;  %v6538_v35 = vld [vmem:[%s12213_s0 + $0x40] sm:$0xff] }
  0x4e   :  { %7641 = vmatpush3.msra.mxu0 %v9050_v6  ;;  %7629 = vmatprep.mubr.msk.f32.mxu0 %vm42_vm0, %v9250_v38 }
  0x4f   :  { %7637 = vmatprep.mubr.msk.f32.mxu1 %vm42_vm0, %v9245_v37  ;;  %7649 = vmatpush3.msra.mxu1 %v9055_v7 }
  0x50   :  { %7656 = vmatprep.subr.mxu0 %v9102_v14  ;;  %7664 = vmatprep.subr.mxu1 %v9107_v15 }
  0x51   :  { %7630 = vmatmul.mubr.msk.f32.gmra.mxu0 %vm42_vm0, %v9267_v40  ;;  %7638 = vmatmul.mubr.msk.f32.gmra.mxu1 %vm42_vm0, %v9262_v39 }
  0x52   :  { %7642 = vmatprep.mubr.msk.f32.mxu0 %vm42_vm0, %v9275_v41  ;;  %7650 = vmatprep.mubr.msk.f32.mxu1 %vm42_vm0, %v6511_v19 }
  0x55   :  { %7643 = vmatmul.mubr.msk.f32.vlgmr.msra.gmra.mxu0 %vm42_vm0, %v9292_v43  ;;  %7651 = vmatmul.mubr.msk.f32.vlgmr.msra.gmra.mxu1 %vm42_vm0, %v6512_v23 }
  0x56   :  { %7657 = vmatpush3.msra.mxu0 %v9102_v14  ;;  %7645 = vmatprep.mubr.msk.f32.mxu0 %vm42_vm0, %v9302_v45 }
  0x57   :  { %7665 = vmatpush3.msra.mxu1 %v9107_v15  ;;  %7653 = vmatprep.mubr.msk.f32.mxu1 %vm42_vm0, %v6513_v24 }
  0x58   :  { %7672 = vmatprep.subr.mxu0 %v9140_v20  ;;  %7680 = vmatprep.subr.mxu1 %v9145_v21 }
  0x59   :  { %7646 = vmatmul.mubr.msk.f32.gmra.mxu0 %vm42_vm0, %v9319_v47  ;;  %7654 = vmatmul.mubr.msk.f32.gmra.mxu1 %vm42_vm0, %v6514_v25 }
  0x5a   :  { %7658 = vmatprep.mubr.msk.f32.mxu0 %vm42_vm0, %v6519_v26  ;;  %7666 = vmatprep.mubr.msk.f32.mxu1 %vm42_vm0, %v9537_v27 }
  0x5d   :  { %7659 = vmatmul.mubr.msk.f32.vlgmr.msra.gmra.mxu0 %vm42_vm0, %v6520_v28  ;;  %7667 = vmatmul.mubr.msk.f32.vlgmr.msra.gmra.mxu1 %vm42_vm0, %v6528_v29 }
  0x5e   :  { %7673 = vmatpush3.msra.mxu0 %v9140_v20  ;;  %7661 = vmatprep.mubr.msk.f32.mxu0 %vm42_vm0, %v6521_v31 }
  0x5f   :  { %7681 = vmatpush3.msra.mxu1 %v9145_v21  ;;  %7669 = vmatprep.mubr.msk.f32.mxu1 %vm42_vm0, %v6529_v32 }
  0x60   :  { %7688 = vmatprep.subr.mxu0 %v9198_v30  ;;  %7696 = vmatprep.subr.mxu1 %v9020_v0 }
  0x61   :  { %7662 = vmatmul.mubr.msk.f32.gmra.mxu0 %vm42_vm0, %v6522_v33  ;;  %7670 = vmatmul.mubr.msk.f32.gmra.mxu1 %vm42_vm0, %v6530_v34 }
  0x62   :  { %7674 = vmatprep.mubr.msk.f32.mxu0 %vm42_vm0, %v9043_v5  ;;  %7682 = vmatprep.mubr.msk.f32.mxu1 %vm42_vm0, %v9038_v4  ;;  %v6546_v5 = vld [vmem:[%s12213_s0 + $0x90] sm:$0xff]  ;;  %v6576_v4 = vld [vmem:[%s12213_s0 + $0x4c0] sm:$0xff] }
  0x65   :  { %7675 = vmatmul.mubr.msk.f32.vlgmr.msra.gmra.mxu0 %vm42_vm0, %v9071_v9  ;;  %7683 = vmatmul.mubr.msk.f32.vlgmr.msra.gmra.mxu1 %vm42_vm0, %v9062_v8  ;;  %v6583_v8 = vld [vmem:[%s12213_s0 + $0x3c2] sm:$0xff]  ;;  %v6584_v9 = vld [vmem:[%s12213_s0 + $0x3d2] sm:$0xff] }
  0x66   :  { %7689 = vmatpush3.msra.mxu0 %v9198_v30  ;;  %7677 = vmatprep.mubr.msk.f32.mxu0 %vm42_vm0, %v9083_v11  ;;  %v6586_v11 = vld [vmem:[%s12213_s0 + $0x3f2] sm:$0xff] }
  0x67   :  { %7697 = vmatpush3.msra.mxu1 %v9020_v0  ;;  %7685 = vmatprep.mubr.msk.f32.mxu1 %vm42_vm0, %v9078_v10  ;;  %v6554_v0 = vld [vmem:[%s12213_s0 + $0xe0] sm:$0xff] }
  0x68   :  { %7704 = vmatprep.subr.mxu0 %v9025_v1  ;;  %7712 = vmatprep.subr.mxu1 %v9050_v6  ;;  %v6585_v10 = vld [vmem:[%s12213_s0 + $0x3e2] sm:$0xff] }
  0x69   :  { %7678 = vmatmul.mubr.msk.f32.gmra.mxu0 %vm42_vm0, %v6538_v35  ;;  %7686 = vmatmul.mubr.msk.f32.gmra.mxu1 %vm42_vm0, %v6546_v5 }
  0x6a   :  { %7690 = vmatprep.mubr.msk.f32.mxu0 %vm42_vm0, %v9119_v16  ;;  %7698 = vmatprep.mubr.msk.f32.mxu1 %vm42_vm0, %v9426_v61 }
  0x6d   :  { %7691 = vmatmul.mubr.msk.f32.vlgmr.msra.gmra.mxu0 %vm42_vm0, %v9129_v18  ;;  %7699 = vmatmul.mubr.msk.f32.vlgmr.msra.gmra.mxu1 %vm42_vm0, %v9445_v63 }
  0x6e   :  { %7705 = vmatpush3.msra.mxu0 %v9025_v1  ;;  %7693 = vmatprep.mubr.msk.f32.mxu0 %vm42_vm0, %v9153_v22  ;;  %v6575_v1 = vld [vmem:[%s12213_s0 + $0x4b0] sm:$0xff] }
  0x6f   :  { %7713 = vmatpush3.msra.mxu1 %v9050_v6  ;;  %7701 = vmatprep.mubr.msk.f32.mxu1 %vm42_vm0, %v9455_v3  ;;  %v6577_v6 = vld [vmem:[%s12213_s0 + $0x4d0] sm:$0xff] }
  0x70   :  { %7720 = vmatprep.subr.mxu0 %v9055_v7  ;;  %7728 = vmatprep.subr.mxu1 %v9102_v14 }
  0x71   :  { %7694 = vmatmul.mubr.msk.f32.gmra.mxu0 %vm42_vm0, %v6554_v0  ;;  %7702 = vmatmul.mubr.msk.f32.gmra.mxu1 %vm42_vm0, %v9472_v13 }
  0x72   :  { %7706 = vmatprep.mubr.msk.f32.mxu0 %vm42_vm0, %v9275_v41  ;;  %7714 = vmatprep.mubr.msk.f32.mxu1 %vm42_vm0, %v9431_v62 }
  0x75   :  { %7707 = vmatmul.mubr.msk.f32.vlgmr.msra.gmra.mxu0 %vm42_vm0, %v9292_v43  ;;  %7715 = vmatmul.mubr.msk.f32.vlgmr.msra.gmra.mxu1 %vm42_vm0, %v9450_v2 }
  0x76   :  { %7721 = vmatpush3.msra.mxu0 %v9055_v7  ;;  %7709 = vmatprep.mubr.msk.f32.mxu0 %vm42_vm0, %v9302_v45  ;;  %v6578_v7 = vld [vmem:[%s12213_s0 + $0x4e0] sm:$0xff] }
  0x77   :  { %7729 = vmatpush3.msra.mxu1 %v9102_v14  ;;  %7717 = vmatprep.mubr.msk.f32.mxu1 %vm42_vm0, %v9460_v12  ;;  %v6598_v14 = vld [vmem:[%s12213_s0 + $0x130] sm:$0xff] }
  0x78   :  { %7736 = vmatprep.subr.mxu0 %v9107_v15  ;;  %7744 = vmatprep.subr.mxu1 %v9140_v20 }
  0x79   :  { %7710 = vmatmul.mubr.msk.f32.gmra.mxu0 %vm42_vm0, %v9319_v47  ;;  %7718 = vmatmul.mubr.msk.f32.gmra.mxu1 %vm42_vm0, %v9477_v17 }
  0x7a   :  { %7722 = vmatprep.mubr.msk.f32.mxu0 %vm42_vm0, %v9537_v27  ;;  %7730 = vmatprep.mubr.msk.f32.mxu1 %vm42_vm0, %v6575_v1 }
  0x7d   :  { %7723 = vmatmul.mubr.msk.f32.vlgmr.msra.gmra.mxu0 %vm42_vm0, %v6528_v29  ;;  %7731 = vmatmul.mubr.msk.f32.vlgmr.msra.gmra.mxu1 %vm42_vm0, %v6576_v4 }
  0x7e   :  { %7737 = vmatpush3.msra.mxu0 %v9107_v15  ;;  %7725 = vmatprep.mubr.msk.f32.mxu0 %vm42_vm0, %v6529_v32  ;;  %v6606_v15 = vld [vmem:[%s12213_s0 + $0x42] sm:$0xff] }
  0x7f   :  { %7745 = vmatpush3.msra.mxu1 %v9140_v20  ;;  %7733 = vmatprep.mubr.msk.f32.mxu1 %vm42_vm0, %v6577_v6 }
  0x80   :  { %7752 = vmatprep.subr.mxu0 %v9145_v21  ;;  %7760 = vmatprep.subr.mxu1 %v9198_v30 }
  0x81   :  { %7726 = vmatmul.mubr.msk.f32.gmra.mxu0 %vm42_vm0, %v6530_v34  ;;  %7734 = vmatmul.mubr.msk.f32.gmra.mxu1 %vm42_vm0, %v6578_v7 }
  0x82   :  { %7738 = vmatprep.mubr.msk.f32.mxu0 %vm42_vm0, %v6583_v8  ;;  %7746 = vmatprep.mubr.msk.f32.mxu1 %vm42_vm0, %v9119_v16 }
  0x85   :  { %7739 = vmatmul.mubr.msk.f32.vlgmr.msra.gmra.mxu0 %vm42_vm0, %v6584_v9  ;;  %7747 = vmatmul.mubr.msk.f32.vlgmr.msra.gmra.mxu1 %vm42_vm0, %v9129_v18 }
  0x86   :  { %7753 = vmatpush3.msra.mxu0 %v9145_v21  ;;  %7741 = vmatprep.mubr.msk.f32.mxu0 %vm42_vm0, %v6585_v10 }
  0x87   :  { %7761 = vmatpush3.msra.mxu1 %v9198_v30  ;;  %7749 = vmatprep.mubr.msk.f32.mxu1 %vm42_vm0, %v9153_v22 }
  0x89   :  { %7742 = vmatmul.mubr.msk.f32.gmra.mxu0 %vm42_vm0, %v6586_v11  ;;  %7750 = vmatmul.mubr.msk.f32.gmra.mxu1 %vm42_vm0, %v6554_v0 }
  0x8a   :  { %7754 = vmatprep.mubr.msk.f32.mxu0 %vm42_vm0, %v9297_v44  ;;  %7762 = vmatprep.mubr.msk.f32.mxu1 %vm42_vm0, %v9344_v50 }
  0x8d   :  { %7755 = vmatmul.mubr.msk.f32.vlgmr.msra.gmra.mxu0 %vm42_vm0, %v9307_v46  ;;  %7763 = vmatmul.mubr.msk.f32.vlgmr.msra.gmra.mxu1 %vm42_vm0, %v9349_v51 }
  0x8e   :  { %7757 = vmatprep.mubr.msk.f32.mxu0 %vm42_vm0, %v9324_v48  ;;  %7765 = vmatprep.mubr.msk.f32.mxu1 %vm42_vm0, %v9361_v52 }
  0x91   :  { %7758 = vmatmul.mubr.msk.f32.gmra.mxu0 %vm42_vm0, %v6598_v14  ;;  %7766 = vmatmul.mubr.msk.f32.gmra.mxu1 %vm42_vm0, %v6606_v15 }
  0xc5   :  { %v7484_v16 = vpop.f32.mrf.mxu0  ;;  %v7492_v18 = vpop.f32.mrf.mxu1 }
  0xc6   :  { %v224_v20 = vadd.f32 %v7492_v18, %v7484_v16 }
  0xc7   :  { %v121_v21 = vpop.f32.mrf.mxu0  ;;  %v218_v22 = vpop.f32.mrf.mxu1 }
  0xc8   :  { %v219_v30 = vadd.f32 %v218_v22, %v121_v21 }
  0xc9   :  { %v7487_v36 = vpop.f32.mrf.mxu0  ;;  %v7495_v37 = vpop.f32.mrf.mxu1 }
  0xca   :  { %v234_v38 = vadd.f32 %v7495_v37, %v7487_v36 }
  0xcb   :  { %v131_v39 = vpop.f32.mrf.mxu0  ;;  %v228_v40 = vpop.f32.mrf.mxu1 }
  0xcc   :  { %v229_v41 = vadd.f32 %v228_v40, %v131_v39 }
  0xcd   :  { %v7500_v42 = vpop.f32.mrf.mxu0  ;;  %v7508_v43 = vpop.f32.mrf.mxu1 }
  0xce   :  { %v342_v44 = vadd.f32 %v7500_v42, %v224_v20 }
  0xcf   :  { %v322_v45 = vpop.f32.mrf.mxu0  ;;  %v430_v46 = vpop.f32.mrf.mxu1 }
  0xd0   :  { %v450_v47 = vadd.f32 %v7508_v43, %v342_v44  ;;  %v341_v48 = vadd.f32 %v322_v45, %v219_v30 }
  0xd1   :  { %v7503_v49 = vpop.f32.mrf.mxu0  ;;  %v7511_v50 = vpop.f32.mrf.mxu1 }
  0xd2   :  { %v449_v51 = vadd.f32 %v430_v46, %v341_v48  ;;  %v344_v52 = vadd.f32 %v7503_v49, %v234_v38 }
  0xd3   :  { %v332_v53 = vpop.f32.mrf.mxu0  ;;  %v440_v54 = vpop.f32.mrf.mxu1 }
  0xd4   :  { %v452_v55 = vadd.f32 %v7511_v50, %v344_v52  ;;  %v343_v56 = vadd.f32 %v332_v53, %v229_v41 }
  0xd5   :  { %v7516_v57 = vpop.f32.mrf.mxu0  ;;  %v7524_v58 = vpop.f32.mrf.mxu1 }
  0xd6   :  { %v451_v59 = vadd.f32 %v440_v54, %v343_v56  ;;  %v558_v60 = vadd.f32 %v7516_v57, %v450_v47 }
  0xd7   :  { %v538_v61 = vpop.f32.mrf.mxu0  ;;  %v646_v62 = vpop.f32.mrf.mxu1 }
  0xd8   :  { %v666_v63 = vadd.f32 %v7524_v58, %v558_v60  ;;  %v557_v2 = vadd.f32 %v538_v61, %v449_v51 }
  0xd9   :  { %v7519_v3 = vpop.f32.mrf.mxu0  ;;  %v7527_v12 = vpop.f32.mrf.mxu1 }
  0xda   :  { %v665_v13 = vadd.f32 %v646_v62, %v557_v2  ;;  %v560_v17 = vadd.f32 %v7519_v3, %v452_v55 }
  0xdb   :  { %v548_v19 = vpop.f32.mrf.mxu0  ;;  %v656_v23 = vpop.f32.mrf.mxu1 }
  0xdc   :  { %v668_v24 = vadd.f32 %v7527_v12, %v560_v17  ;;  %v559_v25 = vadd.f32 %v548_v19, %v451_v59 }
  0xdd   :  { %v7532_v26 = vpop.f32.mrf.mxu0  ;;  %v7540_v27 = vpop.f32.mrf.mxu1 }
  0xde   :  { %v667_v28 = vadd.f32 %v656_v23, %v559_v25  ;;  %v774_v29 = vadd.f32 %v7532_v26, %v666_v63 }
  0xdf   :  { %v754_v31 = vpop.f32.mrf.mxu0  ;;  %v862_v32 = vpop.f32.mrf.mxu1 }
  0xe0   :  { %v882_v33 = vadd.f32 %v7540_v27, %v774_v29  ;;  %v773_v34 = vadd.f32 %v754_v31, %v665_v13 }
  0xe1   :  { %v7535_v35 = vpop.f32.mrf.mxu0  ;;  %v7543_v5 = vpop.f32.mrf.mxu1 }
  0xe2   :  { %v881_v0 = vadd.f32 %v862_v32, %v773_v34  ;;  %v776_v1 = vadd.f32 %v7535_v35, %v668_v24 }
  0xe3   :  { %v764_v4 = vpop.f32.mrf.mxu0  ;;  %v872_v6 = vpop.f32.mrf.mxu1 }
  0xe4   :  { %v884_v7 = vadd.f32 %v7543_v5, %v776_v1  ;;  %v775_v8 = vadd.f32 %v764_v4, %v667_v28 }
  0xe5   :  { %v7548_v9 = vpop.f32.mrf.mxu0  ;;  %v7556_v10 = vpop.f32.mrf.mxu1 }
  0xe6   :  { %v883_v11 = vadd.f32 %v872_v6, %v775_v8  ;;  %v9711_v14 = vadd.f32 %v7548_v9, %v882_v33 }
  0xe7   :  { %v970_v15 = vpop.f32.mrf.mxu0  ;;  %v1085_v16 = vpop.f32.mrf.mxu1 }
  0xe8   :  { %v9713_v18 = vadd.f32 %v970_v15, %v881_v0 }
  0xe9   :  { %v7551_v20 = vpop.f32.mrf.mxu0  ;;  %v7559_v21 = vpop.f32.mrf.mxu1 }
  0xea   :  { %v9715_v22 = vadd.f32 %v7551_v20, %v884_v7 }
  0xeb   :  { %v980_v30 = vpop.f32.mrf.mxu0  ;;  %v1095_v36 = vpop.f32.mrf.mxu1 }
  0xec   :  { %v9717_v37 = vadd.f32 %v980_v30, %v883_v11 }
  0xed   :  { %v7564_v38 = vpop.f32.mrf.mxu0  ;;  %v7572_v39 = vpop.f32.mrf.mxu1 }
  0xee   :  { %v1176_v40 = vadd.f32 %v7564_v38, %v7556_v10 }
  0xef   :  { %v1170_v41 = vpop.f32.mrf.mxu0  ;;  %v1271_v42 = vpop.f32.mrf.mxu1 }
  0xf0   :  { %v1291_v43 = vadd.f32 %v7572_v39, %v1176_v40  ;;  %v1171_v44 = vadd.f32 %v1170_v41, %v1085_v16 }
  0xf1   :  { %v7567_v45 = vpop.f32.mrf.mxu0  ;;  %v7575_v46 = vpop.f32.mrf.mxu1 }
  0xf2   :  { %v1290_v47 = vadd.f32 %v1271_v42, %v1171_v44  ;;  %v1186_v48 = vadd.f32 %v7567_v45, %v7559_v21 }
  0xf3   :  { %v1180_v49 = vpop.f32.mrf.mxu0  ;;  %v1281_v50 = vpop.f32.mrf.mxu1 }
  0xf4   :  { %v1293_v51 = vadd.f32 %v7575_v46, %v1186_v48  ;;  %v1181_v52 = vadd.f32 %v1180_v49, %v1095_v36  ;;  %v8969_v48 = vmov 0.0   ;;  %v6626_v49 = vld [vmem:[%s12216_s3 + $0x278] sm:$0xff] }
  0xf5   :  { %v7580_v53 = vpop.f32.mrf.mxu0  ;;  %v7588_v54 = vpop.f32.mrf.mxu1  ;;  %7803 = vmatprep.subr.mxu1 %v8969_v48  ;;  %7768 = vmatprep.subr.mxu0 %v8969_v48 }
  0xf6   :  { %v1292_v55 = vadd.f32 %v1281_v50, %v1181_v52  ;;  %v1380_v56 = vadd.f32 %v7580_v53, %v1291_v43  ;;  %7804 = vmatpush3.msra.mxu1 %v6626_v49  ;;  %v6642_v52 = vld [vmem:[%s12216_s3 + $0x2f8] sm:$0xff]  ;;  %v6625_v53 = vld [vmem:[%s12216_s3 + $0x270] sm:$0xff]  ;;  %7835 = vmatprep.mubr.msk.f32.mxu1 %vm8970_vm1, %v8969_v48 }
  0xf7   :  { %v1360_v57 = vpop.f32.mrf.mxu0  ;;  %v1466_v58 = vpop.f32.mrf.mxu1  ;;  %7805 = vmatprep.subr.mxu1 %v8969_v48  ;;  %7769 = vmatpush3.msra.mxu0 %v6642_v52  ;;  %v9895_v49 = vld [vmem:[%s12216_s3 + $0x218] sm:$0xff] }
  0xf8   :  { %v1486_v59 = vadd.f32 %v7588_v54, %v1380_v56  ;;  %v1379_v60 = vadd.f32 %v1360_v57, %v1290_v47  ;;  %7806 = vmatpush3.msra.mxu1 %v6625_v53  ;;  %7770 = vmatprep.subr.mxu0 %v8969_v48  ;;  %v6641_v56 = vld [vmem:[%s12216_s3 + $0x2f0] sm:$0xff]  ;;  %v6624_v57 = vld [vmem:[%s12216_s3 + $0x268] sm:$0xff] }
  0xf9   :  { %v7583_v61 = vpop.f32.mrf.mxu0  ;;  %v7591_v62 = vpop.f32.mrf.mxu1  ;;  %7807 = vmatprep.subr.mxu1 %v8969_v48  ;;  %7771 = vmatpush3.msra.mxu0 %v6641_v56 }
  0xfa   :  { %v1485_v63 = vadd.f32 %v1466_v58, %v1379_v60  ;;  %v1382_v2 = vadd.f32 %v7583_v61, %v1293_v51  ;;  %7808 = vmatpush3.msra.mxu1 %v6624_v57  ;;  %7772 = vmatprep.subr.mxu0 %v8969_v48  ;;  %v6640_v60 = vld [vmem:[%s12216_s3 + $0x2e8] sm:$0xff]  ;;  %v6623_v61 = vld [vmem:[%s12216_s3 + $0x260] sm:$0xff]  ;;  %v6630_v57 = vld [vmem:[%s12216_s3 + $0x298] sm:$0xff] }
  0xfb   :  { %v1370_v3 = vpop.f32.mrf.mxu0  ;;  %v1476_v12 = vpop.f32.mrf.mxu1  ;;  %7809 = vmatprep.subr.mxu1 %v8969_v48  ;;  %7773 = vmatpush3.msra.mxu0 %v6640_v60  ;;  %v9915_v60 = vld [vmem:[%s12216_s3 + $0x210] sm:$0xff] }
  0xfc   :  { %v1488_v13 = vadd.f32 %v7591_v62, %v1382_v2  ;;  %v1381_v17 = vadd.f32 %v1370_v3, %v1292_v55  ;;  %7810 = vmatpush3.msra.mxu1 %v6623_v61  ;;  %7774 = vmatprep.subr.mxu0 %v8969_v48  ;;  %v6639_v2 = vld [vmem:[%s12216_s3 + $0x2e0] sm:$0xff]  ;;  %v6622_v3 = vld [vmem:[%s12216_s3 + $0x258] sm:$0xff] }
  0xfd   :  { %v7596_v19 = vpop.f32.mrf.mxu0  ;;  %v7604_v23 = vpop.f32.mrf.mxu1  ;;  %7811 = vmatprep.subr.mxu1 %v8969_v48  ;;  %7775 = vmatpush3.msra.mxu0 %v6639_v2  ;;  %v6628_v2 = vld [vmem:[%s12216_s3 + $0x288] sm:$0xff] }
  0xfe   :  { %v1487_v24 = vadd.f32 %v1476_v12, %v1381_v17  ;;  %v1591_v25 = vadd.f32 %v7596_v19, %v1486_v59  ;;  %7812 = vmatpush3.msra.mxu1 %v6622_v3  ;;  %7776 = vmatprep.subr.mxu0 %v8969_v48  ;;  %v6638_v17 = vld [vmem:[%s12216_s3 + $0x2d8] sm:$0xff]  ;;  %v6621_v19 = vld [vmem:[%s12216_s3 + $0x250] sm:$0xff]  ;;  %v9938_v3 = vld [vmem:[%s12216_s3 + $0x200] sm:$0xff] }
  0xff   :  { %v1571_v26 = vpop.f32.mrf.mxu0  ;;  %v1660_v27 = vpop.f32.mrf.mxu1  ;;  %7813 = vmatprep.subr.mxu1 %v8969_v48  ;;  %7777 = vmatpush3.msra.mxu0 %v6638_v17 }
 0x100   :  { %v1680_v28 = vadd.f32 %v7604_v23, %v1591_v25  ;;  %v1590_v29 = vadd.f32 %v1571_v26, %v1485_v63  ;;  %7814 = vmatpush3.msra.mxu1 %v6621_v19  ;;  %7778 = vmatprep.subr.mxu0 %v8969_v48  ;;  %v6637_v25 = vld [vmem:[%s12216_s3 + $0x2d0] sm:$0xff]  ;;  %v6620_v26 = vld [vmem:[%s12216_s3 + $0x248] sm:$0xff] }
 0x101   :  { %v7599_v31 = vpop.f32.mrf.mxu0  ;;  %v7607_v32 = vpop.f32.mrf.mxu1  ;;  %7815 = vmatprep.subr.mxu1 %v8969_v48  ;;  %7779 = vmatpush3.msra.mxu0 %v6637_v25 }
 0x102   :  { %v1679_v33 = vadd.f32 %v1660_v27, %v1590_v29  ;;  %v1593_v34 = vadd.f32 %v7599_v31, %v1488_v13  ;;  %7816 = vmatpush3.msra.mxu1 %v6620_v26  ;;  %7780 = vmatprep.subr.mxu0 %v8969_v48  ;;  %v6636_v29 = vld [vmem:[%s12216_s3 + $0x2c8] sm:$0xff]  ;;  %v6619_v31 = vld [vmem:[%s12216_s3 + $0x240] sm:$0xff] }
 0x103   :  { %v1581_v35 = vpop.f32.mrf.mxu0  ;;  %v1670_v5 = vpop.f32.mrf.mxu1  ;;  %7817 = vmatprep.subr.mxu1 %v8969_v48  ;;  %7781 = vmatpush3.msra.mxu0 %v6636_v29 }
 0x104   :  { %v1682_v0 = vadd.f32 %v7607_v32, %v1593_v34  ;;  %v1592_v1 = vadd.f32 %v1581_v35, %v1487_v24  ;;  %7818 = vmatpush3.msra.mxu1 %v6619_v31  ;;  %7782 = vmatprep.subr.mxu0 %v8969_v48  ;;  %v6635_v34 = vld [vmem:[%s12216_s3 + $0x2c0] sm:$0xff]  ;;  %v6618_v35 = vld [vmem:[%s12216_s3 + $0x238] sm:$0xff] }
 0x105   :  { %v7612_v4 = vpop.f32.mrf.mxu0  ;;  %v7620_v6 = vpop.f32.mrf.mxu1  ;;  %7819 = vmatprep.subr.mxu1 %v8969_v48  ;;  %7783 = vmatpush3.msra.mxu0 %v6635_v34 }
 0x106   :  { %v1681_v7 = vadd.f32 %v1670_v5, %v1592_v1  ;;  %v1786_v8 = vadd.f32 %v7612_v4, %v1680_v28  ;;  %7820 = vmatpush3.msra.mxu1 %v6618_v35  ;;  %7784 = vmatprep.subr.mxu0 %v8969_v48  ;;  %v6634_v1 = vld [vmem:[%s12216_s3 + $0x2b8] sm:$0xff]  ;;  %v6617_v4 = vld [vmem:[%s12216_s3 + $0x230] sm:$0xff] }
 0x107   :  { %v1766_v9 = vpop.f32.mrf.mxu0  ;;  %v1871_v10 = vpop.f32.mrf.mxu1  ;;  %7821 = vmatprep.subr.mxu1 %v8969_v48  ;;  %7785 = vmatpush3.msra.mxu0 %v6634_v1 }
 0x108   :  { %v9719_v11 = vadd.f32 %v7620_v6, %v1786_v8  ;;  %v1785_v15 = vadd.f32 %v1766_v9, %v1679_v33  ;;  %7822 = vmatpush3.msra.mxu1 %v6617_v4  ;;  %7786 = vmatprep.subr.mxu0 %v8969_v48  ;;  %v6633_v8 = vld [vmem:[%s12216_s3 + $0x2b0] sm:$0xff]  ;;  %v9863_v9 = vld [vmem:[%s12216_s3 + $0x228] sm:$0xff] }
 0x109   :  { %v7615_v16 = vpop.f32.mrf.mxu0  ;;  %v7623_v20 = vpop.f32.mrf.mxu1  ;;  %7823 = vmatprep.subr.mxu1 %v8969_v48  ;;  %7787 = vmatpush3.msra.mxu0 %v6633_v8 }
 0x10a   :  { %v9721_v21 = vadd.f32 %v1871_v10, %v1785_v15  ;;  %v1788_v30 = vadd.f32 %v7615_v16, %v1682_v0  ;;  %7824 = vmatpush3.msra.mxu1 %v9863_v9  ;;  %7788 = vmatprep.subr.mxu0 %v8969_v48  ;;  %v6632_v16 = vld [vmem:[%s12216_s3 + $0x2a8] sm:$0xff] }
 0x10b   :  { %v1776_v36 = vpop.f32.mrf.mxu0  ;;  %v1881_v38 = vpop.f32.mrf.mxu1  ;;  %7825 = vmatprep.subr.mxu1 %v8969_v48  ;;  %7789 = vmatpush3.msra.mxu0 %v6632_v16 }
 0x10c   :  { %v9723_v39 = vadd.f32 %v7623_v20, %v1788_v30  ;;  %v1787_v40 = vadd.f32 %v1776_v36, %v1681_v7  ;;  %v9878_v20 = vld [vmem:[%s12216_s3 + $0x220] sm:$0xff]  ;;  %7790 = vmatprep.subr.mxu0 %v8969_v48  ;;  %7800 = vmatprep.mubr.msk.f32.mxu0 %vm8970_vm1, %v8969_v48 }
 0x10d   :  { %v9725_v41 = vpop.f32.mrf.mxu0  ;;  %v9727_v42 = vpop.f32.mrf.mxu1  ;;  %7826 = vmatpush3.msra.mxu1 %v9878_v20 }
 0x10e   :  { %v9729_v43 = vadd.f32 %v1881_v38, %v1787_v40  ;;  %7827 = vmatprep.subr.mxu1 %v8969_v48  ;;  %v6631_v40 = vld [vmem:[%s12216_s3 + $0x2a0] sm:$0xff] }
 0x10f   :  { %v9731_v44 = vpop.f32.mrf.mxu0  ;;  %v9733_v45 = vpop.f32.mrf.mxu1  ;;  %7791 = vmatpush3.msra.mxu0 %v6631_v40  ;;  %7828 = vmatpush3.msra.mxu1 %v9895_v49 }
 0x110   :  { %v2050_v38 = vadd.f32 %v9733_v45, %v9731_v44  ;;  %v2055_v44 = vadd.f32 %v9727_v42, %v9725_v41  ;;  %7792 = vmatprep.subr.mxu0 %v8969_v48  ;;  %7829 = vmatprep.subr.mxu1 %v8969_v48  ;;  %v6629_v41 = vld [vmem:[%s12216_s3 + $0x290] sm:$0xff] }
 0x111   :  { %v9735_v46 = vpop.f32.mrf.mxu0  ;;  %v9737_v47 = vpop.f32.mrf.mxu1  ;;  %7793 = vmatpush3.msra.mxu0 %v6630_v57  ;;  %7830 = vmatpush3.msra.mxu1 %v9915_v60 }
 0x112   :  { %7794 = vmatprep.subr.mxu0 %v8969_v48  ;;  %7831 = vmatprep.subr.mxu1 %v8969_v48  ;;  %v2065_v25 = vadd.f32 %v9737_v47, %v9735_v46 }
 0x113   :  { %v9744_v50 = vpop.f32.mrf.mxu0  ;;  %v9746_v51 = vpop.f32.mrf.mxu1  ;;  %7795 = vmatpush3.msra.mxu0 %v6629_v41 }
 0x114   :  { %v2060_v45 = vadd.f32 %v9746_v51, %v9744_v50  ;;  %v9926_v51 = vld [vmem:[%s12216_s3 + $0x208] sm:$0xff]  ;;  %7796 = vmatprep.subr.mxu0 %v8969_v48 }
 0x115   :  { %v9755_v54 = vpop.f32.mrf.mxu0  ;;  %v9757_v55 = vpop.f32.mrf.mxu1  ;;  %7832 = vmatpush3.msra.mxu1 %v9926_v51  ;;  %7797 = vmatpush3.msra.mxu0 %v6628_v2 }
 0x116   :  { %7833 = vmatprep.subr.mxu1 %v8969_v48  ;;  %7798 = vmatprep.subr.mxu0 %v8969_v48 }
 0x117   :  { %v9767_v58 = vpop.f32.mrf.mxu0  ;;  %v9769_v59 = vpop.f32.mrf.mxu1  ;;  %7834 = vmatpush3.msra.mxu1 %v9938_v3 }
 0x118   :  { %v2153_v56 = vadd.f32 %v9767_v58, %v2050_v38  ;;  %v2154_v58 = vadd.f32 %v9755_v54, %v2055_v44  ;;  %7873 = vmatprep.subr.mxu1 %v8969_v48 }
 0x119   :  { %v9779_v62 = vpop.f32.mrf.mxu0  ;;  %v9781_v63 = vpop.f32.mrf.mxu1 }
 0x11a   :  { %v2259_v54 = vadd.f32 %v9769_v59, %v2153_v56  ;;  %v2260_v31 = vadd.f32 %v9757_v55, %v2154_v58  ;;  %v2156_v46 = vadd.f32 %v9779_v62, %v2065_v25 }
 0x11b   :  { %v9791_v12 = vpop.f32.mrf.mxu0  ;;  %v9793_v13 = vpop.f32.mrf.mxu1 }
 0x11c   :  { %v2155_v61 = vadd.f32 %v9791_v12, %v2060_v45  ;;  %v6627_v12 = vld [vmem:[%s12216_s3 + $0x280] sm:$0xff]  ;;  %v2262_v62 = vadd.f32 %v9781_v63, %v2156_v46 }
 0x11d   :  { %v9803_v23 = vpop.f32.mrf.mxu0  ;;  %v9805_v24 = vpop.f32.mrf.mxu1  ;;  %7799 = vmatpush3.msra.mxu0 %v6627_v12 }
 0x11e   :  { %v2261_v59 = vadd.f32 %v9793_v13, %v2155_v61  ;;  %v2366_v1 = vadd.f32 %v9803_v23, %v2260_v31  ;;  %7838 = vmatprep.subr.mxu0 %v8969_v48 }
 0x11f   :  { %v9815_v27 = vpop.f32.mrf.mxu0  ;;  %v9817_v28 = vpop.f32.mrf.mxu1 }
 0x120   :  { %v2365_v34 = vadd.f32 %v9815_v27, %v2259_v54  ;;  %v2472_v38 = vadd.f32 %v9805_v24, %v2366_v1 }
 0x121   :  { %v9827_v32 = vpop.f32.mrf.mxu0  ;;  %v9829_v33 = vpop.f32.mrf.mxu1 }
 0x122   :  { %v2471_v4 = vadd.f32 %v9817_v28, %v2365_v34 }
 0x123   :  { %v9839_v5 = vpop.f32.mrf.mxu0  ;;  %v9841_v0 = vpop.f32.mrf.mxu1 }
 0x124   :  { %v2367_v55 = vadd.f32 %v9839_v5, %v2261_v59  ;;  %v2368_v5 = vadd.f32 %v9827_v32, %v2262_v62 }
 0x125   :  { %v9851_v6 = vpop.f32.mrf.mxu0  ;;  %v9853_v7 = vpop.f32.mrf.mxu1 }
 0x126   :  { %v2473_v40 = vadd.f32 %v9841_v0, %v2367_v55  ;;  %v2578_v56 = vadd.f32 %v9851_v6, %v2472_v38  ;;  %v2474_v61 = vadd.f32 %v9829_v33, %v2368_v5  ;;  %v9978_v0 = vld [vmem:[%s12215_s2] ss:$0 sm:$0xff] }
 0x127   :  { %v9865_v10 = vpop.f32.mrf.mxu0  ;;  %v9867_v15 = vpop.f32.mrf.mxu1  ;;  %v9984_v54 = vadd.f32 %v9978_v0, %v9721_v21  ;;  %v9998_v21 = vadd.f32 %v9978_v0, %v9729_v43  ;;  %v10029_v5 = vadd.f32 %v9978_v0, %v9723_v39 }
 0x128   :  { %v2577_v23 = vadd.f32 %v9865_v10, %v2471_v4  ;;  %v2684_v32 = vadd.f32 %v9853_v7, %v2578_v56  ;;  %v9990_v7 = vadd.f32 %v9978_v0, %v9713_v18  ;;  %v10005_v18 = vadd.f32 %v9978_v0, %v9711_v14 }
 0x129   :  { %v9880_v30 = vpop.f32.mrf.mxu0  ;;  %v9882_v36 = vpop.f32.mrf.mxu1 }
 0x12a   :  { %v2683_v63 = vadd.f32 %v9867_v15, %v2577_v23  ;;  %v2580_v15 = vadd.f32 %v9880_v30, %v2474_v61 }
 0x12b   :  { %v9897_v52 = vpop.f32.mrf.mxu0  ;;  %v9899_v53 = vpop.f32.mrf.mxu1 }
 0x12c   :  { %v2579_v57 = vadd.f32 %v9897_v52, %v2473_v40  ;;  %v2686_v46 = vadd.f32 %v9882_v36, %v2580_v15 }
 0x12d   :  { %v9920_v42 = vpop.f32.mrf.mxu0  ;;  %v7700_v50 = vpop.f32.mrf.mxu1 }
 0x12e   :  { %v2685_v6 = vadd.f32 %v9899_v53, %v2579_v57  ;;  %v2790_v12 = vadd.f32 %v9920_v42, %v2684_v32  ;;  %v9994_v53 = vadd.f32 %v9978_v0, %v9719_v11  ;;  %v10009_v11 = vadd.f32 %v9978_v0, %v9717_v37 }
 0x12f   :  { %v2770_v17 = vpop.f32.mrf.mxu0  ;;  %v2863_v19 = vpop.f32.mrf.mxu1 }
 0x130   :  { %v2789_v10 = vadd.f32 %v2770_v17, %v2683_v63  ;;  %v3669_v43 = vadd.f32 %v9994_v53, %v9984_v54  ;;  %v10015_v55 = vadd.f32 %v9978_v0, %v2790_v12  ;;  %v10034_v63 = vadd.f32 %v9978_v0, %v9715_v22 }
 0x131   :  { %v9949_v26 = vpop.f32.mrf.mxu0  ;;  %v7703_v29 = vpop.f32.mrf.mxu1 }
 0x132   :  { %v3670_v37 = vadd.f32 %v3669_v43, %v9998_v21  ;;  %v2792_v4 = vadd.f32 %v9949_v26, %v2686_v46 }
 0x133   :  { %v2780_v47 = vpop.f32.mrf.mxu0  ;;  %v2873_v35 = vpop.f32.mrf.mxu1 }
 0x134   :  { %v2791_v25 = vadd.f32 %v2780_v47, %v2685_v6 }
 0x135   :  { %v7708_v13 = vpop.f32.mrf.mxu0  ;;  %v7716_v27 = vpop.f32.mrf.mxu1 }
 0x136   :  { %v2954_v58 = vadd.f32 %v7708_v13, %v7700_v50 }
 0x137   :  { %v2948_v8 = vpop.f32.mrf.mxu0  ;;  %v3033_v16 = vpop.f32.mrf.mxu1 }
 0x138   :  { %v2949_v52 = vadd.f32 %v2948_v8, %v2863_v19  ;;  %v3053_v31 = vadd.f32 %v7716_v27, %v2954_v58  ;;  %v10001_v19 = vadd.f32 %v9978_v0, %v2789_v10  ;;  %v3660_v27 = vadd.f32 %v10005_v18, %v9990_v7 }
 0x139   :  { %v7711_v44 = vpop.f32.mrf.mxu0  ;;  %v7719_v45 = vpop.f32.mrf.mxu1 }
 0x13a   :  { %v2964_v59 = vadd.f32 %v7711_v44, %v7703_v29  ;;  %v3052_v42 = vadd.f32 %v3033_v16, %v2949_v52  ;;  %v3679_v36 = vadd.f32 %v10015_v55, %v10001_v19  ;;  %v3661_v23 = vadd.f32 %v3660_v27, %v10009_v11 }
 0x13b   :  { %v2958_v41 = vpop.f32.mrf.mxu0  ;;  %v3043_v28 = vpop.f32.mrf.mxu1 }
 0x13c   :  { %v2959_v34 = vadd.f32 %v2958_v41, %v2873_v35  ;;  %v10018_v35 = vadd.f32 %v9978_v0, %v2791_v25  ;;  %v3055_v13 = vadd.f32 %v7719_v45, %v2964_v59  ;;  %v3662_v32 = vadd.f32 %v3661_v23, %v10034_v63 }
 0x13d   :  { %v7724_v24 = vpop.f32.mrf.mxu0  ;;  %v7732_v2 = vpop.f32.mrf.mxu1 }
 0x13e   :  { %v3142_v29 = vadd.f32 %v7724_v24, %v3053_v31  ;;  %v3054_v16 = vadd.f32 %v3043_v28, %v2959_v34  ;;  %v3680_v56 = vadd.f32 %v3679_v36, %v10018_v35  ;;  %v3671_v28 = vadd.f32 %v3670_v37, %v10029_v5 }
 0x13f   :  { %v3122_v33 = vpop.f32.mrf.mxu0  ;;  %v3228_v50 = vpop.f32.mrf.mxu1  ;;  %v10038_v24 = vadd.f32 %v9978_v0, %v2792_v4 }
 0x140   :  { %v3141_v14 = vadd.f32 %v3122_v33, %v3052_v42  ;;  %v3248_v38 = vadd.f32 %v7732_v2, %v3142_v29  ;;  %v3672_v22 = vrot.slane %v3671_v28, 4  ;;  %v3663_v29 = vrot.slane %v3662_v32, 4 }
 0x141   :  { %v7727_v30 = vpop.f32.mrf.mxu0  ;;  %v7735_v17 = vpop.f32.mrf.mxu1  ;;  %v3681_v52 = vadd.f32 %v3680_v56, %v10038_v24 }
 0x142   :  { %v3144_v40 = vadd.f32 %v7727_v30, %v3055_v13  ;;  %v3247_v57 = vadd.f32 %v3228_v50, %v3141_v14 }
 0x143   :  { %v3132_v47 = vpop.f32.mrf.mxu0  ;;  %v3238_v1 = vpop.f32.mrf.mxu1 }
 0x144   :  { %v3143_v26 = vadd.f32 %v3132_v47, %v3054_v16  ;;  %v3250_v39 = vadd.f32 %v7735_v17, %v3144_v40  ;;  %v3682_v17 = vrot.slane %v3681_v52, 4  ;;  %v3673_v47 = vadd.f32 %v3672_v22, %v3671_v28 }
 0x145   :  { %v7740_v62 = vpop.f32.mrf.mxu0  ;;  %v7748_v8 = vpop.f32.mrf.mxu1 }
 0x146   :  { %v3353_v41 = vadd.f32 %v7740_v62, %v3248_v38  ;;  %v3249_v15 = vadd.f32 %v3238_v1, %v3143_v26  ;;  %v3683_v36 = vadd.f32 %v3682_v17, %v3681_v52  ;;  %v3674_v23 = vrot.slane %v3673_v47, 2 }
 0x147   :  { %v3333_v44 = vpop.f32.mrf.mxu0  ;;  %v3422_v45 = vpop.f32.mrf.mxu1 }
 0x148   :  { %v3352_v2 = vadd.f32 %v3333_v44, %v3247_v57  ;;  %v3442_v33 = vadd.f32 %v7748_v8, %v3353_v41  ;;  %v3664_v8 = vadd.f32 %v3663_v29, %v3662_v32  ;;  %v3684_v26 = vrot.slane %v3683_v36, 2 }
 0x149   :  { %v7743_v58 = vpop.f32.mrf.mxu0  ;;  %v7751_v61 = vpop.f32.mrf.mxu1 }
 0x14a   :  { %v3355_v50 = vadd.f32 %v7743_v58, %v3250_v39  ;;  %v3441_v31 = vadd.f32 %v3422_v45, %v3352_v2  ;;  %v3665_v57 = vrot.slane %v3664_v8, 2  ;;  %v3675_v58 = vadd.f32 %v3674_v23, %v3673_v47 }
 0x14b   :  { %v3343_v6 = vpop.f32.mrf.mxu0  ;;  %v3432_v10 = vpop.f32.mrf.mxu1  ;;  %v3685_v32 = vadd.f32 %v3684_v26, %v3683_v36 }
 0x14c   :  { %v3354_v59 = vadd.f32 %v3343_v6, %v3249_v15  ;;  %v3444_v43 = vadd.f32 %v7751_v61, %v3355_v50  ;;  %v3666_v2 = vadd.f32 %v3665_v57, %v3664_v8 }
 0x14d   :  { %v7756_v12 = vpop.f32.mrf.mxu0  ;;  %v7764_v25 = vpop.f32.mrf.mxu1 }
 0x14e   :  { %v3548_v30 = vadd.f32 %v7756_v12, %v3442_v33  ;;  %v3443_v27 = vadd.f32 %v3432_v10, %v3354_v59  ;;  %v3676_v10 = vrot.slane %v3675_v58, 1  ;;  %v3667_v15 = vrot.slane %v3666_v2, 1 }
 0x14f   :  { %v3528_v42 = vpop.f32.mrf.mxu0  ;;  %v3633_v34 = vpop.f32.mrf.mxu1  ;;  %v3686_v33 = vrot.slane %v3685_v32, 1 }
 0x150   :  { %v3547_v46 = vadd.f32 %v3528_v42, %v3441_v31  ;;  %v3653_v37 = vadd.f32 %v7764_v25, %v3548_v30  ;;  %v3677_v22 = vadd.f32 %v3676_v10, %v3675_v58  ;;  %v3668_v25 = vadd.f32 %v3667_v15, %v3666_v2 }
 0x151   :  { %v7759_v13 = vpop.f32.mrf.mxu0  ;;  %v7767_v14 = vpop.f32.mrf.mxu1  ;;  %v3687_v31 = vadd.f32 %v3686_v33, %v3685_v32 }
 0x152   :  { %v3652_v1 = vadd.f32 %v3633_v34, %v3547_v46  ;;  %v3550_v4 = vadd.f32 %v7759_v13, %v3444_v43  ;;  %v10046_v44 = vadd.f32 %v9978_v0, %v3653_v37  ;;  %v3678_v30 = vadd.f32 %v3677_v22, %v3668_v25 }
 0x153   :  { %v3538_v62 = vpop.f32.mrf.mxu0  ;;  %v3643_v40 = vpop.f32.mrf.mxu1 }
 0x154   :  { %v10043_v16 = vadd.f32 %v9978_v0, %v3652_v1  ;;  %v3549_v38 = vadd.f32 %v3538_v62, %v3443_v27  ;;  %v3655_v45 = vadd.f32 %v7767_v14, %v3550_v4 }
 0x156   :  { %v3654_v56 = vadd.f32 %v3643_v40, %v3549_v38  ;;  %v3689_v41 = vadd.f32 %v10046_v44, %v10043_v16  ;;  %v10054_v61 = vadd.f32 %v9978_v0, %v3655_v45 }
 0x158   :  { %v10051_v28 = vadd.f32 %v9978_v0, %v3654_v56  ;;  %v3688_v0 = vadd.f32 %v3687_v31, %v3678_v30 }
 0x15a   :  { %v3690_v39 = vadd.f32 %v3689_v41, %v10051_v28 }
 0x15c   :  { %v3691_v6 = vadd.f32 %v3690_v39, %v10054_v61 }
 0x15e   :  { %v3692_v52 = vrot.slane %v3691_v6, 4 }
 0x160   :  { %v3693_v50 = vadd.f32 %v3692_v52, %v3691_v6 }
 0x162   :  { %v3694_v12 = vrot.slane %v3693_v50, 2 }
 0x164   :  { %v3695_v59 = vadd.f32 %v3694_v12, %v3693_v50 }
 0x166   :  { %v3696_v42 = vrot.slane %v3695_v59, 1 }
 0x168   :  { %v3697_v34 = vadd.f32 %v3696_v42, %v3695_v59 }
 0x16a   :  { %v3698_v29 = vadd.f32 %v3697_v34, %v3688_v0 }
 0x16c   :  { %v10058_v17 = vmul.f32 0.0078125, %v3698_v29 }
 0x16e   :  { %v3701_v43 = vsub.f32 %v9990_v7, %v10058_v17  ;;  %v3702_v46 = vsub.f32 %v10005_v18, %v10058_v17  ;;  %v3703_v47 = vsub.f32 %v10009_v11, %v10058_v17  ;;  %v3704_v13 = vsub.f32 %v10034_v63, %v10058_v17 }
 0x16f   :  { %v3718_v14 = vsub.f32 %v9984_v54, %v10058_v17  ;;  %v3719_v27 = vsub.f32 %v9994_v53, %v10058_v17  ;;  %v3720_v37 = vsub.f32 %v9998_v21, %v10058_v17  ;;  %v3721_v8 = vsub.f32 %v10029_v5, %v10058_v17 }
 0x170   :  { %v3705_v1 = vmul.f32 %v3701_v43, %v3701_v43  ;;  %v3706_v4 = vmul.f32 %v3702_v46, %v3702_v46  ;;  %v3707_v62 = vmul.f32 %v3703_v47, %v3703_v47  ;;  %v3708_v36 = vmul.f32 %v3704_v13, %v3704_v13 }
 0x171   :  { %v3722_v38 = vmul.f32 %v3718_v14, %v3718_v14  ;;  %v3723_v40 = vmul.f32 %v3719_v27, %v3719_v27  ;;  %v3724_v23 = vmul.f32 %v3720_v37, %v3720_v37  ;;  %v3736_v56 = vsub.f32 %v10001_v19, %v10058_v17 }
 0x172   :  { %v3709_v45 = vadd.f32 %v3706_v4, %v3705_v1  ;;  %v3737_v57 = vsub.f32 %v10015_v55, %v10058_v17  ;;  %v3738_v26 = vsub.f32 %v10018_v35, %v10058_v17  ;;  %v3739_v58 = vsub.f32 %v10038_v24, %v10058_v17 }
 0x173   :  { %v3726_v41 = vadd.f32 %v3723_v40, %v3722_v38  ;;  %v3754_v39 = vsub.f32 %v10043_v16, %v10058_v17  ;;  %v3755_v2 = vsub.f32 %v10046_v44, %v10058_v17  ;;  %v3725_v6 = vmul.f32 %v3721_v8, %v3721_v8 }
 0x174   :  { %v3710_v32 = vadd.f32 %v3709_v45, %v3707_v62  ;;  %v3740_v10 = vmul.f32 %v3736_v56, %v3736_v56  ;;  %v3741_v52 = vmul.f32 %v3737_v57, %v3737_v57  ;;  %v3742_v33 = vmul.f32 %v3738_v26, %v3738_v26 }
 0x175   :  { %v3727_v15 = vadd.f32 %v3726_v41, %v3724_v23  ;;  %v3756_v50 = vsub.f32 %v10051_v28, %v10058_v17  ;;  %v3757_v22 = vsub.f32 %v10054_v61, %v10058_v17  ;;  %v3758_v31 = vmul.f32 %v3754_v39, %v3754_v39 }
 0x176   :  { %v3711_v12 = vadd.f32 %v3710_v32, %v3708_v36  ;;  %v3744_v25 = vadd.f32 %v3741_v52, %v3740_v10  ;;  %v3759_v59 = vmul.f32 %v3755_v2, %v3755_v2  ;;  %v3743_v42 = vmul.f32 %v3739_v58, %v3739_v58 }
 0x177   :  { %v3728_v30 = vadd.f32 %v3727_v15, %v3725_v6  ;;  %v3760_v29 = vmul.f32 %v3756_v50, %v3756_v50  ;;  %v3761_v14 = vmul.f32 %v3757_v22, %v3757_v22 }
 0x178   :  { %v3712_v0 = vrot.slane %v3711_v12, 4  ;;  %v3745_v34 = vadd.f32 %v3744_v25, %v3742_v33  ;;  %v3762_v43 = vadd.f32 %v3759_v59, %v3758_v31  ;;  %v3780_v31 = vlaneseq }
 0x179   :  { %v3729_v46 = vrot.slane %v3728_v30, 4 }
 0x17a   :  { %v3713_v47 = vadd.f32 %v3712_v0, %v3711_v12  ;;  %v3746_v13 = vadd.f32 %v3745_v34, %v3743_v42  ;;  %v3763_v27 = vadd.f32 %v3762_v43, %v3760_v29  ;;  %v3781_v59 = vshrl.u32 %v3780_v31, 7  ;;  %v3777_v29 = vld [vmem:[%s12215_s2 + $0x2] sm:$0x1] }
 0x17b   :  { %v3730_v37 = vadd.f32 %v3729_v46, %v3728_v30  ;;  %v3773_v30 = vld [vmem:[%s12215_s2 + $0x1] sm:$0x1]  ;;  %s6358_s2 = sshll.u32 %s8971_s30, 4  ;;  %s6359_s2 = int_to_ptr.vmem [resolvable:$true] %s6358_s2 }
 0x17c   :  { %v3714_v1 = vrot.slane %v3713_v47, 2  ;;  %v3747_v4 = vrot.slane %v3746_v13, 4  ;;  %v3764_v62 = vadd.f32 %v3763_v27, %v3761_v14  ;;  %v10095_v42 = vsub.s32 0, %v3781_v59  ;;  %s8947_s9 = scalar_lea.vmem %s6359_s2, 32  ;;  %p8952_p1 = scmp.lt.s32.totalorder %s6359_s2, %s6359_s2 }
 0x17d   :  { %v3731_v8 = vrot.slane %v3730_v37, 2  ;;  %p8948_p0 = scmp.ne.s32.totalorder %s6359_s2, %s8947_s9  ;;  %p8953_p2 = scmp.lt.s32.totalorder %s8947_s9, %s8947_s9 }
 0x17e   :  { %v3715_v36 = vadd.f32 %v3714_v1, %v3713_v47  ;;  %v3748_v38 = vadd.f32 %v3747_v4, %v3746_v13  ;;  %v3765_v40 = vrot.slane %v3764_v62, 4  ;;  %12242 = vst [vmem:[#allocation5_spill] sm:$0xff] %v10095_v42 }
 0x17f   :  { %v3732_v23 = vadd.f32 %v3731_v8, %v3730_v37  ;;  %p8954_p3 = por %p8953_p2, %p8952_p1 }
 0x180   :  { %v3716_v45 = vrot.slane %v3715_v36, 1  ;;  %v3749_v56 = vrot.slane %v3748_v38, 2  ;;  %v3766_v57 = vadd.f32 %v3765_v40, %v3764_v62 }
 0x181   :  { %v3733_v26 = vrot.slane %v3732_v23, 1  ;;  %p8955_p4 = pnand %p8954_p3, %p8948_p0 }
 0x182   :  { %v3717_v41 = vadd.f32 %v3716_v45, %v3715_v36  ;;  %v3750_v58 = vadd.f32 %v3749_v56, %v3748_v38  ;;  %v3767_v39 = vrot.slane %v3766_v57, 2 }
 0x183   :  { %v3734_v2 = vadd.f32 %v3733_v26, %v3732_v23 }
 0x184   :  { %v3751_v32 = vrot.slane %v3750_v58, 1  ;;  %v3768_v6 = vadd.f32 %v3767_v39, %v3766_v57 }
 0x185   :  { %v3735_v10 = vadd.f32 %v3734_v2, %v3717_v41 }
 0x186   :  { %v3752_v52 = vadd.f32 %v3751_v32, %v3750_v58  ;;  %v3769_v15 = vrot.slane %v3768_v6, 1 }
 0x188   :  { %v3753_v33 = vadd.f32 %v3752_v52, %v3735_v10  ;;  %v3770_v50 = vadd.f32 %v3769_v15, %v3768_v6 }
 0x18a   :  { %v3771_v22 = vadd.f32 %v3770_v50, %v3753_v33  ;;  %v10143_v33 = vld [vmem:[%s12216_s3 + $0x478] sm:$0xff] }
 0x18c   :  { %v3772_v12 = vmul.f32 0.0078125, %v3771_v22 }
 0x18e   :  { %v3774_v25 = vadd.f32 1e-05, %v3772_v12  ;;  %v10153_v12 = vld [vmem:[%s12216_s3 + $0x3f8] sm:$0xff] }
 0x190   :  { %8821 = vrsqrt.f32 %v3774_v25  ;;  %v10158_v25 = vld [vmem:[%s12216_s3 + $0x470] sm:$0xff] }
 0x19d   :  { %v8822_v0 = vpop.eup %8821 }
 0x19e   :  { %v3776_v34 = vmul.f32 %v8822_v0, %v3773_v30  ;;  %v10172_v30 = vld [vmem:[%s12216_s3 + $0x3f0] sm:$0xff]  ;;  %v10177_v0 = vld [vmem:[%s12216_s3 + $0x468] sm:$0xff] }
 0x1a0   :  { %v3778_v43 = vmul.f32 %v3776_v34, %v10058_v17  ;;  %v10102_v46 = vrot.slane %v3776_v34, %v10095_v42 }
 0x1a2   :  { %v3779_v47 = vsub.f32 %v3777_v29, %v3778_v43  ;;  %v3786_v13 = vmul.f32 %v10102_v46, %v10009_v11  ;;  %v3802_v27 = vmul.f32 %v10102_v46, %v9998_v21  ;;  %v3814_v37 = vmul.f32 %v10102_v46, %v10018_v35  ;;  %v10187_v43 = vld [vmem:[%s12216_s3 + $0x3e8] sm:$0xff] }
 0x1a3   :  { %v3826_v1 = vmul.f32 %v10102_v46, %v10051_v28  ;;  %v3784_v17 = vmul.f32 %v10102_v46, %v9990_v7  ;;  %v3800_v4 = vmul.f32 %v10102_v46, %v9984_v54  ;;  %v3812_v11 = vmul.f32 %v10102_v46, %v10001_v19 }
 0x1a4   :  { %v10107_v14 = vrot.slane %v3779_v47, %v10095_v42  ;;  %v3824_v62 = vmul.f32 %v10102_v46, %v10043_v16  ;;  %v3787_v39 = vmul.f32 %v10102_v46, %v10034_v63  ;;  %v3803_v6 = vmul.f32 %v10102_v46, %v10029_v5  ;;  %v10192_v47 = vld [vmem:[%s12216_s3 + $0x460] sm:$0xff]  ;;  %v6693_v42 = vld [vmem:[%s12216_s3 + $0x308] sm:$0xff] }
 0x1a5   :  { %v3815_v63 = vmul.f32 %v10102_v46, %v10038_v24  ;;  %v3827_v59 = vmul.f32 %v10102_v46, %v10054_v61 }
 0x1a6   :  { %v3794_v21 = vadd.f32 %v10107_v14, %v3786_v13  ;;  %v3806_v8 = vadd.f32 %v3802_v27, %v10107_v14  ;;  %v3818_v35 = vadd.f32 %v3814_v37, %v10107_v14  ;;  %v3830_v28 = vadd.f32 %v3826_v1, %v10107_v14  ;;  %v10201_v27 = vld [vmem:[%s12216_s3 + $0x3e0] sm:$0xff]  ;;  %v10206_v37 = vld [vmem:[%s12216_s3 + $0x458] sm:$0xff] }
 0x1a7   :  { %v3792_v36 = vadd.f32 %v10107_v14, %v3784_v17  ;;  %v3804_v7 = vadd.f32 %v3800_v4, %v10107_v14  ;;  %v3816_v54 = vadd.f32 %v3812_v11, %v10107_v14  ;;  %v3828_v38 = vadd.f32 %v3824_v62, %v10107_v14  ;;  %v10215_v17 = vld [vmem:[%s12216_s3 + $0x3d8] sm:$0xff]  ;;  %v10220_v4 = vld [vmem:[%s12216_s3 + $0x450] sm:$0xff] }
 0x1a8   :  { %v3798_v19 = vmax.f32 %v3794_v21, 0.0  ;;  %v3810_v40 = vmax.f32 %v3806_v8, 0.0  ;;  %v3822_v23 = vmax.f32 %v3818_v35, 0.0  ;;  %v3834_v16 = vmax.f32 %v3830_v28, 0.0  ;;  %v10231_v62 = vld [vmem:[%s12216_s3 + $0x3d0] sm:$0xff]  ;;  %v10236_v21 = vld [vmem:[%s12216_s3 + $0x448] sm:$0xff] }
 0x1a9   :  { %v3796_v45 = vmax.f32 %v3792_v36, 0.0  ;;  %v3808_v56 = vmax.f32 %v3804_v7, 0.0  ;;  %v3820_v57 = vmax.f32 %v3816_v54, 0.0  ;;  %v3832_v26 = vmax.f32 %v3828_v38, 0.0  ;;  %v10247_v35 = vld [vmem:[%s12216_s3 + $0x3c8] sm:$0xff]  ;;  %v10252_v28 = vld [vmem:[%s12216_s3 + $0x440] sm:$0xff] }
 0x1aa   :  { %v3838_v41 = vmax.f32 %v3798_v19, %v3810_v40  ;;  %v3842_v58 = vmax.f32 %v3822_v23, %v3834_v16  ;;  %v3795_v52 = vadd.f32 %v10107_v14, %v3787_v39  ;;  %v3807_v50 = vadd.f32 %v3803_v6, %v10107_v14  ;;  %v10285_v19 = vld [vmem:[%s12216_s3 + $0x3b8] sm:$0xff]  ;;  %v10290_v40 = vld [vmem:[%s12216_s3 + $0x430] sm:$0xff]  ;;  %v10304_v23 = vld [vmem:[%s12216_s3 + $0x428] sm:$0xff] }
 0x1ab   :  { %v3836_v2 = vmax.f32 %v3796_v45, %v3808_v56  ;;  %v3840_v32 = vmax.f32 %v3820_v57, %v3832_v26  ;;  %v3819_v31 = vadd.f32 %v3815_v63, %v10107_v14  ;;  %v3831_v34 = vadd.f32 %v3827_v59, %v10107_v14  ;;  %v10313_v26 = vld [vmem:[%s12216_s3 + $0x3a8] sm:$0xff]  ;;  %v10332_v39 = vld [vmem:[%s12216_s3 + $0x418] sm:$0xff] }
 0x1ac   :  { %v10135_v10 = vmax.f32 %v3838_v41, %v3842_v58  ;;  %v3799_v22 = vmax.f32 %v3795_v52, 0.0  ;;  %v3811_v24 = vmax.f32 %v3807_v50, 0.0  ;;  %v3785_v8 = vmul.f32 %v10102_v46, %v10005_v18  ;;  %v10318_v41 = vld [vmem:[%s12216_s3 + $0x420] sm:$0xff]  ;;  %v10341_v6 = vld [vmem:[%s12216_s3 + $0x398] sm:$0xff]  ;;  %v10346_v52 = vld [vmem:[%s12216_s3 + $0x410] sm:$0xff] }
 0x1ad   :  { %v10138_v15 = vmax.f32 %v3836_v2, %v3840_v32  ;;  %v3823_v61 = vmax.f32 %v3819_v31, 0.0  ;;  %v3835_v13 = vmax.f32 %v3831_v34, 0.0  ;;  %v3801_v36 = vmul.f32 %v10102_v46, %v9994_v53  ;;  %v10268_v53 = vld [vmem:[%s12216_s3 + $0x3c0] sm:$0xff]  ;;  %v10355_v50 = vld [vmem:[%s12216_s3 + $0x390] sm:$0xff]  ;;  %v6691_v34 = vld [vmem:[%s12216_s3 + $0x1f8] sm:$0xff] }
 0x1ae   :  { %12243 = vst [vmem:[#allocation6_spill] sm:$0xff] %v10135_v10  ;;  %v3839_v29 = vmax.f32 %v3799_v22, %v3811_v24  ;;  %v3813_v18 = vmul.f32 %v10102_v46, %v10015_v55  ;;  %v3825_v7 = vmul.f32 %v10102_v46, %v10046_v44  ;;  %v3793_v54 = vadd.f32 %v10107_v14, %v3785_v8  ;;  %v10273_v55 = vld [vmem:[%s12216_s3 + $0x438] sm:$0xff]  ;;  %v10327_v58 = vld [vmem:[%s12216_s3 + $0x3a0] sm:$0xff]  ;;  %v10360_v22 = vld [vmem:[%s12216_s3 + $0x408] sm:$0xff] }
 0x1af   :  { %7836 = vmatmul.mubr.f32.vlgmr.msra.gmra.mxu1 %v10138_v15  ;;  %v3883_v5 = vrot.slane %v10138_v15, 2  ;;  %v3843_v1 = vmax.f32 %v3823_v61, %v3835_v13  ;;  %v3805_v44 = vadd.f32 %v3801_v36, %v10107_v14  ;;  %v10371_v24 = vld [vmem:[%s12216_s3 + $0x388] sm:$0xff]  ;;  %v10376_v31 = vld [vmem:[%s12216_s3 + $0x400] sm:$0xff]  ;;  %v10410_v13 = vld [vmem:[%s12216_s3 + $0x278] sm:$0xff]  ;;  %v4369_v10 = vrot.slane %v10138_v15, 6 }
 0x1b0   :  { %7874 = vmatpush3.msra.mxu1 %v10143_v33  ;;  %7905 = vmatprep.mubr.msk.f32.mxu1 %vm8970_vm1, %v8969_v48  ;;  %v3817_v46 = vadd.f32 %v3813_v18, %v10107_v14  ;;  %v3829_v38 = vadd.f32 %v3825_v7, %v10107_v14  ;;  %v10299_v14 = vld [vmem:[%s12216_s3 + $0x3b0] sm:$0xff]  ;;  %v3797_v16 = vmax.f32 %v3793_v54, 0.0  ;;  %v10388_v61 = vld [vmem:[%s12216_s3 + $0x380] sm:$0xff]  ;;  %v10432_v18 = vld [vmem:[%s12216_s3 + $0x268] sm:$0xff] }
 0x1b1   :  { %7875 = vmatprep.subr.mxu1 %v8969_v48  ;;  %7801 = vmatmul.mubr.f32.vlgmr.msra.gmra.mxu0 %v3883_v5  ;;  %v10224_v11 = vmax.f32 %v3839_v29, %v3843_v1  ;;  %v3809_v45 = vmax.f32 %v3805_v44, 0.0  ;;  %v6690_v29 = vld [vmem:[%s12216_s3 + $0x1f0] sm:$0xff]  ;;  %v6689_v1 = vld [vmem:[%s12216_s3 + $0x1e8] sm:$0xff]  ;;  %v6688_v36 = vld [vmem:[%s12216_s3 + $0x1e0] sm:$0xff] }
 0x1b2   :  { %7839 = vmatpush3.msra.mxu0 %v10153_v12  ;;  %7876 = vmatpush3.msra.mxu1 %v10158_v25  ;;  %v3821_v56 = vmax.f32 %v3817_v46, 0.0  ;;  %v3833_v57 = vmax.f32 %v3829_v38, 0.0  ;;  %v10421_v8 = vld [vmem:[%s12216_s3 + $0x270] sm:$0xff]  ;;  %v6687_v7 = vld [vmem:[%s12216_s3 + $0x1d8] sm:$0xff]  ;;  %v10443_v54 = vld [vmem:[%s12216_s3 + $0x260] sm:$0xff] }
 0x1b3   :  { %7840 = vmatprep.subr.mxu0 %v8969_v48  ;;  %7877 = vmatprep.subr.mxu1 %v8969_v48  ;;  %12244 = vst [vmem:[#allocation7_spill] sm:$0xff] %v10224_v11  ;;  %v3837_v2 = vmax.f32 %v3797_v16, %v3809_v45  ;;  %v6686_v44 = vld [vmem:[%s12216_s3 + $0x1d0] sm:$0xff]  ;;  %v10454_v46 = vld [vmem:[%s12216_s3 + $0x258] sm:$0xff]  ;;  %v6685_v38 = vld [vmem:[%s12216_s3 + $0x1c8] sm:$0xff] }
 0x1b4   :  { %7841 = vmatpush3.msra.mxu0 %v10172_v30  ;;  %7878 = vmatpush3.msra.mxu1 %v10177_v0  ;;  %v3841_v32 = vmax.f32 %v3821_v56, %v3833_v57  ;;  %v10465_v16 = vld [vmem:[%s12216_s3 + $0x250] sm:$0xff]  ;;  %v6684_v45 = vld [vmem:[%s12216_s3 + $0x1c0] sm:$0xff]  ;;  %v10476_v56 = vld [vmem:[%s12216_s3 + $0x248] sm:$0xff] }
 0x1b5   :  { %7842 = vmatprep.subr.mxu0 %v8969_v48  ;;  %7879 = vmatprep.subr.mxu1 %v8969_v48  ;;  %v6683_v57 = vld [vmem:[%s12216_s3 + $0x1b8] sm:$0xff]  ;;  %v6692_v11 = vld [vmem:[%s12216_s3 + $0x300] sm:$0xff] }
 0x1b6   :  { %7843 = vmatpush3.msra.mxu0 %v10187_v43  ;;  %7880 = vmatpush3.msra.mxu1 %v10192_v47  ;;  %v10362_v63 = vmax.f32 %v3837_v2, %v3841_v32  ;;  %v10487_v2 = vld [vmem:[%s12216_s3 + $0x240] sm:$0xff]  ;;  %v6682_v32 = vld [vmem:[%s12216_s3 + $0x1b0] sm:$0xff] }
 0x1b7   :  { %7844 = vmatprep.subr.mxu0 %v8969_v48  ;;  %7881 = vmatprep.subr.mxu1 %v8969_v48 }
 0x1b8   :  { %7845 = vmatpush3.msra.mxu0 %v10201_v27  ;;  %7882 = vmatpush3.msra.mxu1 %v10206_v37  ;;  %v10383_v59 = vrot.slane %v10362_v63, 2 }
 0x1b9   :  { %7846 = vmatprep.subr.mxu0 %v8969_v48  ;;  %7883 = vmatprep.subr.mxu1 %v8969_v48 }
 0x1ba   :  { %7847 = vmatpush3.msra.mxu0 %v10215_v17  ;;  %7884 = vmatpush3.msra.mxu1 %v10220_v4 }
 0x1bb   :  { %7848 = vmatprep.subr.mxu0 %v8969_v48  ;;  %7885 = vmatprep.subr.mxu1 %v8969_v48 }
 0x1bc   :  { %7849 = vmatpush3.msra.mxu0 %v10231_v62  ;;  %7886 = vmatpush3.msra.mxu1 %v10236_v21 }
 0x1bd   :  { %7850 = vmatprep.subr.mxu0 %v8969_v48  ;;  %7887 = vmatprep.subr.mxu1 %v8969_v48 }
 0x1be   :  { %7851 = vmatpush3.msra.mxu0 %v10247_v35  ;;  %7888 = vmatpush3.msra.mxu1 %v10252_v28 }
 0x1bf   :  { %7852 = vmatprep.subr.mxu0 %v8969_v48  ;;  %7889 = vmatprep.subr.mxu1 %v8969_v48 }
 0x1c0   :  { %7853 = vmatpush3.msra.mxu0 %v10268_v53  ;;  %7890 = vmatpush3.msra.mxu1 %v10273_v55 }
 0x1c1   :  { %7854 = vmatprep.subr.mxu0 %v8969_v48  ;;  %7891 = vmatprep.subr.mxu1 %v8969_v48 }
 0x1c2   :  { %7855 = vmatpush3.msra.mxu0 %v10285_v19  ;;  %7892 = vmatpush3.msra.mxu1 %v10290_v40 }
 0x1c3   :  { %7856 = vmatprep.subr.mxu0 %v8969_v48  ;;  %7893 = vmatprep.subr.mxu1 %v8969_v48 }
 0x1c4   :  { %7857 = vmatpush3.msra.mxu0 %v10299_v14  ;;  %7894 = vmatpush3.msra.mxu1 %v10304_v23 }
 0x1c5   :  { %7858 = vmatprep.subr.mxu0 %v8969_v48  ;;  %7895 = vmatprep.subr.mxu1 %v8969_v48 }
 0x1c6   :  { %7859 = vmatpush3.msra.mxu0 %v10313_v26  ;;  %7896 = vmatpush3.msra.mxu1 %v10318_v41 }
 0x1c7   :  { %7860 = vmatprep.subr.mxu0 %v8969_v48  ;;  %7897 = vmatprep.subr.mxu1 %v8969_v48 }
 0x1c8   :  { %7861 = vmatpush3.msra.mxu0 %v10327_v58  ;;  %7898 = vmatpush3.msra.mxu1 %v10332_v39 }
 0x1c9   :  { %7862 = vmatprep.subr.mxu0 %v8969_v48  ;;  %7899 = vmatprep.subr.mxu1 %v8969_v48 }
 0x1ca   :  { %7863 = vmatpush3.msra.mxu0 %v10341_v6  ;;  %7900 = vmatpush3.msra.mxu1 %v10346_v52 }
 0x1cb   :  { %7864 = vmatprep.subr.mxu0 %v8969_v48  ;;  %7901 = vmatprep.subr.mxu1 %v8969_v48 }
 0x1cc   :  { %7865 = vmatpush3.msra.mxu0 %v10355_v50  ;;  %7902 = vmatpush3.msra.mxu1 %v10360_v22 }
 0x1cd   :  { %7866 = vmatprep.subr.mxu0 %v8969_v48  ;;  %7903 = vmatprep.subr.mxu1 %v8969_v48 }
 0x1ce   :  { %7867 = vmatpush3.msra.mxu0 %v10371_v24  ;;  %7904 = vmatpush3.msra.mxu1 %v10376_v31 }
 0x1cf   :  { %7868 = vmatprep.subr.mxu0 %v8969_v48  ;;  %7906 = vmatmul.mubr.f32.vlgmr.msra.gmra.mxu1 %v10383_v59 }
 0x1d0   :  { %7943 = vmatprep.subr.mxu1 %v8969_v48  ;;  %7869 = vmatpush3.msra.mxu0 %v10388_v61 }
 0x1d1   :  { %7870 = vmatprep.mubr.msk.f32.mxu0 %vm8970_vm1, %v8969_v48  ;;  %7944 = vmatpush3.msra.mxu1 %v6691_v34  ;;  %v10498_v34 = vld [vmem:[%s12216_s3 + $0x238] sm:$0xff] }
 0x1d2   :  { %7871 = vmatmul.mubr.f32.vlgmr.msra.gmra.mxu0 %v10362_v63  ;;  %7908 = vmatprep.subr.mxu0 %v8969_v48 }
 0x1d3   :  { %7945 = vmatprep.subr.mxu1 %v8969_v48  ;;  %7909 = vmatpush3.msra.mxu0 %v10410_v13 }
 0x1d4   :  { %7946 = vmatpush3.msra.mxu1 %v6690_v29  ;;  %7910 = vmatprep.subr.mxu0 %v8969_v48  ;;  %v6681_v29 = vld [vmem:[%s12216_s3 + $0x1a8] sm:$0xff] }
 0x1d5   :  { %7947 = vmatprep.subr.mxu1 %v8969_v48  ;;  %7911 = vmatpush3.msra.mxu0 %v10421_v8 }
 0x1d6   :  { %7948 = vmatpush3.msra.mxu1 %v6689_v1  ;;  %7912 = vmatprep.subr.mxu0 %v8969_v48  ;;  %v10509_v1 = vld [vmem:[%s12216_s3 + $0x230] sm:$0xff] }
 0x1d7   :  { %7949 = vmatprep.subr.mxu1 %v8969_v48  ;;  %7913 = vmatpush3.msra.mxu0 %v10432_v18 }
 0x1d8   :  { %7950 = vmatpush3.msra.mxu1 %v6688_v36  ;;  %7914 = vmatprep.subr.mxu0 %v8969_v48  ;;  %v6680_v36 = vld [vmem:[%s12216_s3 + $0x1a0] sm:$0xff] }
 0x1d9   :  { %7951 = vmatprep.subr.mxu1 %v8969_v48  ;;  %7915 = vmatpush3.msra.mxu0 %v10443_v54 }
 0x1da   :  { %7952 = vmatpush3.msra.mxu1 %v6687_v7  ;;  %7916 = vmatprep.subr.mxu0 %v8969_v48  ;;  %v6679_v7 = vld [vmem:[%s12216_s3 + $0x198] sm:$0xff] }
 0x1db   :  { %7953 = vmatprep.subr.mxu1 %v8969_v48  ;;  %7917 = vmatpush3.msra.mxu0 %v10454_v46 }
 0x1dc   :  { %7954 = vmatpush3.msra.mxu1 %v6686_v44  ;;  %7918 = vmatprep.subr.mxu0 %v8969_v48  ;;  %v6678_v44 = vld [vmem:[%s12216_s3 + $0x190] sm:$0xff] }
 0x1dd   :  { %7955 = vmatprep.subr.mxu1 %v8969_v48  ;;  %7919 = vmatpush3.msra.mxu0 %v10465_v16 }
 0x1de   :  { %7956 = vmatpush3.msra.mxu1 %v6685_v38  ;;  %7920 = vmatprep.subr.mxu0 %v8969_v48  ;;  %v10574_v38 = vld [vmem:[%s12216_s3 + $0x2f0] sm:$0xff] }
 0x1df   :  { %7957 = vmatprep.subr.mxu1 %v8969_v48  ;;  %7921 = vmatpush3.msra.mxu0 %v10476_v56 }
 0x1e0   :  { %7958 = vmatpush3.msra.mxu1 %v6684_v45  ;;  %7922 = vmatprep.subr.mxu0 %v8969_v48  ;;  %v6704_v45 = vld [vmem:[%s12216_s3 + $0x360] sm:$0xff] }
 0x1e1   :  { %7959 = vmatprep.subr.mxu1 %v8969_v48  ;;  %7923 = vmatpush3.msra.mxu0 %v10487_v2 }
 0x1e2   :  { %7960 = vmatpush3.msra.mxu1 %v6683_v57  ;;  %7924 = vmatprep.subr.mxu0 %v8969_v48  ;;  %v10585_v57 = vld [vmem:[%s12216_s3 + $0x2e8] sm:$0xff] }
 0x1e3   :  { %7961 = vmatprep.subr.mxu1 %v8969_v48  ;;  %7925 = vmatpush3.msra.mxu0 %v10498_v34 }
 0x1e4   :  { %7962 = vmatpush3.msra.mxu1 %v6682_v32  ;;  %7926 = vmatprep.subr.mxu0 %v8969_v48  ;;  %v6703_v32 = vld [vmem:[%s12216_s3 + $0x358] sm:$0xff] }
 0x1e5   :  { %7963 = vmatprep.subr.mxu1 %v8969_v48  ;;  %7927 = vmatpush3.msra.mxu0 %v10509_v1 }
 0x1e6   :  { %7964 = vmatpush3.msra.mxu1 %v6681_v29  ;;  %7928 = vmatprep.subr.mxu0 %v8969_v48  ;;  %v10596_v29 = vld [vmem:[%s12216_s3 + $0x2e0] sm:$0xff] }
 0x1e7   :  { %7965 = vmatprep.subr.mxu1 %v8969_v48  ;;  %7929 = vmatpush3.msra.mxu0 %v9863_v9  ;;  %v6677_v9 = vld [vmem:[%s12216_s3 + $0x188] sm:$0xff] }
 0x1e8   :  { %7966 = vmatpush3.msra.mxu1 %v6680_v36  ;;  %7930 = vmatprep.subr.mxu0 %v8969_v48  ;;  %v6702_v36 = vld [vmem:[%s12216_s3 + $0x350] sm:$0xff] }
 0x1e9   :  { %7967 = vmatprep.subr.mxu1 %v8969_v48  ;;  %7931 = vmatpush3.msra.mxu0 %v9878_v20  ;;  %v6676_v20 = vld [vmem:[%s12216_s3 + $0x180] sm:$0xff] }
 0x1ea   :  { %7968 = vmatpush3.msra.mxu1 %v6679_v7  ;;  %7932 = vmatprep.subr.mxu0 %v8969_v48  ;;  %v10607_v7 = vld [vmem:[%s12216_s3 + $0x2d8] sm:$0xff] }
 0x1eb   :  { %7969 = vmatprep.subr.mxu1 %v8969_v48  ;;  %7933 = vmatpush3.msra.mxu0 %v9895_v49  ;;  %v6707_v49 = vld [vmem:[%s12216_s3 + $0x378] sm:$0xff] }
 0x1ec   :  { %7970 = vmatpush3.msra.mxu1 %v6678_v44  ;;  %7934 = vmatprep.subr.mxu0 %v8969_v48  ;;  %v6701_v44 = vld [vmem:[%s12216_s3 + $0x348] sm:$0xff] }
 0x1ed   :  { %7971 = vmatprep.subr.mxu1 %v8969_v48  ;;  %7935 = vmatpush3.msra.mxu0 %v9915_v60  ;;  %v4227_v60 = vrot.slane %v10138_v15, 4  ;;  %v10801_v15 = vld [vmem:[%s12216_s3 + $0xf8] sm:$0xff] }
 0x1ee   :  { %7972 = vmatpush3.msra.mxu1 %v6677_v9  ;;  %7936 = vmatprep.subr.mxu0 %v8969_v48  ;;  %v10618_v9 = vld [vmem:[%s12216_s3 + $0x2d0] sm:$0xff] }
 0x1ef   :  { %7973 = vmatprep.subr.mxu1 %v8969_v48  ;;  %7937 = vmatpush3.msra.mxu0 %v9926_v51  ;;  %v6706_v51 = vld [vmem:[%s12216_s3 + $0x370] sm:$0xff] }
 0x1f0   :  { %7974 = vmatpush3.msra.mxu1 %v6676_v20  ;;  %7975 = vmatprep.mubr.msk.f32.mxu1 %vm8970_vm1, %v8969_v48  ;;  %v6700_v20 = vld [vmem:[%s12216_s3 + $0x340] sm:$0xff] }
 0x1f1   :  { %7938 = vmatprep.subr.mxu0 %v8969_v48  ;;  %7976 = vmatmul.mubr.f32.vlgmr.msra.gmra.mxu1 %v3883_v5  ;;  %v10563_v5 = vld [vmem:[%s12216_s3 + $0x2f8] sm:$0xff] }
 0x1f2   :  { %8013 = vmatprep.subr.mxu1 %v8969_v48  ;;  %7939 = vmatpush3.msra.mxu0 %v9938_v3  ;;  %v6705_v3 = vld [vmem:[%s12216_s3 + $0x368] sm:$0xff] }
 0x1f3   :  { %7940 = vmatprep.mubr.msk.f32.mxu0 %vm8970_vm1, %v8969_v48  ;;  %8014 = vmatpush3.msra.mxu1 %v6707_v49  ;;  %v10629_v49 = vld [vmem:[%s12216_s3 + $0x2c8] sm:$0xff] }
 0x1f4   :  { %7941 = vmatmul.mubr.f32.vlgmr.msra.gmra.mxu0 %v4227_v60  ;;  %7978 = vmatprep.subr.mxu0 %v8969_v48  ;;  %v6699_v60 = vld [vmem:[%s12216_s3 + $0x338] sm:$0xff] }
 0x1f5   :  { %8015 = vmatprep.subr.mxu1 %v8969_v48  ;;  %7979 = vmatpush3.msra.mxu0 %v10563_v5 }
 0x1f6   :  { %8016 = vmatpush3.msra.mxu1 %v6706_v51  ;;  %7980 = vmatprep.subr.mxu0 %v8969_v48  ;;  %v10640_v51 = vld [vmem:[%s12216_s3 + $0x2c0] sm:$0xff] }
 0x1f7   :  { %8017 = vmatprep.subr.mxu1 %v8969_v48  ;;  %7981 = vmatpush3.msra.mxu0 %v10574_v38 }
 0x1f8   :  { %8018 = vmatpush3.msra.mxu1 %v6705_v3  ;;  %7982 = vmatprep.subr.mxu0 %v8969_v48  ;;  %v6698_v3 = vld [vmem:[%s12216_s3 + $0x330] sm:$0xff] }
 0x1f9   :  { %8019 = vmatprep.subr.mxu1 %v8969_v48  ;;  %7983 = vmatpush3.msra.mxu0 %v10585_v57 }
 0x1fa   :  { %8020 = vmatpush3.msra.mxu1 %v6704_v45  ;;  %7984 = vmatprep.subr.mxu0 %v8969_v48  ;;  %v10651_v45 = vld [vmem:[%s12216_s3 + $0x2b8] sm:$0xff] }
 0x1fb   :  { %8021 = vmatprep.subr.mxu1 %v8969_v48  ;;  %7985 = vmatpush3.msra.mxu0 %v10596_v29 }
 0x1fc   :  { %8022 = vmatpush3.msra.mxu1 %v6703_v32  ;;  %7986 = vmatprep.subr.mxu0 %v8969_v48  ;;  %v6697_v32 = vld [vmem:[%s12216_s3 + $0x328] sm:$0xff] }
 0x1fd   :  { %8023 = vmatprep.subr.mxu1 %v8969_v48  ;;  %7987 = vmatpush3.msra.mxu0 %v10607_v7 }
 0x1fe   :  { %8024 = vmatpush3.msra.mxu1 %v6702_v36  ;;  %7988 = vmatprep.subr.mxu0 %v8969_v48  ;;  %v10662_v36 = vld [vmem:[%s12216_s3 + $0x2b0] sm:$0xff] }
 0x1ff   :  { %8025 = vmatprep.subr.mxu1 %v8969_v48  ;;  %7989 = vmatpush3.msra.mxu0 %v10618_v9 }
 0x200   :  { %8026 = vmatpush3.msra.mxu1 %v6701_v44  ;;  %7990 = vmatprep.subr.mxu0 %v8969_v48  ;;  %v6696_v44 = vld [vmem:[%s12216_s3 + $0x320] sm:$0xff] }
 0x201   :  { %8027 = vmatprep.subr.mxu1 %v8969_v48  ;;  %7991 = vmatpush3.msra.mxu0 %v10629_v49 }
 0x202   :  { %8028 = vmatpush3.msra.mxu1 %v6700_v20  ;;  %7992 = vmatprep.subr.mxu0 %v8969_v48  ;;  %v10673_v20 = vld [vmem:[%s12216_s3 + $0x2a8] sm:$0xff] }
 0x203   :  { %8029 = vmatprep.subr.mxu1 %v8969_v48  ;;  %7993 = vmatpush3.msra.mxu0 %v10640_v51 }
 0x204   :  { %8030 = vmatpush3.msra.mxu1 %v6699_v60  ;;  %7994 = vmatprep.subr.mxu0 %v8969_v48  ;;  %v6695_v60 = vld [vmem:[%s12216_s3 + $0x318] sm:$0xff] }
 0x205   :  { %8031 = vmatprep.subr.mxu1 %v8969_v48  ;;  %7995 = vmatpush3.msra.mxu0 %v10651_v45 }
 0x206   :  { %8032 = vmatpush3.msra.mxu1 %v6698_v3  ;;  %7996 = vmatprep.subr.mxu0 %v8969_v48  ;;  %v10684_v3 = vld [vmem:[%s12216_s3 + $0x2a0] sm:$0xff] }
 0x207   :  { %8033 = vmatprep.subr.mxu1 %v8969_v48  ;;  %7997 = vmatpush3.msra.mxu0 %v10662_v36 }
 0x208   :  { %8034 = vmatpush3.msra.mxu1 %v6697_v32  ;;  %7998 = vmatprep.subr.mxu0 %v8969_v48  ;;  %v6694_v32 = vld [vmem:[%s12216_s3 + $0x310] sm:$0xff] }
 0x209   :  { %8035 = vmatprep.subr.mxu1 %v8969_v48  ;;  %7999 = vmatpush3.msra.mxu0 %v10673_v20 }
 0x20a   :  { %8036 = vmatpush3.msra.mxu1 %v6696_v44  ;;  %8000 = vmatprep.subr.mxu0 %v8969_v48  ;;  %v10695_v44 = vld [vmem:[%s12216_s3 + $0x298] sm:$0xff] }
 0x20b   :  { %8037 = vmatprep.subr.mxu1 %v8969_v48  ;;  %8001 = vmatpush3.msra.mxu0 %v10684_v3 }
 0x20c   :  { %8038 = vmatpush3.msra.mxu1 %v6695_v60  ;;  %8002 = vmatprep.subr.mxu0 %v8969_v48  ;;  %v10706_v60 = vld [vmem:[%s12216_s3 + $0x290] sm:$0xff] }
 0x20d   :  { %8039 = vmatprep.subr.mxu1 %v8969_v48  ;;  %8003 = vmatpush3.msra.mxu0 %v10695_v44 }
 0x20e   :  { %8040 = vmatpush3.msra.mxu1 %v6694_v32  ;;  %8004 = vmatprep.subr.mxu0 %v8969_v48  ;;  %v10717_v32 = vld [vmem:[%s12216_s3 + $0x288] sm:$0xff] }
 0x20f   :  { %8041 = vmatprep.subr.mxu1 %v8969_v48  ;;  %8005 = vmatpush3.msra.mxu0 %v10706_v60 }
 0x210   :  { %8042 = vmatpush3.msra.mxu1 %v6693_v42  ;;  %8006 = vmatprep.subr.mxu0 %v8969_v48  ;;  %v10728_v42 = vld [vmem:[%s12216_s3 + $0x280] sm:$0xff] }
 0x211   :  { %8043 = vmatprep.subr.mxu1 %v8969_v48  ;;  %8007 = vmatpush3.msra.mxu0 %v10717_v32 }
 0x212   :  { %8044 = vmatpush3.msra.mxu1 %v6692_v11  ;;  %8045 = vmatprep.mubr.msk.f32.mxu1 %vm8970_vm1, %v8969_v48  ;;  %v10884_v11 = vld [vmem:[%s12216_s3 + $0x150] sm:$0xff] }
 0x213   :  { %8008 = vmatprep.subr.mxu0 %v8969_v48  ;;  %8046 = vmatmul.mubr.f32.vlgmr.msra.gmra.mxu1 %v10383_v59  ;;  %12249 = vst [vmem:[#allocation12_spill] sm:$0xff] %v10884_v11 }
 0x214   :  { %8083 = vmatprep.subr.mxu1 %v8969_v48  ;;  %8009 = vmatpush3.msra.mxu0 %v10728_v42 }
 0x215   :  { %8010 = vmatprep.mubr.msk.f32.mxu0 %vm8970_vm1, %v8969_v48  ;;  %8084 = vmatpush3.msra.mxu1 %v10143_v33  ;;  %v12227_v33 = vrot.slane %v10362_v63, 4 }
 0x216   :  { %8011 = vmatmul.mubr.f32.vlgmr.msra.gmra.mxu0 %v4369_v10  ;;  %8048 = vmatprep.subr.mxu0 %v8969_v48  ;;  %v12226_v10 = vrot.slane %v10362_v63, 6 }
 0x217   :  { %8085 = vmatprep.subr.mxu1 %v8969_v48  ;;  %8049 = vmatpush3.msra.mxu0 %v10153_v12  ;;  %v10812_v12 = vld [vmem:[%s12216_s3 + $0x178] sm:$0xff] }
 0x218   :  { %8086 = vmatpush3.msra.mxu1 %v10158_v25  ;;  %8050 = vmatprep.subr.mxu0 %v8969_v48  ;;  %v10820_v25 = vld [vmem:[%s12216_s3 + $0xf0] sm:$0xff] }
 0x219   :  { %8087 = vmatprep.subr.mxu1 %v8969_v48  ;;  %8051 = vmatpush3.msra.mxu0 %v10172_v30  ;;  %v10828_v30 = vld [vmem:[%s12216_s3 + $0x170] sm:$0xff] }
 0x21a   :  { %8088 = vmatpush3.msra.mxu1 %v10177_v0  ;;  %8052 = vmatprep.subr.mxu0 %v8969_v48  ;;  %12245 = vst [vmem:[#allocation8_spill] sm:$0xff] %v10828_v30  ;;  %v10835_v0 = vld [vmem:[%s12216_s3 + $0xe8] sm:$0xff] }
 0x21b   :  { %8089 = vmatprep.subr.mxu1 %v8969_v48  ;;  %8053 = vmatpush3.msra.mxu0 %v10187_v43  ;;  %v10842_v43 = vld [vmem:[%s12216_s3 + $0x168] sm:$0xff] }
 0x21c   :  { %8090 = vmatpush3.msra.mxu1 %v10192_v47  ;;  %8054 = vmatprep.subr.mxu0 %v8969_v48  ;;  %12246 = vst [vmem:[#allocation9_spill] sm:$0xff] %v10842_v43  ;;  %v10849_v47 = vld [vmem:[%s12216_s3 + $0xe0] sm:$0xff] }
 0x21d   :  { %8091 = vmatprep.subr.mxu1 %v8969_v48  ;;  %8055 = vmatpush3.msra.mxu0 %v10201_v27  ;;  %v10856_v27 = vld [vmem:[%s12216_s3 + $0x160] sm:$0xff] }
 0x21e   :  { %8092 = vmatpush3.msra.mxu1 %v10206_v37  ;;  %8056 = vmatprep.subr.mxu0 %v8969_v48  ;;  %12247 = vst [vmem:[#allocation10_spill] sm:$0xff] %v10856_v27  ;;  %v10863_v37 = vld [vmem:[%s12216_s3 + $0xd8] sm:$0xff] }
 0x21f   :  { %8093 = vmatprep.subr.mxu1 %v8969_v48  ;;  %8057 = vmatpush3.msra.mxu0 %v10215_v17  ;;  %v10870_v17 = vld [vmem:[%s12216_s3 + $0x158] sm:$0xff] }
 0x220   :  { %8094 = vmatpush3.msra.mxu1 %v10220_v4  ;;  %8058 = vmatprep.subr.mxu0 %v8969_v48  ;;  %12248 = vst [vmem:[#allocation11_spill] sm:$0xff] %v10870_v17  ;;  %v10877_v4 = vld [vmem:[%s12216_s3 + $0xd0] sm:$0xff] }
 0x221   :  { %8095 = vmatprep.subr.mxu1 %v8969_v48  ;;  %8059 = vmatpush3.msra.mxu0 %v10231_v62  ;;  %v10891_v62 = vld [vmem:[%s12216_s3 + $0xc8] sm:$0xff] }
 0x222   :  { %8096 = vmatpush3.msra.mxu1 %v10236_v21  ;;  %8060 = vmatprep.subr.mxu0 %v8969_v48  ;;  %v10898_v21 = vld [vmem:[%s12216_s3 + $0x148] sm:$0xff] }
 0x223   :  { %8097 = vmatprep.subr.mxu1 %v8969_v48  ;;  %8061 = vmatpush3.msra.mxu0 %v10247_v35  ;;  %12250 = vst [vmem:[#allocation13_spill] sm:$0xff] %v10898_v21  ;;  %v10905_v35 = vld [vmem:[%s12216_s3 + $0xc0] sm:$0xff] }
 0x224   :  { %8098 = vmatpush3.msra.mxu1 %v10252_v28  ;;  %8062 = vmatprep.subr.mxu0 %v8969_v48  ;;  %v10912_v28 = vld [vmem:[%s12216_s3 + $0x140] sm:$0xff] }
 0x225   :  { %8099 = vmatprep.subr.mxu1 %v8969_v48  ;;  %8063 = vmatpush3.msra.mxu0 %v10268_v53  ;;  %12251 = vst [vmem:[#allocation14_spill] sm:$0xff] %v10912_v28  ;;  %v10919_v53 = vld [vmem:[%s12216_s3 + $0xb8] sm:$0xff] }
 0x226   :  { %8100 = vmatpush3.msra.mxu1 %v10273_v55  ;;  %8064 = vmatprep.subr.mxu0 %v8969_v48  ;;  %v10926_v55 = vld [vmem:[%s12216_s3 + $0x138] sm:$0xff] }
 0x227   :  { %8101 = vmatprep.subr.mxu1 %v8969_v48  ;;  %8065 = vmatpush3.msra.mxu0 %v10285_v19  ;;  %12252 = vst [vmem:[#allocation15_spill] sm:$0xff] %v10926_v55 }
 0x228   :  { %8102 = vmatpush3.msra.mxu1 %v10290_v40  ;;  %8066 = vmatprep.subr.mxu0 %v8969_v48 }
 0x229   :  { %8103 = vmatprep.subr.mxu1 %v8969_v48  ;;  %8067 = vmatpush3.msra.mxu0 %v10299_v14 }
 0x22a   :  { %8104 = vmatpush3.msra.mxu1 %v10304_v23  ;;  %8068 = vmatprep.subr.mxu0 %v8969_v48 }
 0x22b   :  { %8105 = vmatprep.subr.mxu1 %v8969_v48  ;;  %8069 = vmatpush3.msra.mxu0 %v10313_v26 }
 0x22c   :  { %8106 = vmatpush3.msra.mxu1 %v10318_v41  ;;  %8070 = vmatprep.subr.mxu0 %v8969_v48 }
 0x22d   :  { %8107 = vmatprep.subr.mxu1 %v8969_v48  ;;  %8071 = vmatpush3.msra.mxu0 %v10327_v58 }
 0x22e   :  { %8108 = vmatpush3.msra.mxu1 %v10332_v39  ;;  %8072 = vmatprep.subr.mxu0 %v8969_v48 }
 0x22f   :  { %8109 = vmatprep.subr.mxu1 %v8969_v48  ;;  %8073 = vmatpush3.msra.mxu0 %v10341_v6 }
 0x230   :  { %8110 = vmatpush3.msra.mxu1 %v10346_v52  ;;  %8074 = vmatprep.subr.mxu0 %v8969_v48 }
 0x231   :  { %8111 = vmatprep.subr.mxu1 %v8969_v48  ;;  %8075 = vmatpush3.msra.mxu0 %v10355_v50 }
 0x232   :  { %8112 = vmatpush3.msra.mxu1 %v10360_v22  ;;  %8076 = vmatprep.subr.mxu0 %v8969_v48 }
 0x233   :  { %8113 = vmatprep.subr.mxu1 %v8969_v48  ;;  %8077 = vmatpush3.msra.mxu0 %v10371_v24 }
 0x234   :  { %8114 = vmatpush3.msra.mxu1 %v10376_v31  ;;  %8115 = vmatprep.mubr.msk.f32.mxu1 %vm8970_vm1, %v8969_v48 }
 0x235   :  { %8078 = vmatprep.subr.mxu0 %v8969_v48  ;;  %8116 = vmatmul.mubr.f32.vlgmr.msra.gmra.mxu1 %v12226_v10  ;;  %v10933_v10 = vld [vmem:[%s12216_s3 + $0xb0] sm:$0xff] }
 0x236   :  { %8153 = vmatprep.subr.mxu1 %v8969_v48  ;;  %8079 = vmatpush3.msra.mxu0 %v10388_v61 }
 0x237   :  { %8080 = vmatprep.mubr.msk.f32.mxu0 %vm8970_vm1, %v8969_v48  ;;  %8154 = vmatpush3.msra.mxu1 %v10801_v15 }
 0x238   :  { %8081 = vmatmul.mubr.f32.vlgmr.msra.gmra.mxu0 %v12227_v33  ;;  %8118 = vmatprep.subr.mxu0 %v8969_v48  ;;  %v10940_v33 = vld [vmem:[%s12216_s3 + $0x130] sm:$0xff] }
 0x239   :  { %8155 = vmatprep.subr.mxu1 %v8969_v48  ;;  %8119 = vmatpush3.msra.mxu0 %v10812_v12  ;;  %12253 = vst [vmem:[#allocation16_spill] sm:$0xff] %v10940_v33 }
 0x23a   :  { %8156 = vmatpush3.msra.mxu1 %v10820_v25  ;;  %8120 = vmatprep.subr.mxu0 %v8969_v48 }
 0x23b   :  { %8157 = vmatprep.subr.mxu1 %v8969_v48  ;;  %8121 = vmatpush3.msra.mxu0 %v10828_v30  ;;  %v11026_v30 = vld [vmem:[%s12216_s3 + $0x100] sm:$0xff] }
 0x23c   :  { %8158 = vmatpush3.msra.mxu1 %v10835_v0  ;;  %8122 = vmatprep.subr.mxu0 %v8969_v48 }
 0x23d   :  { %8159 = vmatprep.subr.mxu1 %v8969_v48  ;;  %8123 = vmatpush3.msra.mxu0 %v10842_v43  ;;  %v11010_v43 = vld [vmem:[%s12216_s3 + $0x108] sm:$0xff] }
 0x23e   :  { %8160 = vmatpush3.msra.mxu1 %v10849_v47  ;;  %8124 = vmatprep.subr.mxu0 %v8969_v48 }
 0x23f   :  { %8161 = vmatprep.subr.mxu1 %v8969_v48  ;;  %8125 = vmatpush3.msra.mxu0 %v10856_v27  ;;  %v10996_v27 = vld [vmem:[%s12216_s3 + $0x110] sm:$0xff] }
 0x240   :  { %8162 = vmatpush3.msra.mxu1 %v10863_v37  ;;  %8126 = vmatprep.subr.mxu0 %v8969_v48 }
 0x241   :  { %8163 = vmatprep.subr.mxu1 %v8969_v48  ;;  %8127 = vmatpush3.msra.mxu0 %v10870_v17  ;;  %v10982_v17 = vld [vmem:[%s12216_s3 + $0x118] sm:$0xff] }
 0x242   :  { %8164 = vmatpush3.msra.mxu1 %v10877_v4  ;;  %8128 = vmatprep.subr.mxu0 %v8969_v48  ;;  %12256 = vst [vmem:[#allocation19_spill] sm:$0xff] %v10982_v17 }
 0x243   :  { %8165 = vmatprep.subr.mxu1 %v8969_v48  ;;  %8129 = vmatpush3.msra.mxu0 %v10884_v11  ;;  %v10968_v11 = vld [vmem:[%s12216_s3 + $0x120] sm:$0xff] }
 0x244   :  { %8166 = vmatpush3.msra.mxu1 %v10891_v62  ;;  %8130 = vmatprep.subr.mxu0 %v8969_v48  ;;  %12255 = vst [vmem:[#allocation18_spill] sm:$0xff] %v10968_v11 }
 0x245   :  { %8167 = vmatprep.subr.mxu1 %v8969_v48  ;;  %8131 = vmatpush3.msra.mxu0 %v10898_v21  ;;  %v10954_v21 = vld [vmem:[%s12216_s3 + $0x128] sm:$0xff] }
 0x246   :  { %8168 = vmatpush3.msra.mxu1 %v10905_v35  ;;  %8132 = vmatprep.subr.mxu0 %v8969_v48  ;;  %12254 = vst [vmem:[#allocation17_spill] sm:$0xff] %v10954_v21 }
 0x247   :  { %8169 = vmatprep.subr.mxu1 %v8969_v48  ;;  %8133 = vmatpush3.msra.mxu0 %v10912_v28  ;;  %v10947_v28 = vld [vmem:[%s12216_s3 + $0xa8] sm:$0xff] }
 0x248   :  { %8170 = vmatpush3.msra.mxu1 %v10919_v53  ;;  %8134 = vmatprep.subr.mxu0 %v8969_v48 }
 0x249   :  { %8171 = vmatprep.subr.mxu1 %v8969_v48  ;;  %8135 = vmatpush3.msra.mxu0 %v10926_v55  ;;  %v10961_v55 = vld [vmem:[%s12216_s3 + $0xa0] sm:$0xff] }
 0x24a   :  { %8172 = vmatpush3.msra.mxu1 %v10933_v10  ;;  %8136 = vmatprep.subr.mxu0 %v8969_v48 }
 0x24b   :  { %8173 = vmatprep.subr.mxu1 %v8969_v48  ;;  %8137 = vmatpush3.msra.mxu0 %v10940_v33  ;;  %v10975_v33 = vld [vmem:[%s12216_s3 + $0x98] sm:$0xff] }
 0x24c   :  { %8174 = vmatpush3.msra.mxu1 %v10947_v28  ;;  %8138 = vmatprep.subr.mxu0 %v8969_v48 }
 0x24d   :  { %8175 = vmatprep.subr.mxu1 %v8969_v48  ;;  %8139 = vmatpush3.msra.mxu0 %v10954_v21  ;;  %v10989_v21 = vld [vmem:[%s12216_s3 + $0x90] sm:$0xff] }
 0x24e   :  { %8176 = vmatpush3.msra.mxu1 %v10961_v55  ;;  %8140 = vmatprep.subr.mxu0 %v8969_v48 }
 0x24f   :  { %8177 = vmatprep.subr.mxu1 %v8969_v48  ;;  %8141 = vmatpush3.msra.mxu0 %v10968_v11  ;;  %v11003_v11 = vld [vmem:[%s12216_s3 + $0x88] sm:$0xff] }
 0x250   :  { %8178 = vmatpush3.msra.mxu1 %v10975_v33  ;;  %8142 = vmatprep.subr.mxu0 %v8969_v48 }
 0x251   :  { %8179 = vmatprep.subr.mxu1 %v8969_v48  ;;  %8143 = vmatpush3.msra.mxu0 %v10982_v17  ;;  %v11017_v17 = vld [vmem:[%s12216_s3 + $0x80] sm:$0xff] }
 0x252   :  { %8180 = vmatpush3.msra.mxu1 %v10989_v21  ;;  %8144 = vmatprep.subr.mxu0 %v8969_v48 }
 0x253   :  { %8181 = vmatprep.subr.mxu1 %v8969_v48  ;;  %8145 = vmatpush3.msra.mxu0 %v10996_v27 }
 0x254   :  { %8182 = vmatpush3.msra.mxu1 %v11003_v11  ;;  %8146 = vmatprep.subr.mxu0 %v8969_v48 }
 0x255   :  { %8183 = vmatprep.subr.mxu1 %v8969_v48  ;;  %8147 = vmatpush3.msra.mxu0 %v11010_v43 }
 0x256   :  { %8184 = vmatpush3.msra.mxu1 %v11017_v17  ;;  %8185 = vmatprep.mubr.msk.f32.mxu1 %vm8970_vm1, %v8969_v48 }
 0x257   :  { %8148 = vmatprep.subr.mxu0 %v8969_v48  ;;  %8186 = vmatmul.mubr.f32.vlgmr.msra.gmra.mxu1 %v10362_v63 }
 0x258   :  { %8223 = vmatprep.subr.mxu1 %v8969_v48  ;;  %8149 = vmatpush3.msra.mxu0 %v11026_v30 }
 0x259   :  { %8150 = vmatprep.mubr.msk.f32.mxu0 %vm8970_vm1, %v8969_v48  ;;  %8224 = vmatpush3.msra.mxu1 %v10563_v5  ;;  %v12257_v5 = vld [vmem:[#allocation6_spill] sm:$0xff] }
 0x25a   :  { %8151 = vmatmul.mubr.f32.vlgmr.msra.gmra.mxu0 %v10383_v59  ;;  %8188 = vmatprep.subr.mxu0 %v8969_v48 }
 0x25b   :  { %8225 = vmatprep.subr.mxu1 %v8969_v48  ;;  %8189 = vmatpush3.msra.mxu0 %v10410_v13  ;;  %v11084_v13 = vld [vmem:[%s12216_s3 + $0x228] sm:$0xff] }
 0x25c   :  { %8226 = vmatpush3.msra.mxu1 %v10574_v38  ;;  %8190 = vmatprep.subr.mxu0 %v8969_v48  ;;  %v12240_v38 = vrot.slane %v12257_v5, 2 }
 0x25d   :  { %8227 = vmatprep.subr.mxu1 %v8969_v48  ;;  %8191 = vmatpush3.msra.mxu0 %v10421_v8 }
 0x25e   :  { %8228 = vmatpush3.msra.mxu1 %v10585_v57  ;;  %8192 = vmatprep.subr.mxu0 %v8969_v48  ;;  %v11136_v57 = vld [vmem:[%s12216_s3 + $0x200] sm:$0xff] }
 0x25f   :  { %8229 = vmatprep.subr.mxu1 %v8969_v48  ;;  %8193 = vmatpush3.msra.mxu0 %v10432_v18  ;;  %v11093_v18 = vld [vmem:[%s12216_s3 + $0x220] sm:$0xff] }
 0x260   :  { %8230 = vmatpush3.msra.mxu1 %v10596_v29  ;;  %8194 = vmatprep.subr.mxu0 %v8969_v48  ;;  %v11144_v29 = vld [vmem:[%s12216_s3 + $0x478] sm:$0xff] }
 0x261   :  { %8231 = vmatprep.subr.mxu1 %v8969_v48  ;;  %8195 = vmatpush3.msra.mxu0 %v10443_v54 }
 0x262   :  { %8232 = vmatpush3.msra.mxu1 %v10607_v7  ;;  %8196 = vmatprep.subr.mxu0 %v8969_v48  ;;  %v11153_v7 = vld [vmem:[%s12216_s3 + $0x3f8] sm:$0xff] }
 0x263   :  { %8233 = vmatprep.subr.mxu1 %v8969_v48  ;;  %8197 = vmatpush3.msra.mxu0 %v10454_v46 }
 0x264   :  { %8234 = vmatpush3.msra.mxu1 %v10618_v9  ;;  %8198 = vmatprep.subr.mxu0 %v8969_v48  ;;  %v11159_v9 = vld [vmem:[%s12216_s3 + $0x470] sm:$0xff] }
 0x265   :  { %8235 = vmatprep.subr.mxu1 %v8969_v48  ;;  %8199 = vmatpush3.msra.mxu0 %v10465_v16 }
 0x266   :  { %8236 = vmatpush3.msra.mxu1 %v10629_v49  ;;  %8200 = vmatprep.subr.mxu0 %v8969_v48  ;;  %v11167_v49 = vld [vmem:[%s12216_s3 + $0x3f0] sm:$0xff] }
 0x267   :  { %8237 = vmatprep.subr.mxu1 %v8969_v48  ;;  %8201 = vmatpush3.msra.mxu0 %v10476_v56  ;;  %v11104_v56 = vld [vmem:[%s12216_s3 + $0x218] sm:$0xff] }
 0x268   :  { %8238 = vmatpush3.msra.mxu1 %v10640_v51  ;;  %8202 = vmatprep.subr.mxu0 %v8969_v48  ;;  %v11173_v51 = vld [vmem:[%s12216_s3 + $0x468] sm:$0xff] }
 0x269   :  { %8239 = vmatprep.subr.mxu1 %v8969_v48  ;;  %8203 = vmatpush3.msra.mxu0 %v10487_v2 }
 0x26a   :  { %8240 = vmatpush3.msra.mxu1 %v10651_v45  ;;  %8204 = vmatprep.subr.mxu0 %v8969_v48  ;;  %v11181_v45 = vld [vmem:[%s12216_s3 + $0x3e8] sm:$0xff] }
 0x26b   :  { %8241 = vmatprep.subr.mxu1 %v8969_v48  ;;  %8205 = vmatpush3.msra.mxu0 %v10498_v34  ;;  %v11113_v34 = vld [vmem:[%s12216_s3 + $0x210] sm:$0xff] }
 0x26c   :  { %8242 = vmatpush3.msra.mxu1 %v10662_v36  ;;  %8206 = vmatprep.subr.mxu0 %v8969_v48  ;;  %v11187_v36 = vld [vmem:[%s12216_s3 + $0x460] sm:$0xff] }
 0x26d   :  { %8243 = vmatprep.subr.mxu1 %v8969_v48  ;;  %8207 = vmatpush3.msra.mxu0 %v10509_v1  ;;  %v11122_v1 = vld [vmem:[%s12216_s3 + $0x208] sm:$0xff] }
 0x26e   :  { %8244 = vmatpush3.msra.mxu1 %v10673_v20  ;;  %8208 = vmatprep.subr.mxu0 %v8969_v48  ;;  %v11195_v20 = vld [vmem:[%s12216_s3 + $0x3e0] sm:$0xff] }
 0x26f   :  { %8245 = vmatprep.subr.mxu1 %v8969_v48  ;;  %8209 = vmatpush3.msra.mxu0 %v11084_v13  ;;  %v4021_v8 = vpop.f32.mrf.mxu1 }
 0x270   :  { %8246 = vmatpush3.msra.mxu1 %v10684_v3  ;;  %8210 = vmatprep.subr.mxu0 %v8969_v48  ;;  %v11201_v3 = vld [vmem:[%s12216_s3 + $0x458] sm:$0xff] }
 0x271   :  { %8247 = vmatprep.subr.mxu1 %v8969_v48  ;;  %8211 = vmatpush3.msra.mxu0 %v11093_v18  ;;  %v3951_v54 = vpop.f32.mrf.mxu0  ;;  %v7837_v46 = vpop.f32.mrf.mxu1 }
 0x272   :  { %8248 = vmatpush3.msra.mxu1 %v10695_v44  ;;  %8212 = vmatprep.subr.mxu0 %v8969_v48  ;;  %v11098_v16 = vadd.f32 %v4021_v8, %v3951_v54  ;;  %v11209_v44 = vld [vmem:[%s12216_s3 + $0x3d8] sm:$0xff]  ;;  %v11237_v8 = vld [vmem:[%s12216_s3 + $0x3c8] sm:$0xff]  ;;  %v11243_v54 = vld [vmem:[%s12216_s3 + $0x440] sm:$0xff] }
 0x273   :  { %8249 = vmatprep.subr.mxu1 %v8969_v48  ;;  %8213 = vmatpush3.msra.mxu0 %v11104_v56  ;;  %v7802_v2 = vpop.f32.mrf.mxu0  ;;  %v11251_v46 = vld [vmem:[%s12216_s3 + $0x3c0] sm:$0xff] }
 0x274   :  { %8250 = vmatpush3.msra.mxu1 %v10706_v60  ;;  %8214 = vmatprep.subr.mxu0 %v8969_v48  ;;  %v11215_v60 = vld [vmem:[%s12216_s3 + $0x450] sm:$0xff]  ;;  %v11257_v2 = vld [vmem:[%s12216_s3 + $0x438] sm:$0xff] }
 0x275   :  { %8251 = vmatprep.subr.mxu1 %v8969_v48  ;;  %8215 = vmatpush3.msra.mxu0 %v11113_v34  ;;  %12258 = vst [vmem:[#allocation6_spill] sm:$0xff] %v11257_v2 }
 0x276   :  { %8252 = vmatpush3.msra.mxu1 %v10717_v32  ;;  %8216 = vmatprep.subr.mxu0 %v8969_v48  ;;  %v11223_v32 = vld [vmem:[%s12216_s3 + $0x3d0] sm:$0xff] }
 0x277   :  { %8253 = vmatprep.subr.mxu1 %v8969_v48  ;;  %8217 = vmatpush3.msra.mxu0 %v11122_v1 }
 0x278   :  { %8254 = vmatpush3.msra.mxu1 %v10728_v42  ;;  %8255 = vmatprep.mubr.msk.f32.mxu1 %vm8970_vm1, %v8969_v48  ;;  %v11229_v42 = vld [vmem:[%s12216_s3 + $0x448] sm:$0xff] }
 0x279   :  { %8218 = vmatprep.subr.mxu0 %v8969_v48  ;;  %8256 = vmatmul.mubr.f32.vlgmr.msra.gmra.mxu1 %v12240_v38 }
 0x27a   :  { %8293 = vmatprep.subr.mxu1 %v8969_v48  ;;  %8219 = vmatpush3.msra.mxu0 %v11136_v57 }
 0x27b   :  { %8220 = vmatprep.mubr.msk.f32.mxu0 %vm8970_vm1, %v8969_v48  ;;  %8294 = vmatpush3.msra.mxu1 %v11144_v29 }
 0x27c   :  { %8221 = vmatmul.mubr.f32.vlgmr.msra.gmra.mxu0 %v12257_v5  ;;  %8258 = vmatprep.subr.mxu0 %v8969_v48 }
 0x27d   :  { %8295 = vmatprep.subr.mxu1 %v8969_v48  ;;  %8259 = vmatpush3.msra.mxu0 %v11153_v7 }
 0x27e   :  { %8296 = vmatpush3.msra.mxu1 %v11159_v9  ;;  %8260 = vmatprep.subr.mxu0 %v8969_v48 }
 0x27f   :  { %8297 = vmatprep.subr.mxu1 %v8969_v48  ;;  %8261 = vmatpush3.msra.mxu0 %v11167_v49 }
 0x280   :  { %8298 = vmatpush3.msra.mxu1 %v11173_v51  ;;  %8262 = vmatprep.subr.mxu0 %v8969_v48 }
 0x281   :  { %8299 = vmatprep.subr.mxu1 %v8969_v48  ;;  %8263 = vmatpush3.msra.mxu0 %v11181_v45 }
 0x282   :  { %8300 = vmatpush3.msra.mxu1 %v11187_v36  ;;  %8264 = vmatprep.subr.mxu0 %v8969_v48 }
 0x283   :  { %8301 = vmatprep.subr.mxu1 %v8969_v48  ;;  %8265 = vmatpush3.msra.mxu0 %v11195_v20 }
 0x284   :  { %8302 = vmatpush3.msra.mxu1 %v11201_v3  ;;  %8266 = vmatprep.subr.mxu0 %v8969_v48 }
 0x285   :  { %8303 = vmatprep.subr.mxu1 %v8969_v48  ;;  %8267 = vmatpush3.msra.mxu0 %v11209_v44 }
 0x286   :  { %8304 = vmatpush3.msra.mxu1 %v11215_v60  ;;  %8268 = vmatprep.subr.mxu0 %v8969_v48 }
 0x287   :  { %8305 = vmatprep.subr.mxu1 %v8969_v48  ;;  %8269 = vmatpush3.msra.mxu0 %v11223_v32 }
 0x288   :  { %8306 = vmatpush3.msra.mxu1 %v11229_v42  ;;  %8270 = vmatprep.subr.mxu0 %v8969_v48 }
 0x289   :  { %8307 = vmatprep.subr.mxu1 %v8969_v48  ;;  %8271 = vmatpush3.msra.mxu0 %v11237_v8 }
 0x28a   :  { %8308 = vmatpush3.msra.mxu1 %v11243_v54  ;;  %8272 = vmatprep.subr.mxu0 %v8969_v48 }
 0x28b   :  { %8309 = vmatprep.subr.mxu1 %v8969_v48  ;;  %8273 = vmatpush3.msra.mxu0 %v11251_v46 }
 0x28c   :  { %8310 = vmatpush3.msra.mxu1 %v11257_v2  ;;  %8274 = vmatprep.subr.mxu0 %v8969_v48 }
 0x28d   :  { %8311 = vmatprep.subr.mxu1 %v8969_v48  ;;  %8275 = vmatpush3.msra.mxu0 %v10285_v19 }
 0x28e   :  { %8312 = vmatpush3.msra.mxu1 %v10290_v40  ;;  %8276 = vmatprep.subr.mxu0 %v8969_v48 }
 0x28f   :  { %8313 = vmatprep.subr.mxu1 %v8969_v48  ;;  %8277 = vmatpush3.msra.mxu0 %v10299_v14  ;;  %v4199_v38 = vpop.f32.mrf.mxu1 }
 0x290   :  { %8314 = vmatpush3.msra.mxu1 %v10304_v23  ;;  %8278 = vmatprep.subr.mxu0 %v8969_v48 }
 0x291   :  { %8315 = vmatprep.subr.mxu1 %v8969_v48  ;;  %8279 = vmatpush3.msra.mxu0 %v10313_v26  ;;  %v7907_v2 = vpop.f32.mrf.mxu1  ;;  %v12259_v26 = vld [vmem:[#allocation7_spill] sm:$0xff] }
 0x292   :  { %8316 = vmatpush3.msra.mxu1 %v10318_v41  ;;  %8280 = vmatprep.subr.mxu0 %v8969_v48  ;;  %v4108_v19 = vpop.f32.mrf.mxu0  ;;  %v5068_v41 = vrot.slane %v12259_v26, 2  ;;  %v8878_v2 = vld [vmem:[%s12216_s3 + $0x1d8] sm:$0xff] }
 0x293   :  { %8317 = vmatprep.subr.mxu1 %v8969_v48  ;;  %8281 = vmatpush3.msra.mxu0 %v10327_v58  ;;  %v4112_v40 = vadd.f32 %v4108_v19, %v11098_v16  ;;  %v5157_v58 = vld [vmem:[%s12216_s3 + $0x78] sm:$0xff]  ;;  %v8877_v16 = vld [vmem:[%s12216_s3 + $0x1e0] sm:$0xff] }
 0x294   :  { %8318 = vmatpush3.msra.mxu1 %v10332_v39  ;;  %8282 = vmatprep.subr.mxu0 %v8969_v48  ;;  %v7872_v14 = vpop.f32.mrf.mxu0  ;;  %v5156_v39 = vld [vmem:[%s12216_s3 + $0x70] sm:$0xff] }
 0x295   :  { %8319 = vmatprep.subr.mxu1 %v8969_v48  ;;  %8283 = vmatpush3.msra.mxu0 %v10341_v6  ;;  %v11280_v23 = vadd.f32 %v4199_v38, %v4112_v40  ;;  %v5155_v6 = vld [vmem:[%s12216_s3 + $0x68] sm:$0xff]  ;;  %v12264_v19 = vld [vmem:[#allocation11_spill] sm:$0xff]  ;;  %v12265_v14 = vld [vmem:[#allocation12_spill] sm:$0xff] }
 0x296   :  { %8320 = vmatpush3.msra.mxu1 %v10346_v52  ;;  %8284 = vmatprep.subr.mxu0 %v8969_v48  ;;  %v5154_v52 = vld [vmem:[%s12216_s3 + $0x60] sm:$0xff]  ;;  %v12263_v38 = vld [vmem:[#allocation10_spill] sm:$0xff] }
 0x297   :  { %8321 = vmatprep.subr.mxu1 %v8969_v48  ;;  %8285 = vmatpush3.msra.mxu0 %v10355_v50  ;;  %v5153_v50 = vld [vmem:[%s12216_s3 + $0x58] sm:$0xff]  ;;  %v8879_v40 = vld [vmem:[%s12216_s3 + $0x1d0] sm:$0xff] }
 0x298   :  { %8322 = vmatpush3.msra.mxu1 %v10360_v22  ;;  %8286 = vmatprep.subr.mxu0 %v8969_v48  ;;  %v5152_v22 = vld [vmem:[%s12216_s3 + $0x50] sm:$0xff] }
 0x299   :  { %8323 = vmatprep.subr.mxu1 %v8969_v48  ;;  %8287 = vmatpush3.msra.mxu0 %v10371_v24  ;;  %v5151_v24 = vld [vmem:[%s12216_s3 + $0x48] sm:$0xff] }
 0x29a   :  { %8324 = vmatpush3.msra.mxu1 %v10376_v31  ;;  %8325 = vmatprep.mubr.msk.f32.mxu1 %vm8970_vm1, %v8969_v48  ;;  %v5150_v31 = vld [vmem:[%s12216_s3 + $0x40] sm:$0xff] }
 0x29b   :  { %8288 = vmatprep.subr.mxu0 %v8969_v48  ;;  %8326 = vmatmul.mubr.f32.vlgmr.msra.gmra.mxu1 %v5068_v41 }
 0x29c   :  { %8363 = vmatprep.subr.mxu1 %v8969_v48  ;;  %8289 = vmatpush3.msra.mxu0 %v10388_v61  ;;  %v5149_v61 = vld [vmem:[%s12216_s3 + $0x38] sm:$0xff] }
 0x29d   :  { %8290 = vmatprep.mubr.msk.f32.mxu0 %vm8970_vm1, %v8969_v48  ;;  %8364 = vmatpush3.msra.mxu1 %v5157_v58  ;;  %v8880_v58 = vld [vmem:[%s12216_s3 + $0x1c8] sm:$0xff] }
 0x29e   :  { %8291 = vmatmul.mubr.f32.vlgmr.msra.gmra.mxu0 %v12259_v26  ;;  %8328 = vmatprep.subr.mxu0 %v8969_v48 }
 0x29f   :  { %8365 = vmatprep.subr.mxu1 %v8969_v48  ;;  %8329 = vmatpush3.msra.mxu0 %v10801_v15  ;;  %v5148_v15 = vld [vmem:[%s12216_s3 + $0x30] sm:$0xff] }
 0x2a0   :  { %8366 = vmatpush3.msra.mxu1 %v5156_v39  ;;  %8330 = vmatprep.subr.mxu0 %v8969_v48  ;;  %v12266_v39 = vld [vmem:[#allocation13_spill] sm:$0xff] }
 0x2a1   :  { %8367 = vmatprep.subr.mxu1 %v8969_v48  ;;  %8331 = vmatpush3.msra.mxu0 %v10820_v25  ;;  %v5147_v25 = vld [vmem:[%s12216_s3 + $0x28] sm:$0xff] }
 0x2a2   :  { %8368 = vmatpush3.msra.mxu1 %v5155_v6  ;;  %8332 = vmatprep.subr.mxu0 %v8969_v48  ;;  %v8881_v6 = vld [vmem:[%s12216_s3 + $0x1c0] sm:$0xff] }
 0x2a3   :  { %8369 = vmatprep.subr.mxu1 %v8969_v48  ;;  %8333 = vmatpush3.msra.mxu0 %v10835_v0  ;;  %v5146_v0 = vld [vmem:[%s12216_s3 + $0x20] sm:$0xff] }
 0x2a4   :  { %8370 = vmatpush3.msra.mxu1 %v5154_v52  ;;  %8334 = vmatprep.subr.mxu0 %v8969_v48  ;;  %v12267_v52 = vld [vmem:[#allocation14_spill] sm:$0xff] }
 0x2a5   :  { %8371 = vmatprep.subr.mxu1 %v8969_v48  ;;  %8335 = vmatpush3.msra.mxu0 %v10849_v47 }
 0x2a6   :  { %8372 = vmatpush3.msra.mxu1 %v5153_v50  ;;  %8336 = vmatprep.subr.mxu0 %v8969_v48  ;;  %v8882_v50 = vld [vmem:[%s12216_s3 + $0x1b8] sm:$0xff] }
 0x2a7   :  { %8373 = vmatprep.subr.mxu1 %v8969_v48  ;;  %8337 = vmatpush3.msra.mxu0 %v10863_v37  ;;  %v5145_v37 = vld [vmem:[%s12216_s3 + $0x18] sm:$0xff] }
 0x2a8   :  { %8374 = vmatpush3.msra.mxu1 %v5152_v22  ;;  %8338 = vmatprep.subr.mxu0 %v8969_v48  ;;  %v12268_v22 = vld [vmem:[#allocation15_spill] sm:$0xff] }
 0x2a9   :  { %8375 = vmatprep.subr.mxu1 %v8969_v48  ;;  %8339 = vmatpush3.msra.mxu0 %v10877_v4 }
 0x2aa   :  { %8376 = vmatpush3.msra.mxu1 %v5151_v24  ;;  %8340 = vmatprep.subr.mxu0 %v8969_v48  ;;  %v8883_v24 = vld [vmem:[%s12216_s3 + $0x1b0] sm:$0xff] }
 0x2ab   :  { %8377 = vmatprep.subr.mxu1 %v8969_v48  ;;  %8341 = vmatpush3.msra.mxu0 %v10891_v62  ;;  %v5144_v62 = vld [vmem:[%s12216_s3 + $0x10] sm:$0xff] }
 0x2ac   :  { %8378 = vmatpush3.msra.mxu1 %v5150_v31  ;;  %8342 = vmatprep.subr.mxu0 %v8969_v48  ;;  %v12269_v31 = vld [vmem:[#allocation16_spill] sm:$0xff] }
 0x2ad   :  { %8379 = vmatprep.subr.mxu1 %v8969_v48  ;;  %8343 = vmatpush3.msra.mxu0 %v10905_v35 }
 0x2ae   :  { %8380 = vmatpush3.msra.mxu1 %v5149_v61  ;;  %8344 = vmatprep.subr.mxu0 %v8969_v48 }
 0x2af   :  { %8381 = vmatprep.subr.mxu1 %v8969_v48  ;;  %8345 = vmatpush3.msra.mxu0 %v10919_v53  ;;  %v5143_v53 = vld [vmem:[%s12216_s3 + $0x8] sm:$0xff] }
 0x2b0   :  { %8382 = vmatpush3.msra.mxu1 %v5148_v15  ;;  %8346 = vmatprep.subr.mxu0 %v8969_v48  ;;  %v8884_v15 = vld [vmem:[%s12216_s3 + $0x1a8] sm:$0xff] }
 0x2b1   :  { %8383 = vmatprep.subr.mxu1 %v8969_v48  ;;  %8347 = vmatpush3.msra.mxu0 %v10933_v10  ;;  %v4365_v47 = vpop.f32.mrf.mxu1 }
 0x2b2   :  { %8384 = vmatpush3.msra.mxu1 %v5147_v25  ;;  %8348 = vmatprep.subr.mxu0 %v8969_v48  ;;  %v12270_v25 = vld [vmem:[#allocation17_spill] sm:$0xff] }
 0x2b3   :  { %8385 = vmatprep.subr.mxu1 %v8969_v48  ;;  %8349 = vmatpush3.msra.mxu0 %v10947_v28  ;;  %v7977_v4 = vpop.f32.mrf.mxu1 }
 0x2b4   :  { %8386 = vmatpush3.msra.mxu1 %v5146_v0  ;;  %8350 = vmatprep.subr.mxu0 %v8969_v48  ;;  %v4295_v10 = vpop.f32.mrf.mxu0  ;;  %v12271_v4 = vld [vmem:[#allocation18_spill] sm:$0xff] }
 0x2b5   :  { %8387 = vmatprep.subr.mxu1 %v8969_v48  ;;  %8351 = vmatpush3.msra.mxu0 %v10961_v55  ;;  %v11380_v35 = vadd.f32 %v4365_v47, %v4295_v10  ;;  %v5142_v55 = vld [vmem:[%s12216_s3] sm:$0xff] }
 0x2b6   :  { %8388 = vmatpush3.msra.mxu1 %v5145_v37  ;;  %8352 = vmatprep.subr.mxu0 %v8969_v48  ;;  %v7942_v28 = vpop.f32.mrf.mxu0  ;;  %v8885_v47 = vld [vmem:[%s12216_s3 + $0x1a0] sm:$0xff] }
 0x2b7   :  { %8389 = vmatprep.subr.mxu1 %v8969_v48  ;;  %8353 = vmatpush3.msra.mxu0 %v10975_v33  ;;  %v8874_v33 = vld [vmem:[%s12216_s3 + $0x1f8] sm:$0xff] }
 0x2b8   :  { %8390 = vmatpush3.msra.mxu1 %v5144_v62  ;;  %8354 = vmatprep.subr.mxu0 %v8969_v48  ;;  %v8886_v62 = vld [vmem:[%s12216_s3 + $0x198] sm:$0xff] }
 0x2b9   :  { %8391 = vmatprep.subr.mxu1 %v8969_v48  ;;  %8355 = vmatpush3.msra.mxu0 %v10989_v21  ;;  %v8876_v21 = vld [vmem:[%s12216_s3 + $0x1e8] sm:$0xff] }
 0x2ba   :  { %8392 = vmatpush3.msra.mxu1 %v5143_v53  ;;  %8356 = vmatprep.subr.mxu0 %v8969_v48  ;;  %v12272_v53 = vld [vmem:[#allocation19_spill] sm:$0xff] }
 0x2bb   :  { %8393 = vmatprep.subr.mxu1 %v8969_v48  ;;  %8357 = vmatpush3.msra.mxu0 %v11003_v11  ;;  %v12260_v11 = vrot.slane %v10362_v63, 4 }
 0x2bc   :  { %8394 = vmatpush3.msra.mxu1 %v5142_v55  ;;  %8395 = vmatprep.mubr.msk.f32.mxu1 %vm8970_vm1, %v8969_v48 }
 0x2bd   :  { %8358 = vmatprep.subr.mxu0 %v8969_v48  ;;  %8396 = vmatmul.mubr.f32.vlgmr.msra.gmra.mxu1 %v10383_v59  ;;  %v8875_v59 = vld [vmem:[%s12216_s3 + $0x1f0] sm:$0xff] }
 0x2be   :  { %8433 = vmatprep.subr.mxu1 %v8969_v48  ;;  %8359 = vmatpush3.msra.mxu0 %v11017_v17  ;;  %v12261_v17 = vld [vmem:[#allocation8_spill] sm:$0xff] }
 0x2bf   :  { %8360 = vmatprep.mubr.msk.f32.mxu0 %vm8970_vm1, %v8969_v48  ;;  %8434 = vmatpush3.msra.mxu1 %v8874_v33  ;;  %v8887_v33 = vld [vmem:[%s12216_s3 + $0x190] sm:$0xff] }
 0x2c0   :  { %8361 = vmatmul.mubr.f32.vlgmr.msra.gmra.mxu0 %v12260_v11  ;;  %8398 = vmatprep.subr.mxu0 %v8969_v48  ;;  %v8889_v11 = vld [vmem:[%s12216_s3 + $0x180] sm:$0xff] }
 0x2c1   :  { %8435 = vmatprep.subr.mxu1 %v8969_v48  ;;  %8399 = vmatpush3.msra.mxu0 %v10812_v12  ;;  %v12262_v12 = vld [vmem:[#allocation9_spill] sm:$0xff] }
 0x2c2   :  { %8436 = vmatpush3.msra.mxu1 %v8875_v59  ;;  %8400 = vmatprep.subr.mxu0 %v8969_v48  ;;  %v12274_v59 = vrot.slane %v10362_v63, 6  ;;  %v8893_v63 = vld [vmem:[%s12216_s3 + $0x270] sm:$0xff] }
 0x2c3   :  { %8437 = vmatprep.subr.mxu1 %v8969_v48  ;;  %8401 = vmatpush3.msra.mxu0 %v12261_v17  ;;  %v8891_v17 = vld [vmem:[%s12216_s3 + $0x278] sm:$0xff] }
 0x2c4   :  { %8438 = vmatpush3.msra.mxu1 %v8876_v21  ;;  %8402 = vmatprep.subr.mxu0 %v8969_v48  ;;  %v8894_v21 = vld [vmem:[%s12216_s3 + $0x2e8] sm:$0xff] }
 0x2c5   :  { %8439 = vmatprep.subr.mxu1 %v8969_v48  ;;  %8403 = vmatpush3.msra.mxu0 %v12262_v12  ;;  %v8895_v12 = vld [vmem:[%s12216_s3 + $0x268] sm:$0xff] }
 0x2c6   :  { %8440 = vmatpush3.msra.mxu1 %v8877_v16  ;;  %8404 = vmatprep.subr.mxu0 %v8969_v48  ;;  %v8896_v16 = vld [vmem:[%s12216_s3 + $0x2e0] sm:$0xff] }
 0x2c7   :  { %8441 = vmatprep.subr.mxu1 %v8969_v48  ;;  %8405 = vmatpush3.msra.mxu0 %v12263_v38  ;;  %v8897_v38 = vld [vmem:[%s12216_s3 + $0x260] sm:$0xff] }
 0x2c8   :  { %8442 = vmatpush3.msra.mxu1 %v8878_v2  ;;  %8406 = vmatprep.subr.mxu0 %v8969_v48  ;;  %v8898_v2 = vld [vmem:[%s12216_s3 + $0x2d8] sm:$0xff] }
 0x2c9   :  { %8443 = vmatprep.subr.mxu1 %v8969_v48  ;;  %8407 = vmatpush3.msra.mxu0 %v12264_v19  ;;  %v8899_v19 = vld [vmem:[%s12216_s3 + $0x258] sm:$0xff] }
 0x2ca   :  { %8444 = vmatpush3.msra.mxu1 %v8879_v40  ;;  %8408 = vmatprep.subr.mxu0 %v8969_v48  ;;  %v8900_v40 = vld [vmem:[%s12216_s3 + $0x2d0] sm:$0xff] }
 0x2cb   :  { %8445 = vmatprep.subr.mxu1 %v8969_v48  ;;  %8409 = vmatpush3.msra.mxu0 %v12265_v14  ;;  %v8901_v14 = vld [vmem:[%s12216_s3 + $0x250] sm:$0xff] }
 0x2cc   :  { %8446 = vmatpush3.msra.mxu1 %v8880_v58  ;;  %8410 = vmatprep.subr.mxu0 %v8969_v48  ;;  %v8902_v58 = vld [vmem:[%s12216_s3 + $0x2c8] sm:$0xff] }
 0x2cd   :  { %8447 = vmatprep.subr.mxu1 %v8969_v48  ;;  %8411 = vmatpush3.msra.mxu0 %v12266_v39  ;;  %v8903_v39 = vld [vmem:[%s12216_s3 + $0x248] sm:$0xff] }
 0x2ce   :  { %8448 = vmatpush3.msra.mxu1 %v8881_v6  ;;  %8412 = vmatprep.subr.mxu0 %v8969_v48  ;;  %v8904_v6 = vld [vmem:[%s12216_s3 + $0x2c0] sm:$0xff] }
 0x2cf   :  { %8449 = vmatprep.subr.mxu1 %v8969_v48  ;;  %8413 = vmatpush3.msra.mxu0 %v12267_v52  ;;  %v8905_v52 = vld [vmem:[%s12216_s3 + $0x240] sm:$0xff] }
 0x2d0   :  { %8450 = vmatpush3.msra.mxu1 %v8882_v50  ;;  %8414 = vmatprep.subr.mxu0 %v8969_v48  ;;  %v8906_v50 = vld [vmem:[%s12216_s3 + $0x2b8] sm:$0xff] }
 0x2d1   :  { %8451 = vmatprep.subr.mxu1 %v8969_v48  ;;  %8415 = vmatpush3.msra.mxu0 %v12268_v22  ;;  %v8907_v22 = vld [vmem:[%s12216_s3 + $0x238] sm:$0xff] }
 0x2d2   :  { %8452 = vmatpush3.msra.mxu1 %v8883_v24  ;;  %8416 = vmatprep.subr.mxu0 %v8969_v48  ;;  %v8908_v24 = vld [vmem:[%s12216_s3 + $0x2b0] sm:$0xff] }
 0x2d3   :  { %8453 = vmatprep.subr.mxu1 %v8969_v48  ;;  %8417 = vmatpush3.msra.mxu0 %v12269_v31  ;;  %v4525_v61 = vpop.f32.mrf.mxu1  ;;  %v8909_v31 = vld [vmem:[%s12216_s3 + $0x230] sm:$0xff] }
 0x2d4   :  { %8454 = vmatpush3.msra.mxu1 %v8884_v15  ;;  %8418 = vmatprep.subr.mxu0 %v8969_v48  ;;  %v8910_v15 = vld [vmem:[%s12216_s3 + $0x2a8] sm:$0xff] }
 0x2d5   :  { %8455 = vmatprep.subr.mxu1 %v8969_v48  ;;  %8419 = vmatpush3.msra.mxu0 %v12270_v25  ;;  %v8047_v0 = vpop.f32.mrf.mxu1 }
 0x2d6   :  { %8456 = vmatpush3.msra.mxu1 %v8885_v47  ;;  %8420 = vmatprep.subr.mxu0 %v8969_v48  ;;  %v4437_v37 = vpop.f32.mrf.mxu0  ;;  %v8911_v0 = vld [vmem:[%s12216_s3 + $0x2a0] sm:$0xff] }
 0x2d7   :  { %8457 = vmatprep.subr.mxu1 %v8969_v48  ;;  %8421 = vmatpush3.msra.mxu0 %v12271_v4  ;;  %v4441_v10 = vadd.f32 %v4437_v37, %v11380_v35  ;;  %v8888_v35 = vld [vmem:[%s12216_s3 + $0x188] sm:$0xff]  ;;  %v8912_v4 = vld [vmem:[%s12216_s3 + $0x298] sm:$0xff] }
 0x2d8   :  { %8458 = vmatpush3.msra.mxu1 %v8886_v62  ;;  %8422 = vmatprep.subr.mxu0 %v8969_v48  ;;  %v8012_v28 = vpop.f32.mrf.mxu0  ;;  %v8914_v62 = vld [vmem:[%s12216_s3 + $0x288] sm:$0xff] }
 0x2d9   :  { %8459 = vmatprep.subr.mxu1 %v8969_v48  ;;  %8423 = vmatpush3.msra.mxu0 %v12272_v53  ;;  %v11486_v55 = vadd.f32 %v4525_v61, %v4441_v10  ;;  %v8915_v28 = vld [vmem:[%s12216_s3 + $0x280] sm:$0xff]  ;;  %v8927_v53 = vld [vmem:[%s12216_s3 + $0x330] sm:$0xff] }
 0x2da   :  { %8460 = vmatpush3.msra.mxu1 %v8887_v33  ;;  %8424 = vmatprep.subr.mxu0 %v8969_v48  ;;  %v8928_v33 = vld [vmem:[%s12216_s3 + $0x3a8] sm:$0xff] }
 0x2db   :  { %8461 = vmatprep.subr.mxu1 %v8969_v48  ;;  %8425 = vmatpush3.msra.mxu0 %v10996_v27  ;;  %v12273_v27 = vrot.slane %v12257_v5, 2 }
 0x2dc   :  { %8462 = vmatpush3.msra.mxu1 %v8888_v35  ;;  %8426 = vmatprep.subr.mxu0 %v8969_v48  ;;  %v8929_v35 = vld [vmem:[%s12216_s3 + $0x328] sm:$0xff] }
 0x2dd   :  { %8463 = vmatprep.subr.mxu1 %v8969_v48  ;;  %8427 = vmatpush3.msra.mxu0 %v11010_v43  ;;  %v8890_v43 = vld [vmem:[%s12216_s3 + $0x2f8] sm:$0xff] }
 0x2de   :  { %8464 = vmatpush3.msra.mxu1 %v8889_v11  ;;  %8465 = vmatprep.mubr.msk.f32.mxu1 %vm8970_vm1, %v8969_v48 }
 0x2df   :  { %8428 = vmatprep.subr.mxu0 %v8969_v48  ;;  %8466 = vmatmul.mubr.f32.vlgmr.msra.gmra.mxu1 %v12273_v27  ;;  %v8930_v27 = vld [vmem:[%s12216_s3 + $0x3a0] sm:$0xff] }
 0x2e0   :  { %8503 = vmatprep.subr.mxu1 %v8969_v48  ;;  %8429 = vmatpush3.msra.mxu0 %v11026_v30  ;;  %v8892_v30 = vld [vmem:[%s12216_s3 + $0x2f0] sm:$0xff] }
 0x2e1   :  { %8430 = vmatprep.mubr.msk.f32.mxu0 %vm8970_vm1, %v8969_v48  ;;  %8504 = vmatpush3.msra.mxu1 %v8890_v43 }
 0x2e2   :  { %8431 = vmatmul.mubr.f32.vlgmr.msra.gmra.mxu0 %v12274_v59  ;;  %8468 = vmatprep.subr.mxu0 %v8969_v48  ;;  %v8931_v59 = vld [vmem:[%s12216_s3 + $0x320] sm:$0xff] }
 0x2e3   :  { %8505 = vmatprep.subr.mxu1 %v8969_v48  ;;  %8469 = vmatpush3.msra.mxu0 %v8891_v17 }
 0x2e4   :  { %8506 = vmatpush3.msra.mxu1 %v8892_v30  ;;  %8470 = vmatprep.subr.mxu0 %v8969_v48  ;;  %v8932_v30 = vld [vmem:[%s12216_s3 + $0x398] sm:$0xff] }
 0x2e5   :  { %8507 = vmatprep.subr.mxu1 %v8969_v48  ;;  %8471 = vmatpush3.msra.mxu0 %v8893_v63 }
 0x2e6   :  { %8508 = vmatpush3.msra.mxu1 %v8894_v21  ;;  %8472 = vmatprep.subr.mxu0 %v8969_v48  ;;  %v8933_v21 = vld [vmem:[%s12216_s3 + $0x318] sm:$0xff] }
 0x2e7   :  { %8509 = vmatprep.subr.mxu1 %v8969_v48  ;;  %8473 = vmatpush3.msra.mxu0 %v8895_v12  ;;  %v8934_v12 = vld [vmem:[%s12216_s3 + $0x390] sm:$0xff] }
 0x2e8   :  { %8510 = vmatpush3.msra.mxu1 %v8896_v16  ;;  %8474 = vmatprep.subr.mxu0 %v8969_v48  ;;  %v8935_v16 = vld [vmem:[%s12216_s3 + $0x310] sm:$0xff] }
 0x2e9   :  { %8511 = vmatprep.subr.mxu1 %v8969_v48  ;;  %8475 = vmatpush3.msra.mxu0 %v8897_v38  ;;  %v8936_v38 = vld [vmem:[%s12216_s3 + $0x388] sm:$0xff] }
 0x2ea   :  { %8512 = vmatpush3.msra.mxu1 %v8898_v2  ;;  %8476 = vmatprep.subr.mxu0 %v8969_v48  ;;  %v8937_v2 = vld [vmem:[%s12216_s3 + $0x308] sm:$0xff] }
 0x2eb   :  { %8513 = vmatprep.subr.mxu1 %v8969_v48  ;;  %8477 = vmatpush3.msra.mxu0 %v8899_v19  ;;  %v5657_v19 = vrot.slane %v12259_v26, 4 }
 0x2ec   :  { %8514 = vmatpush3.msra.mxu1 %v8900_v40  ;;  %8478 = vmatprep.subr.mxu0 %v8969_v48  ;;  %v8938_v40 = vld [vmem:[%s12216_s3 + $0x380] sm:$0xff] }
 0x2ed   :  { %8515 = vmatprep.subr.mxu1 %v8969_v48  ;;  %8479 = vmatpush3.msra.mxu0 %v8901_v14  ;;  %v8939_v14 = vld [vmem:[%s12216_s3 + $0x300] sm:$0xff] }
 0x2ee   :  { %8516 = vmatpush3.msra.mxu1 %v8902_v58  ;;  %8480 = vmatprep.subr.mxu0 %v8969_v48 }
 0x2ef   :  { %8517 = vmatprep.subr.mxu1 %v8969_v48  ;;  %8481 = vmatpush3.msra.mxu0 %v8903_v39 }
 0x2f0   :  { %8518 = vmatpush3.msra.mxu1 %v8904_v6  ;;  %8482 = vmatprep.subr.mxu0 %v8969_v48  ;;  %v8944_v6 = vld [vmem:[%s12216_s3 + $0x410] sm:$0xff] }
 0x2f1   :  { %8519 = vmatprep.subr.mxu1 %v8969_v48  ;;  %8483 = vmatpush3.msra.mxu0 %v8905_v52  ;;  %v8945_v52 = vld [vmem:[%s12216_s3 + $0x408] sm:$0xff] }
 0x2f2   :  { %8520 = vmatpush3.msra.mxu1 %v8906_v50  ;;  %8484 = vmatprep.subr.mxu0 %v8969_v48  ;;  %v5730_v50 = vrot.slane %v12259_v26, 6 }
 0x2f3   :  { %8521 = vmatprep.subr.mxu1 %v8969_v48  ;;  %8485 = vmatpush3.msra.mxu0 %v8907_v22  ;;  %v8946_v22 = vld [vmem:[%s12216_s3 + $0x400] sm:$0xff] }
 0x2f4   :  { %8522 = vmatpush3.msra.mxu1 %v8908_v24  ;;  %8486 = vmatprep.subr.mxu0 %v8969_v48 }
 0x2f5   :  { %8523 = vmatprep.subr.mxu1 %v8969_v48  ;;  %8487 = vmatpush3.msra.mxu0 %v8909_v31  ;;  %v4671_v61 = vpop.f32.mrf.mxu1 }
 0x2f6   :  { %8524 = vmatpush3.msra.mxu1 %v8910_v15  ;;  %8488 = vmatprep.subr.mxu0 %v8969_v48 }
 0x2f7   :  { %8525 = vmatprep.subr.mxu1 %v8969_v48  ;;  %8489 = vmatpush3.msra.mxu0 %v11084_v13  ;;  %v8117_v25 = vpop.f32.mrf.mxu1 }
 0x2f8   :  { %8526 = vmatpush3.msra.mxu1 %v8911_v0  ;;  %8490 = vmatprep.subr.mxu0 %v8969_v48  ;;  %v4598_v47 = vpop.f32.mrf.mxu0 }
 0x2f9   :  { %8527 = vmatprep.subr.mxu1 %v8969_v48  ;;  %8491 = vmatpush3.msra.mxu0 %v11093_v18  ;;  %v4602_v37 = vadd.f32 %v4598_v47, %v11486_v55  ;;  %v8913_v18 = vld [vmem:[%s12216_s3 + $0x290] sm:$0xff] }
 0x2fa   :  { %8528 = vmatpush3.msra.mxu1 %v8912_v4  ;;  %8492 = vmatprep.subr.mxu0 %v8969_v48  ;;  %v8082_v13 = vpop.f32.mrf.mxu0 }
 0x2fb   :  { %8529 = vmatprep.subr.mxu1 %v8969_v48  ;;  %8493 = vmatpush3.msra.mxu0 %v11104_v56  ;;  %v11613_v10 = vadd.f32 %v4671_v61, %v4602_v37  ;;  %v5513_v56 = vrot.slane %v12257_v5, 6 }
 0x2fc   :  { %8530 = vmatpush3.msra.mxu1 %v8913_v18  ;;  %8494 = vmatprep.subr.mxu0 %v8969_v48 }
 0x2fd   :  { %8531 = vmatprep.subr.mxu1 %v8969_v48  ;;  %8495 = vmatpush3.msra.mxu0 %v11113_v34  ;;  %v5440_v34 = vrot.slane %v12257_v5, 4  ;;  %v8917_v5 = vld [vmem:[%s12216_s3 + $0x370] sm:$0xff] }
 0x2fe   :  { %8532 = vmatpush3.msra.mxu1 %v8914_v62  ;;  %8496 = vmatprep.subr.mxu0 %v8969_v48 }
 0x2ff   :  { %8533 = vmatprep.subr.mxu1 %v8969_v48  ;;  %8497 = vmatpush3.msra.mxu0 %v11122_v1  ;;  %v8916_v1 = vld [vmem:[%s12216_s3 + $0x378] sm:$0xff] }
 0x300   :  { %8534 = vmatpush3.msra.mxu1 %v8915_v28  ;;  %8535 = vmatprep.mubr.msk.f32.mxu1 %vm8970_vm1, %v8969_v48 }
 0x301   :  { %8498 = vmatprep.subr.mxu0 %v8969_v48  ;;  %8536 = vmatmul.mubr.f32.vlgmr.msra.gmra.mxu1 %v5513_v56 }
 0x302   :  { %8573 = vmatprep.subr.mxu1 %v8969_v48  ;;  %8499 = vmatpush3.msra.mxu0 %v11136_v57  ;;  %v8918_v57 = vld [vmem:[%s12216_s3 + $0x368] sm:$0xff] }
 0x303   :  { %8500 = vmatprep.mubr.msk.f32.mxu0 %vm8970_vm1, %v8969_v48  ;;  %8574 = vmatpush3.msra.mxu1 %v11153_v7  ;;  %v8919_v7 = vld [vmem:[%s12216_s3 + $0x360] sm:$0xff] }
 0x304   :  { %8501 = vmatmul.mubr.f32.vlgmr.msra.gmra.mxu0 %v5440_v34  ;;  %8538 = vmatprep.subr.mxu0 %v8969_v48 }
 0x305   :  { %8575 = vmatprep.subr.mxu1 %v8969_v48  ;;  %8539 = vmatpush3.msra.mxu0 %v8916_v1 }
 0x306   :  { %8576 = vmatpush3.msra.mxu1 %v11167_v49  ;;  %8540 = vmatprep.subr.mxu0 %v8969_v48  ;;  %v8920_v49 = vld [vmem:[%s12216_s3 + $0x358] sm:$0xff] }
 0x307   :  { %8577 = vmatprep.subr.mxu1 %v8969_v48  ;;  %8541 = vmatpush3.msra.mxu0 %v8917_v5  ;;  %v6755_v5 = vld [vmem:[%s12218_s5 + $0xf8] sm:$0xff] }
 0x308   :  { %8578 = vmatpush3.msra.mxu1 %v11181_v45  ;;  %8542 = vmatprep.subr.mxu0 %v8969_v48  ;;  %v8921_v45 = vld [vmem:[%s12216_s3 + $0x350] sm:$0xff] }
 0x309   :  { %8579 = vmatprep.subr.mxu1 %v8969_v48  ;;  %8543 = vmatpush3.msra.mxu0 %v8918_v57  ;;  %v5911_v57 = vld [vmem:[%s12218_s5 + $0x78] sm:$0xff] }
 0x30a   :  { %8580 = vmatpush3.msra.mxu1 %v11195_v20  ;;  %8544 = vmatprep.subr.mxu0 %v8969_v48  ;;  %v8922_v20 = vld [vmem:[%s12216_s3 + $0x348] sm:$0xff] }
 0x30b   :  { %8581 = vmatprep.subr.mxu1 %v8969_v48  ;;  %8545 = vmatpush3.msra.mxu0 %v8919_v7  ;;  %v6754_v7 = vld [vmem:[%s12218_s5 + $0xf0] sm:$0xff] }
 0x30c   :  { %8582 = vmatpush3.msra.mxu1 %v11209_v44  ;;  %8546 = vmatprep.subr.mxu0 %v8969_v48  ;;  %v8923_v44 = vld [vmem:[%s12216_s3 + $0x340] sm:$0xff] }
 0x30d   :  { %8583 = vmatprep.subr.mxu1 %v8969_v48  ;;  %8547 = vmatpush3.msra.mxu0 %v8920_v49  ;;  %v5910_v49 = vld [vmem:[%s12218_s5 + $0x70] sm:$0xff] }
 0x30e   :  { %8584 = vmatpush3.msra.mxu1 %v11223_v32  ;;  %8548 = vmatprep.subr.mxu0 %v8969_v48  ;;  %v8924_v32 = vld [vmem:[%s12216_s3 + $0x3b8] sm:$0xff] }
 0x30f   :  { %8585 = vmatprep.subr.mxu1 %v8969_v48  ;;  %8549 = vmatpush3.msra.mxu0 %v8921_v45  ;;  %v6753_v45 = vld [vmem:[%s12218_s5 + $0xe8] sm:$0xff] }
 0x310   :  { %8586 = vmatpush3.msra.mxu1 %v11237_v8  ;;  %8550 = vmatprep.subr.mxu0 %v8969_v48  ;;  %v8925_v8 = vld [vmem:[%s12216_s3 + $0x338] sm:$0xff] }
 0x311   :  { %8587 = vmatprep.subr.mxu1 %v8969_v48  ;;  %8551 = vmatpush3.msra.mxu0 %v8922_v20  ;;  %v5909_v20 = vld [vmem:[%s12218_s5 + $0x68] sm:$0xff] }
 0x312   :  { %8588 = vmatpush3.msra.mxu1 %v11251_v46  ;;  %8552 = vmatprep.subr.mxu0 %v8969_v48  ;;  %v8926_v46 = vld [vmem:[%s12216_s3 + $0x3b0] sm:$0xff] }
 0x313   :  { %8589 = vmatprep.subr.mxu1 %v8969_v48  ;;  %8553 = vmatpush3.msra.mxu0 %v8923_v44  ;;  %v6752_v44 = vld [vmem:[%s12218_s5 + $0xe0] sm:$0xff] }
 0x314   :  { %8590 = vmatpush3.msra.mxu1 %v8924_v32  ;;  %8554 = vmatprep.subr.mxu0 %v8969_v48  ;;  %v5908_v32 = vld [vmem:[%s12218_s5 + $0x60] sm:$0xff] }
 0x315   :  { %8591 = vmatprep.subr.mxu1 %v8969_v48  ;;  %8555 = vmatpush3.msra.mxu0 %v8925_v8  ;;  %v6751_v8 = vld [vmem:[%s12218_s5 + $0xd8] sm:$0xff] }
 0x316   :  { %8592 = vmatpush3.msra.mxu1 %v8926_v46  ;;  %8556 = vmatprep.subr.mxu0 %v8969_v48  ;;  %v5907_v46 = vld [vmem:[%s12218_s5 + $0x58] sm:$0xff] }
 0x317   :  { %8593 = vmatprep.subr.mxu1 %v8969_v48  ;;  %8557 = vmatpush3.msra.mxu0 %v8927_v53  ;;  %v4847_v55 = vpop.f32.mrf.mxu1  ;;  %v6750_v53 = vld [vmem:[%s12218_s5 + $0xd0] sm:$0xff] }
 0x318   :  { %8594 = vmatpush3.msra.mxu1 %v8928_v33  ;;  %8558 = vmatprep.subr.mxu0 %v8969_v48  ;;  %v6749_v33 = vld [vmem:[%s12218_s5 + $0xc8] sm:$0xff] }
 0x319   :  { %8595 = vmatprep.subr.mxu1 %v8969_v48  ;;  %8559 = vmatpush3.msra.mxu0 %v8929_v35  ;;  %v8187_v11 = vpop.f32.mrf.mxu1  ;;  %v5905_v35 = vld [vmem:[%s12218_s5 + $0x48] sm:$0xff] }
 0x31a   :  { %8596 = vmatpush3.msra.mxu1 %v8930_v27  ;;  %8560 = vmatprep.subr.mxu0 %v8969_v48  ;;  %v4777_v43 = vpop.f32.mrf.mxu0  ;;  %v6748_v11 = vld [vmem:[%s12218_s5 + $0xc0] sm:$0xff] }
 0x31b   :  { %8597 = vmatprep.subr.mxu1 %v8969_v48  ;;  %8561 = vmatpush3.msra.mxu0 %v8931_v59  ;;  %v11719_v17 = vadd.f32 %v4847_v55, %v4777_v43  ;;  %v5906_v55 = vld [vmem:[%s12218_s5 + $0x50] sm:$0xff]  ;;  %v5904_v27 = vld [vmem:[%s12218_s5 + $0x40] sm:$0xff]  ;;  %v6747_v43 = vld [vmem:[%s12218_s5 + $0xb8] sm:$0xff] }
 0x31c   :  { %8598 = vmatpush3.msra.mxu1 %v8932_v30  ;;  %8562 = vmatprep.subr.mxu0 %v8969_v48  ;;  %v8152_v63 = vpop.f32.mrf.mxu0  ;;  %v5903_v59 = vld [vmem:[%s12218_s5 + $0x38] sm:$0xff]  ;;  %v6746_v30 = vld [vmem:[%s12218_s5 + $0xb0] sm:$0xff] }
 0x31d   :  { %8599 = vmatprep.subr.mxu1 %v8969_v48  ;;  %8563 = vmatpush3.msra.mxu0 %v8933_v21  ;;  %v5902_v63 = vld [vmem:[%s12218_s5 + $0x30] sm:$0xff] }
 0x31e   :  { %8600 = vmatpush3.msra.mxu1 %v8934_v12  ;;  %8564 = vmatprep.subr.mxu0 %v8969_v48  ;;  %v6745_v12 = vld [vmem:[%s12218_s5 + $0xa8] sm:$0xff] }
 0x31f   :  { %8601 = vmatprep.subr.mxu1 %v8969_v48  ;;  %8565 = vmatpush3.msra.mxu0 %v8935_v16  ;;  %v5901_v16 = vld [vmem:[%s12218_s5 + $0x28] sm:$0xff] }
 0x320   :  { %8602 = vmatpush3.msra.mxu1 %v8936_v38  ;;  %8566 = vmatprep.subr.mxu0 %v8969_v48 }
 0x321   :  { %8603 = vmatprep.subr.mxu1 %v8969_v48  ;;  %8567 = vmatpush3.msra.mxu0 %v8937_v2  ;;  %v6744_v2 = vld [vmem:[%s12218_s5 + $0xa0] sm:$0xff] }
 0x322   :  { %8604 = vmatpush3.msra.mxu1 %v8938_v40  ;;  %8605 = vmatprep.mubr.msk.f32.mxu1 %vm8970_vm1, %v8969_v48 }
 0x323   :  { %8568 = vmatprep.subr.mxu0 %v8969_v48  ;;  %8606 = vmatmul.mubr.f32.vlgmr.msra.gmra.mxu1 %v5657_v19  ;;  %v5900_v19 = vld [vmem:[%s12218_s5 + $0x20] sm:$0xff] }
 0x324   :  { %8569 = vmatpush3.msra.mxu0 %v8939_v14  ;;  %8570 = vmatprep.mubr.msk.f32.mxu0 %vm8970_vm1, %v8969_v48  ;;  %v6743_v14 = vld [vmem:[%s12218_s5 + $0x98] sm:$0xff] }
 0x325   :  { %8571 = vmatmul.mubr.f32.vlgmr.msra.gmra.mxu0 %v5068_v41  ;;  %8608 = vmatprep.subr.mxu0 %v8969_v48  ;;  %v8943_v41 = vld [vmem:[%s12216_s3 + $0x418] sm:$0xff] }
 0x326   :  { %8609 = vmatpush3.msra.mxu0 %v11144_v29  ;;  %8640 = vmatprep.mubr.msk.f32.mxu0 %vm8970_vm1, %v8969_v48  ;;  %v12275_v29 = vld [vmem:[#allocation6_spill] sm:$0xff] }
 0x327   :  { %8610 = vmatprep.subr.mxu0 %v8969_v48  ;;  %8643 = vmatprep.subr.mxu1 %v8969_v48 }
 0x328   :  { %8611 = vmatpush3.msra.mxu0 %v11159_v9  ;;  %8675 = vmatprep.mubr.msk.f32.mxu1 %vm8970_vm1, %v8969_v48  ;;  %v8940_v9 = vld [vmem:[%s12216_s3 + $0x430] sm:$0xff] }
 0x329   :  { %8612 = vmatprep.subr.mxu0 %v8969_v48  ;;  %8644 = vmatpush3.msra.mxu1 %v6755_v5 }
 0x32a   :  { %8613 = vmatpush3.msra.mxu0 %v11173_v51  ;;  %8645 = vmatprep.subr.mxu1 %v8969_v48 }
 0x32b   :  { %8614 = vmatprep.subr.mxu0 %v8969_v48  ;;  %8646 = vmatpush3.msra.mxu1 %v6754_v7 }
 0x32c   :  { %8615 = vmatpush3.msra.mxu0 %v11187_v36  ;;  %v8941_v36 = vld [vmem:[%s12216_s3 + $0x428] sm:$0xff]  ;;  %8647 = vmatprep.subr.mxu1 %v8969_v48 }
 0x32d   :  { %8616 = vmatprep.subr.mxu0 %v8969_v48  ;;  %8648 = vmatpush3.msra.mxu1 %v6753_v45 }
 0x32e   :  { %8617 = vmatpush3.msra.mxu0 %v11201_v3  ;;  %8649 = vmatprep.subr.mxu1 %v8969_v48 }
 0x32f   :  { %8618 = vmatprep.subr.mxu0 %v8969_v48  ;;  %8650 = vmatpush3.msra.mxu1 %v6752_v44 }
 0x330   :  { %8619 = vmatpush3.msra.mxu0 %v11215_v60  ;;  %v8942_v60 = vld [vmem:[%s12216_s3 + $0x420] sm:$0xff]  ;;  %8651 = vmatprep.subr.mxu1 %v8969_v48 }
 0x331   :  { %8620 = vmatprep.subr.mxu0 %v8969_v48  ;;  %8652 = vmatpush3.msra.mxu1 %v6751_v8 }
 0x332   :  { %8621 = vmatpush3.msra.mxu0 %v11229_v42  ;;  %8653 = vmatprep.subr.mxu1 %v8969_v48 }
 0x333   :  { %8622 = vmatprep.subr.mxu0 %v8969_v48  ;;  %8654 = vmatpush3.msra.mxu1 %v6750_v53 }
 0x334   :  { %8623 = vmatpush3.msra.mxu0 %v11243_v54  ;;  %8655 = vmatprep.subr.mxu1 %v8969_v48 }
 0x335   :  { %8624 = vmatprep.subr.mxu0 %v8969_v48  ;;  %8656 = vmatpush3.msra.mxu1 %v6749_v33 }
 0x336   :  { %8625 = vmatpush3.msra.mxu0 %v12275_v29  ;;  %8657 = vmatprep.subr.mxu1 %v8969_v48  ;;  %v5899_v29 = vld [vmem:[%s12218_s5 + $0x18] sm:$0xff] }
 0x337   :  { %8626 = vmatprep.subr.mxu0 %v8969_v48  ;;  %8658 = vmatpush3.msra.mxu1 %v6748_v11 }
 0x338   :  { %8627 = vmatpush3.msra.mxu0 %v8940_v9  ;;  %8659 = vmatprep.subr.mxu1 %v8969_v48  ;;  %v6742_v9 = vld [vmem:[%s12218_s5 + $0x90] sm:$0xff] }
 0x339   :  { %8628 = vmatprep.subr.mxu0 %v8969_v48  ;;  %v4991_v51 = vpop.f32.mrf.mxu1  ;;  %8660 = vmatpush3.msra.mxu1 %v6747_v43 }
 0x33a   :  { %8629 = vmatpush3.msra.mxu0 %v8941_v36  ;;  %8661 = vmatprep.subr.mxu1 %v8969_v48  ;;  %v6741_v36 = vld [vmem:[%s12218_s5 + $0x88] sm:$0xff] }
 0x33b   :  { %8630 = vmatprep.subr.mxu0 %v8969_v48  ;;  %v8257_v3 = vpop.f32.mrf.mxu1  ;;  %8662 = vmatpush3.msra.mxu1 %v6746_v30 }
 0x33c   :  { %8631 = vmatpush3.msra.mxu0 %v8942_v60  ;;  %v4917_v42 = vpop.f32.mrf.mxu0  ;;  %8663 = vmatprep.subr.mxu1 %v8969_v48  ;;  %v5897_v3 = vld [vmem:[%s12218_s5 + $0x8] sm:$0xff]  ;;  %v6740_v60 = vld [vmem:[%s12218_s5 + $0x80] sm:$0xff] }
 0x33d   :  { %8632 = vmatprep.subr.mxu0 %v8969_v48  ;;  %v4921_v54 = vadd.f32 %v4917_v42, %v11719_v17  ;;  %8664 = vmatpush3.msra.mxu1 %v6745_v12  ;;  %v5896_v42 = vld [vmem:[%s12218_s5] sm:$0xff] }
 0x33e   :  { %8633 = vmatpush3.msra.mxu0 %v8943_v41  ;;  %v8222_v58 = vpop.f32.mrf.mxu0  ;;  %8665 = vmatprep.subr.mxu1 %v8969_v48 }
 0x33f   :  { %8634 = vmatprep.subr.mxu0 %v8969_v48  ;;  %v4995_v39 = vadd.f32 %v4991_v51, %v4921_v54  ;;  %8666 = vmatpush3.msra.mxu1 %v6744_v2  ;;  %v5898_v51 = vld [vmem:[%s12218_s5 + $0x10] sm:$0xff] }
 0x340   :  { %8635 = vmatpush3.msra.mxu0 %v8944_v6  ;;  %8667 = vmatprep.subr.mxu1 %v8969_v48  ;;  %v6675_v6 = vld [vmem:[%s12217_s4] ss:$0 sm:$0xff] }
 0x341   :  { %8636 = vmatprep.subr.mxu0 %v8969_v48  ;;  %8668 = vmatpush3.msra.mxu1 %v6743_v14 }
 0x342   :  { %8637 = vmatpush3.msra.mxu0 %v8945_v52  ;;  %8669 = vmatprep.subr.mxu1 %v8969_v48  ;;  %v11953_v52 = vadd.f32 %v6675_v6, %v11613_v10 }
 0x343   :  { %8638 = vmatprep.subr.mxu0 %v8969_v48  ;;  %8670 = vmatpush3.msra.mxu1 %v6742_v9 }
 0x344   :  { %8639 = vmatpush3.msra.mxu0 %v8946_v22  ;;  %8671 = vmatprep.subr.mxu1 %v8969_v48 }
 0x345   :  { %8641 = vmatmul.mubr.f32.vlgmr.msra.gmra.mxu0 %v5730_v50  ;;  %8678 = vmatprep.subr.mxu0 %v8969_v48  ;;  %v11956_v50 = vadd.f32 %v6675_v6, %v11280_v23 }
 0x346   :  { %8710 = vmatprep.mubr.msk.f32.mxu0 %vm8970_vm1, %v8969_v48  ;;  %8679 = vmatpush3.msra.mxu0 %v5911_v57 }
 0x347   :  { %8680 = vmatprep.subr.mxu0 %v8969_v48  ;;  %8672 = vmatpush3.msra.mxu1 %v6741_v36 }
 0x348   :  { %8681 = vmatpush3.msra.mxu0 %v5910_v49  ;;  %8673 = vmatprep.subr.mxu1 %v8969_v48 }
 0x349   :  { %8682 = vmatprep.subr.mxu0 %v8969_v48  ;;  %8674 = vmatpush3.msra.mxu1 %v6740_v60 }
 0x34a   :  { %8683 = vmatpush3.msra.mxu0 %v5909_v20  ;;  %8713 = vmatprep.subr.mxu1 %v8969_v48 }
 0x34b   :  { %8684 = vmatprep.subr.mxu0 %v8969_v48 }
 0x34c   :  { %8685 = vmatpush3.msra.mxu0 %v5908_v32 }
 0x34d   :  { %8686 = vmatprep.subr.mxu0 %v8969_v48 }
 0x34e   :  { %8687 = vmatpush3.msra.mxu0 %v5907_v46 }
 0x34f   :  { %8688 = vmatprep.subr.mxu0 %v8969_v48 }
 0x350   :  { %8689 = vmatpush3.msra.mxu0 %v5906_v55 }
 0x351   :  { %8690 = vmatprep.subr.mxu0 %v8969_v48 }
 0x352   :  { %8691 = vmatpush3.msra.mxu0 %v5905_v35 }
 0x353   :  { %8692 = vmatprep.subr.mxu0 %v8969_v48 }
 0x354   :  { %8693 = vmatpush3.msra.mxu0 %v5904_v27 }
 0x355   :  { %8694 = vmatprep.subr.mxu0 %v8969_v48 }
 0x356   :  { %8695 = vmatpush3.msra.mxu0 %v5903_v59 }
 0x357   :  { %8696 = vmatprep.subr.mxu0 %v8969_v48 }
 0x358   :  { %8697 = vmatpush3.msra.mxu0 %v5902_v63 }
 0x359   :  { %8698 = vmatprep.subr.mxu0 %v8969_v48 }
 0x35a   :  { %8699 = vmatpush3.msra.mxu0 %v5901_v16 }
 0x35b   :  { %v5136_v24 = vpop.f32.mrf.mxu1  ;;  %8700 = vmatprep.subr.mxu0 %v8969_v48 }
 0x35c   :  { %8701 = vmatpush3.msra.mxu0 %v5900_v19 }
 0x35d   :  { %v8327_v31 = vpop.f32.mrf.mxu1  ;;  %8702 = vmatprep.subr.mxu0 %v8969_v48 }
 0x35e   :  { %v5062_v61 = vpop.f32.mrf.mxu0  ;;  %8703 = vmatpush3.msra.mxu0 %v5899_v29  ;;  %v5805_v31 = vsel %vm5804_vm2, %v11956_v50, 0.0 }
 0x35f   :  { %v5066_v15 = vadd.f32 %v5062_v61, %v4995_v39  ;;  %8704 = vmatprep.subr.mxu0 %v8969_v48 }
 0x360   :  { %v8292_v25 = vpop.f32.mrf.mxu0  ;;  %8705 = vmatpush3.msra.mxu0 %v5898_v51 }
 0x361   :  { %v11815_v0 = vadd.f32 %v5136_v24, %v5066_v15  ;;  %8706 = vmatprep.subr.mxu0 %v8969_v48  ;;  %v5812_v24 = vsel %vm5804_vm2, %v11953_v52, 0.0  ;;  %v5806_v25 = vrot.slane %v5805_v31, 4 }
 0x362   :  { %8707 = vmatpush3.msra.mxu0 %v5897_v3  ;;  %v5813_v10 = vrot.slane %v5812_v24, 4 }
 0x363   :  { %8708 = vmatprep.subr.mxu0 %v8969_v48  ;;  %v11959_v22 = vadd.f32 %v6675_v6, %v11815_v0 }
 0x364   :  { %8709 = vmatpush3.msra.mxu0 %v5896_v42 }
 0x365   :  { %8748 = vmatprep.subr.mxu0 %v8969_v48  ;;  %v5820_v61 = vsel %vm5804_vm2, %v11959_v22, 0.0 }
 0x37d   :  { %v5294_v47 = vpop.f32.mrf.mxu1 }
 0x37f   :  { %v8397_v26 = vpop.f32.mrf.mxu1 }
 0x380   :  { %v5224_v37 = vpop.f32.mrf.mxu0  ;;  %v5814_v26 = vadd.f32 %v5813_v10, %v5812_v24 }
 0x381   :  { %v5295_v4 = vadd.f32 %v5294_v47, %v5224_v37  ;;  %v5821_v47 = vrot.slane %v5820_v61, 4  ;;  %v5807_v37 = vadd.f32 %v5806_v25, %v5805_v31 }
 0x382   :  { %v8362_v13 = vpop.f32.mrf.mxu0 }
 0x383   :  { %v5815_v13 = vrot.slane %v5814_v26, 2 }
 0x385   :  { %v5816_v5 = vadd.f32 %v5815_v13, %v5814_v26 }
 0x387   :  { %v5817_v20 = vrot.slane %v5816_v5, 1 }
 0x389   :  { %v5818_v53 = vadd.f32 %v5817_v20, %v5816_v5 }
 0x39f   :  { %v5435_v18 = vpop.f32.mrf.mxu1 }
 0x3a1   :  { %v8467_v62 = vpop.f32.mrf.mxu1 }
 0x3a2   :  { %v5364_v56 = vpop.f32.mrf.mxu0  ;;  %v5808_v62 = vrot.slane %v5807_v37, 2 }
 0x3a3   :  { %v5368_v28 = vadd.f32 %v5364_v56, %v5295_v4  ;;  %v5822_v4 = vadd.f32 %v5821_v47, %v5820_v61 }
 0x3a4   :  { %v8432_v34 = vpop.f32.mrf.mxu0 }
 0x3a5   :  { %v11817_v1 = vadd.f32 %v5435_v18, %v5368_v28  ;;  %v5823_v56 = vrot.slane %v5822_v4, 2 }
 0x3a7   :  { %v5824_v49 = vadd.f32 %v5823_v56, %v5822_v4 }
 0x3a9   :  { %v5825_v8 = vrot.slane %v5824_v49, 1 }
 0x3ab   :  { %v5826_v35 = vadd.f32 %v5825_v8, %v5824_v49  ;;  %v5878_v49 = vld [vmem:[%s12217_s4 + $0x1] sm:$0x1]  ;;  %v12276_v8 = vld [vmem:[#allocation5_spill] sm:$0xff] }
 0x3c1   :  { %v11889_v17 = vpop.f32.mrf.mxu1 }
 0x3c3   :  { %v8537_v21 = vpop.f32.mrf.mxu1 }
 0x3c4   :  { %v5508_v38 = vpop.f32.mrf.mxu0 }
 0x3c5   :  { %v5512_v15 = vadd.f32 %v5508_v38, %v11817_v1  ;;  %v5809_v1 = vadd.f32 %v5808_v62, %v5807_v37 }
 0x3c6   :  { %v8502_v40 = vpop.f32.mrf.mxu0 }
 0x3c7   :  { %v5585_v23 = vadd.f32 %v11889_v17, %v5512_v15  ;;  %v5810_v32 = vrot.slane %v5809_v1, 1 }
 0x3c9   :  { %v5811_v33 = vadd.f32 %v5810_v32, %v5809_v1 }
 0x3cb   :  { %v5819_v27 = vadd.f32 %v5818_v53, %v5811_v33 }
 0x3cd   :  { %v5827_v59 = vadd.f32 %v5826_v35, %v5819_v27 }
 0x3e3   :  { %v5725_v54 = vpop.f32.mrf.mxu1 }
 0x3e5   :  { %v5652_v41 = vpop.f32.mrf.mxu0  ;;  %v8607_v58 = vpop.f32.mrf.mxu1 }
 0x3e6   :  { %v5656_v0 = vadd.f32 %v5652_v41, %v5585_v23 }
 0x3e7   :  { %v8572_v39 = vpop.f32.mrf.mxu0 }
 0x3e8   :  { %v5729_v18 = vadd.f32 %v5725_v54, %v5656_v0 }
 0x405   :  { %v5798_v28 = vpop.f32.mrf.mxu0 }
 0x406   :  { %v5802_v34 = vadd.f32 %v5798_v28, %v5729_v18 }
 0x407   :  { %v8642_v57 = vpop.f32.mrf.mxu0 }
 0x408   :  { %v11969_v7 = vadd.f32 %v6675_v6, %v5802_v34 }
 0x40a   :  { %v5828_v45 = vsel %vm5804_vm2, %v11969_v7, 0.0 }
 0x40b   :  { %v5829_v44 = vrot.slane %v5828_v45, 4 }
 0x40d   :  { %v5830_v46 = vadd.f32 %v5829_v44, %v5828_v45  ;;  %v5882_v44 = vld [vmem:[%s12217_s4 + $0x2] sm:$0x1] }
 0x40f   :  { %v5831_v55 = vrot.slane %v5830_v46, 2 }
 0x411   :  { %v5832_v11 = vadd.f32 %v5831_v55, %v5830_v46 }
 0x413   :  { %v5833_v43 = vrot.slane %v5832_v11, 1 }
 0x415   :  { %v5834_v17 = vadd.f32 %v5833_v43, %v5832_v11 }
 0x417   :  { %v5835_v30 = vadd.f32 %v5834_v17, %v5827_v59 }
 0x419   :  { %v5837_v63 = vmul.f32 0.125, %v5835_v30 }
 0x41b   :  { %v5838_v21 = vsub.f32 %v11956_v50, %v5837_v63  ;;  %v5847_v12 = vsub.f32 %v11953_v52, %v5837_v63  ;;  %v5857_v16 = vsub.f32 %v11959_v22, %v5837_v63  ;;  %v5867_v38 = vsub.f32 %v11969_v7, %v5837_v63 }
 0x41d   :  { %v5839_v2 = vmul.f32 %v5838_v21, %v5838_v21  ;;  %v5848_v19 = vmul.f32 %v5847_v12, %v5847_v12  ;;  %v5858_v40 = vmul.f32 %v5857_v16, %v5857_v16  ;;  %v5868_v14 = vmul.f32 %v5867_v38, %v5867_v38  ;;  %v6769_v21 = vld [vmem:[%s12218_s5 + $0x168] sm:$0xff]  ;;  %v6768_v16 = vld [vmem:[%s12218_s5 + $0x160] sm:$0xff] }
 0x41e   :  { %v6785_v12 = vld [vmem:[%s12218_s5 + $0x1e8] sm:$0xff]  ;;  %v6784_v38 = vld [vmem:[%s12218_s5 + $0x1e0] sm:$0xff] }
 0x41f   :  { %v5840_v29 = vsel %vm5804_vm2, %v5839_v2, 0.0  ;;  %v5849_v9 = vsel %vm5804_vm2, %v5848_v19, 0.0  ;;  %v5859_v51 = vsel %vm5804_vm2, %v5858_v40, 0.0  ;;  %v5869_v36 = vsel %vm5804_vm2, %v5868_v14, 0.0  ;;  %v6767_v2 = vld [vmem:[%s12218_s5 + $0x158] sm:$0xff]  ;;  %v6766_v40 = vld [vmem:[%s12218_s5 + $0x150] sm:$0xff] }
 0x420   :  { %v5841_v3 = vrot.slane %v5840_v29, 4  ;;  %v5850_v60 = vrot.slane %v5849_v9, 4  ;;  %v5860_v42 = vrot.slane %v5859_v51, 4  ;;  %v5870_v54 = vrot.slane %v5869_v36, 4  ;;  %v6783_v19 = vld [vmem:[%s12218_s5 + $0x1d8] sm:$0xff]  ;;  %v6782_v14 = vld [vmem:[%s12218_s5 + $0x1d0] sm:$0xff] }
 0x422   :  { %v5842_v41 = vadd.f32 %v5841_v3, %v5840_v29  ;;  %v5851_v58 = vadd.f32 %v5850_v60, %v5849_v9  ;;  %v5861_v39 = vadd.f32 %v5860_v42, %v5859_v51  ;;  %v5871_v6 = vadd.f32 %v5870_v54, %v5869_v36  ;;  %v6765_v29 = vld [vmem:[%s12218_s5 + $0x148] sm:$0xff]  ;;  %v6764_v51 = vld [vmem:[%s12218_s5 + $0x140] sm:$0xff]  ;;  %v6763_v3 = vld [vmem:[%s12218_s5 + $0x138] sm:$0xff] }
 0x423   :  { %v6781_v9 = vld [vmem:[%s12218_s5 + $0x1c8] sm:$0xff]  ;;  %v6780_v36 = vld [vmem:[%s12218_s5 + $0x1c0] sm:$0xff]  ;;  %v6779_v60 = vld [vmem:[%s12218_s5 + $0x1b8] sm:$0xff] }
 0x424   :  { %v5843_v24 = vrot.slane %v5842_v41, 2  ;;  %v5852_v31 = vrot.slane %v5851_v58, 2  ;;  %v5862_v61 = vrot.slane %v5861_v39, 2  ;;  %v5872_v15 = vrot.slane %v5871_v6, 2  ;;  %v6762_v42 = vld [vmem:[%s12218_s5 + $0x130] sm:$0xff] }
 0x425   :  { %v6778_v54 = vld [vmem:[%s12218_s5 + $0x1b0] sm:$0xff] }
 0x426   :  { %v5844_v10 = vadd.f32 %v5843_v24, %v5842_v41  ;;  %v5853_v25 = vadd.f32 %v5852_v31, %v5851_v58  ;;  %v5863_v47 = vadd.f32 %v5862_v61, %v5861_v39  ;;  %v5873_v23 = vadd.f32 %v5872_v15, %v5871_v6  ;;  %v6761_v41 = vld [vmem:[%s12218_s5 + $0x128] sm:$0xff]  ;;  %v6760_v39 = vld [vmem:[%s12218_s5 + $0x120] sm:$0xff]  ;;  %v6759_v24 = vld [vmem:[%s12218_s5 + $0x118] sm:$0xff] }
 0x427   :  { %v6777_v58 = vld [vmem:[%s12218_s5 + $0x1a8] sm:$0xff]  ;;  %v6776_v6 = vld [vmem:[%s12218_s5 + $0x1a0] sm:$0xff]  ;;  %v6775_v31 = vld [vmem:[%s12218_s5 + $0x198] sm:$0xff] }
 0x428   :  { %v5845_v26 = vrot.slane %v5844_v10, 1  ;;  %v5854_v0 = vrot.slane %v5853_v25, 1  ;;  %v5864_v37 = vrot.slane %v5863_v47, 1  ;;  %v5874_v18 = vrot.slane %v5873_v23, 1  ;;  %v6758_v61 = vld [vmem:[%s12218_s5 + $0x110] sm:$0xff] }
 0x429   :  { %v6774_v15 = vld [vmem:[%s12218_s5 + $0x190] sm:$0xff] }
 0x42a   :  { %v5846_v4 = vadd.f32 %v5845_v26, %v5844_v10  ;;  %v5855_v13 = vadd.f32 %v5854_v0, %v5853_v25  ;;  %v5865_v56 = vadd.f32 %v5864_v37, %v5863_v47  ;;  %v5875_v34 = vadd.f32 %v5874_v18, %v5873_v23  ;;  %v6757_v25 = vld [vmem:[%s12218_s5 + $0x108] sm:$0xff]  ;;  %v6772_v26 = vld [vmem:[%s12218_s5 + $0x180] sm:$0xff] }
 0x42b   :  { %v6773_v47 = vld [vmem:[%s12218_s5 + $0x188] sm:$0xff] }
 0x42c   :  { %v5856_v62 = vadd.f32 %v5855_v13, %v5846_v4  ;;  %v6275_v4 = vld [vmem:[%s12219_s6 + $0x78] sm:$0xff]  ;;  %v6274_v13 = vld [vmem:[%s12219_s6 + $0x70] sm:$0xff]  ;;  %v6273_v18 = vld [vmem:[%s12219_s6 + $0x68] sm:$0xff] }
 0x42e   :  { %v5866_v28 = vadd.f32 %v5865_v56, %v5856_v62  ;;  %v6272_v62 = vld [vmem:[%s12219_s6 + $0x60] sm:$0xff]  ;;  %v6271_v56 = vld [vmem:[%s12219_s6 + $0x58] sm:$0xff] }
 0x430   :  { %v5876_v5 = vadd.f32 %v5875_v34, %v5866_v28  ;;  %v6270_v28 = vld [vmem:[%s12219_s6 + $0x50] sm:$0xff]  ;;  %v6269_v34 = vld [vmem:[%s12219_s6 + $0x48] sm:$0xff] }
 0x432   :  { %v5877_v57 = vmul.f32 0.125, %v5876_v5  ;;  %v6268_v5 = vld [vmem:[%s12219_s6 + $0x40] sm:$0xff] }
 0x434   :  { %v5879_v1 = vadd.f32 1e-05, %v5877_v57  ;;  %v6267_v57 = vld [vmem:[%s12219_s6 + $0x38] sm:$0xff] }
 0x436   :  { %8823 = vrsqrt.f32 %v5879_v1  ;;  %v6266_v1 = vld [vmem:[%s12219_s6 + $0x30] sm:$0xff] }
 0x443   :  { %v8824_v45 = vpop.eup %8823 }
 0x444   :  { %v5881_v20 = vmul.f32 %v8824_v45, %v5878_v49  ;;  %v6265_v49 = vld [vmem:[%s12219_s6 + $0x28] sm:$0xff]  ;;  %v6264_v45 = vld [vmem:[%s12219_s6 + $0x20] sm:$0xff] }
 0x446   :  { %v5883_v32 = vmul.f32 %v5881_v20, %v5837_v63  ;;  %v11988_v46 = vrot.slane %v5881_v20, %v12276_v8  ;;  %v6786_v63 = vld [vmem:[%s12218_s5 + $0x1f0] sm:$0xff]  ;;  %v6263_v20 = vld [vmem:[%s12219_s6 + $0x18] sm:$0xff] }
 0x448   :  { %v6163_v53 = vmul.f32 %v11988_v46, %v11969_v7  ;;  %v5884_v55 = vsub.f32 %v5882_v44, %v5883_v32  ;;  %v5912_v35 = vmul.f32 %v11988_v46, %v11953_v52  ;;  %v5889_v11 = vmul.f32 %v11988_v46, %v11956_v50  ;;  %v6771_v7 = vld [vmem:[%s12218_s5 + $0x178] sm:$0xff]  ;;  %v6770_v50 = vld [vmem:[%s12218_s5 + $0x170] sm:$0xff]  ;;  %v6261_v32 = vld [vmem:[%s12219_s6 + $0x8] sm:$0xff] }
 0x449   :  { %v6787_v52 = vld [vmem:[%s12218_s5 + $0x1f8] sm:$0xff]  ;;  %v6072_v10 = vmul.f32 %v11988_v46, %v11959_v22  ;;  %v6756_v22 = vld [vmem:[%s12218_s5 + $0x100] sm:$0xff]  ;;  %v6262_v44 = vld [vmem:[%s12219_s6 + $0x10] sm:$0xff] }
 0x44a   :  { %v11993_v33 = vrot.slane %v5884_v55, %v12276_v8  ;;  %v6260_v8 = vld [vmem:[%s12219_s6] sm:$0xff] }
 0x44c   :  { %v5913_v27 = vadd.f32 %v5912_v35, %v11993_v33  ;;  %v5894_v43 = vadd.f32 %v11993_v33, %v5889_v11  ;;  %v12002_v59 = vadd.f32 %v6163_v53, %v11993_v33  ;;  %v6073_v23 = vadd.f32 %v6072_v10, %v11993_v33 }
 0x44e   :  { %v5914_v17 = vmax.f32 %v5913_v27, 0.0  ;;  %v5895_v30 = vmax.f32 %v5894_v43, 0.0  ;;  %v6074_v0 = vmax.f32 %v6073_v23, 0.0  ;;  %v6165_v37 = vmax.f32 %v12002_v59, 0.0  ;;  %v6788_v59 = vld [vmem:[%s12220_s7] ss:$0 sm:$0xff] }
 0x450   :  { %8676 = vmatmul.mubr.f32.vlgmr.msra.gmra.mxu1 %v5914_v17  ;;  %8711 = vmatmul.mubr.f32.vlgmr.msra.gmra.mxu0 %v5895_v30 }
 0x451   :  { %8714 = vmatpush3.msra.mxu1 %v6771_v7  ;;  %8749 = vmatpush3.msra.mxu0 %v6787_v52  ;;  %v6789_v52 = vld [vmem:[%s12220_s7 + $0x1] ss:$0 sm:$0xff] }
 0x452   :  { %8715 = vmatprep.subr.mxu1 %v8969_v48  ;;  %8750 = vmatprep.subr.mxu0 %v8969_v48 }
 0x453   :  { %8716 = vmatpush3.msra.mxu1 %v6770_v50  ;;  %8751 = vmatpush3.msra.mxu0 %v6786_v63 }
 0x454   :  { %8717 = vmatprep.subr.mxu1 %v8969_v48  ;;  %8752 = vmatprep.subr.mxu0 %v8969_v48 }
 0x455   :  { %8718 = vmatpush3.msra.mxu1 %v6769_v21  ;;  %8753 = vmatpush3.msra.mxu0 %v6785_v12 }
 0x456   :  { %8719 = vmatprep.subr.mxu1 %v8969_v48  ;;  %8754 = vmatprep.subr.mxu0 %v8969_v48 }
 0x457   :  { %8720 = vmatpush3.msra.mxu1 %v6768_v16  ;;  %8755 = vmatpush3.msra.mxu0 %v6784_v38 }
 0x458   :  { %8721 = vmatprep.subr.mxu1 %v8969_v48  ;;  %8756 = vmatprep.subr.mxu0 %v8969_v48 }
 0x459   :  { %8722 = vmatpush3.msra.mxu1 %v6767_v2  ;;  %8757 = vmatpush3.msra.mxu0 %v6783_v19 }
 0x45a   :  { %8723 = vmatprep.subr.mxu1 %v8969_v48  ;;  %8758 = vmatprep.subr.mxu0 %v8969_v48 }
 0x45b   :  { %8724 = vmatpush3.msra.mxu1 %v6766_v40  ;;  %8759 = vmatpush3.msra.mxu0 %v6782_v14 }
 0x45c   :  { %8725 = vmatprep.subr.mxu1 %v8969_v48  ;;  %8760 = vmatprep.subr.mxu0 %v8969_v48 }
 0x45d   :  { %8726 = vmatpush3.msra.mxu1 %v6765_v29  ;;  %8761 = vmatpush3.msra.mxu0 %v6781_v9 }
 0x45e   :  { %8727 = vmatprep.subr.mxu1 %v8969_v48  ;;  %8762 = vmatprep.subr.mxu0 %v8969_v48 }
 0x45f   :  { %8728 = vmatpush3.msra.mxu1 %v6764_v51  ;;  %8763 = vmatpush3.msra.mxu0 %v6780_v36 }
 0x460   :  { %8729 = vmatprep.subr.mxu1 %v8969_v48  ;;  %8764 = vmatprep.subr.mxu0 %v8969_v48 }
 0x461   :  { %8730 = vmatpush3.msra.mxu1 %v6763_v3  ;;  %8765 = vmatpush3.msra.mxu0 %v6779_v60 }
 0x462   :  { %8731 = vmatprep.subr.mxu1 %v8969_v48  ;;  %8766 = vmatprep.subr.mxu0 %v8969_v48 }
 0x463   :  { %8732 = vmatpush3.msra.mxu1 %v6762_v42  ;;  %8767 = vmatpush3.msra.mxu0 %v6778_v54 }
 0x464   :  { %8733 = vmatprep.subr.mxu1 %v8969_v48  ;;  %8768 = vmatprep.subr.mxu0 %v8969_v48 }
 0x465   :  { %8734 = vmatpush3.msra.mxu1 %v6761_v41  ;;  %8769 = vmatpush3.msra.mxu0 %v6777_v58 }
 0x466   :  { %8735 = vmatprep.subr.mxu1 %v8969_v48  ;;  %8770 = vmatprep.subr.mxu0 %v8969_v48 }
 0x467   :  { %8736 = vmatpush3.msra.mxu1 %v6760_v39  ;;  %8771 = vmatpush3.msra.mxu0 %v6776_v6 }
 0x468   :  { %8737 = vmatprep.subr.mxu1 %v8969_v48  ;;  %8772 = vmatprep.subr.mxu0 %v8969_v48 }
 0x469   :  { %8738 = vmatpush3.msra.mxu1 %v6759_v24  ;;  %8773 = vmatpush3.msra.mxu0 %v6775_v31 }
 0x46a   :  { %8739 = vmatprep.subr.mxu1 %v8969_v48  ;;  %8774 = vmatprep.subr.mxu0 %v8969_v48 }
 0x46b   :  { %8740 = vmatpush3.msra.mxu1 %v6758_v61  ;;  %8775 = vmatpush3.msra.mxu0 %v6774_v15 }
 0x46c   :  { %8741 = vmatprep.subr.mxu1 %v8969_v48  ;;  %8776 = vmatprep.subr.mxu0 %v8969_v48 }
 0x46d   :  { %8742 = vmatpush3.msra.mxu1 %v6757_v25  ;;  %8777 = vmatpush3.msra.mxu0 %v6773_v47 }
 0x46e   :  { %8743 = vmatprep.subr.mxu1 %v8969_v48  ;;  %8778 = vmatprep.subr.mxu0 %v8969_v48 }
 0x46f   :  { %8744 = vmatpush3.msra.mxu1 %v6756_v22  ;;  %8745 = vmatprep.mubr.msk.f32.mxu1 %vm8970_vm1, %v8969_v48 }
 0x470   :  { %8779 = vmatpush3.msra.mxu0 %v6772_v26  ;;  %8780 = vmatprep.mubr.msk.f32.mxu0 %vm8970_vm1, %v8969_v48 }
 0x471   :  { %8746 = vmatmul.mubr.f32.vlgmr.msra.gmra.mxu1 %v6074_v0  ;;  %8781 = vmatmul.mubr.f32.vlgmr.msra.gmra.mxu0 %v6165_v37 }
 0x472   :  { %8783 = vmatprep.subr.mxu1 %v8969_v48  ;;  %8815 = vmatprep.mubr.msk.f32.mxu1 %vm8970_vm1, %v8969_v48 }
 0x473   :  { %8784 = vmatpush3.msra.mxu1 %v6275_v4 }
 0x474   :  { %8785 = vmatprep.subr.mxu1 %v8969_v48 }
 0x475   :  { %8786 = vmatpush3.msra.mxu1 %v6274_v13 }
 0x476   :  { %8787 = vmatprep.subr.mxu1 %v8969_v48 }
 0x477   :  { %8788 = vmatpush3.msra.mxu1 %v6273_v18 }
 0x478   :  { %8789 = vmatprep.subr.mxu1 %v8969_v48 }
 0x479   :  { %8790 = vmatpush3.msra.mxu1 %v6272_v62 }
 0x47a   :  { %8791 = vmatprep.subr.mxu1 %v8969_v48 }
 0x47b   :  { %8792 = vmatpush3.msra.mxu1 %v6271_v56 }
 0x47c   :  { %8793 = vmatprep.subr.mxu1 %v8969_v48 }
 0x47d   :  { %8794 = vmatpush3.msra.mxu1 %v6270_v28 }
 0x47e   :  { %8795 = vmatprep.subr.mxu1 %v8969_v48 }
 0x47f   :  { %8796 = vmatpush3.msra.mxu1 %v6269_v34 }
 0x480   :  { %8797 = vmatprep.subr.mxu1 %v8969_v48 }
 0x481   :  { %8798 = vmatpush3.msra.mxu1 %v6268_v5 }
 0x482   :  { %8799 = vmatprep.subr.mxu1 %v8969_v48 }
 0x483   :  { %8800 = vmatpush3.msra.mxu1 %v6267_v57 }
 0x484   :  { %8801 = vmatprep.subr.mxu1 %v8969_v48 }
 0x485   :  { %8802 = vmatpush3.msra.mxu1 %v6266_v1 }
 0x486   :  { %8803 = vmatprep.subr.mxu1 %v8969_v48 }
 0x487   :  { %8804 = vmatpush3.msra.mxu1 %v6265_v49 }
 0x488   :  { %8805 = vmatprep.subr.mxu1 %v8969_v48 }
 0x489   :  { %8806 = vmatpush3.msra.mxu1 %v6264_v45 }
 0x48a   :  { %8807 = vmatprep.subr.mxu1 %v8969_v48 }
 0x48b   :  { %8808 = vmatpush3.msra.mxu1 %v6263_v20 }
 0x48c   :  { %8809 = vmatprep.subr.mxu1 %v8969_v48 }
 0x48d   :  { %8810 = vmatpush3.msra.mxu1 %v6262_v44 }
 0x48e   :  { %8811 = vmatprep.subr.mxu1 %v8969_v48 }
 0x48f   :  { %8812 = vmatpush3.msra.mxu1 %v6261_v32 }
 0x490   :  { %8813 = vmatprep.subr.mxu1 %v8969_v48 }
 0x491   :  { %8814 = vmatpush3.msra.mxu1 %v6260_v8 }
 0x510   :  { %v5998_v46 = vpop.f32.mrf.mxu1  ;;  %v6068_v53 = vpop.f32.mrf.mxu0 }
 0x511   :  { %v6069_v35 = vadd.f32 %v6068_v53, %v5998_v46 }
 0x512   :  { %v8677_v55 = vpop.f32.mrf.mxu1  ;;  %v8712_v33 = vpop.f32.mrf.mxu0 }
 0x531   :  { %v6158_v11 = vpop.f32.mrf.mxu1  ;;  %v6249_v27 = vpop.f32.mrf.mxu0 }
 0x532   :  { %v6162_v43 = vadd.f32 %v6158_v11, %v6069_v35 }
 0x533   :  { %v8747_v17 = vpop.f32.mrf.mxu1  ;;  %v8782_v30 = vpop.f32.mrf.mxu0 }
 0x534   :  { %v6253_v48 = vadd.f32 %v6249_v27, %v6162_v43 }
 0x536   :  { %v6259_v7 = vadd.f32 %v6788_v59, %v6253_v48 }
 0x538   :  { %8816 = vmatmul.mubr.f32.vlgmr.msra.gmra.mxu1 %v6259_v7 }
 0x5f8   :  { %v6347_v50 = vpop.f32.mrf.mxu1 }
 0x5f9   :  { %v6348_v63 = vadd.f32 %v6789_v52, %v6347_v50 }
 0x5fa   :  { %v8817_v21 = vpop.f32.mrf.mxu1 }
 0x5fb   :  { %6351 = vst [vmem:[#allocation2] sm:$0x3] %v6348_v63 }
 0x5fc   :  { %8958 = shalt.err (!%p8955_p4)
}
 0x5fd   :  { %6361 = dma.vmem_to_hbm [thread:$0]  %s6359_s2, 32, %s12221_s8, [#allocation3]  }
 0x5fe   :  { %8967 = dma.done.wait [#allocation3], 32  }
 0x5ff   :  { %8968 = vsyncadd [#allocation3], 4294967264 }
 0x600   :  { %6365 = vsyncpa [#allocation3], 1 }

</bundles_post_ra>
